<compile_context>
chip_gen: v6e
topology: v6e:2x2x1
jax: 0.10.0
libtpu: 0.0.40
codegen_flags: <defaults>
</compile_context>

<pallas_src>
import functools
import math

import jax
import jax.numpy as jnp
from jax.experimental import pallas as pl
from jax.experimental.pallas import tpu as pltpu


# ----------------------------------------------------------------------------
# f32 math helpers (used both in-kernel and for the tiny host-side loc layer)
# ----------------------------------------------------------------------------

def _ln(x, g, b, eps=1e-5):
    mu = jnp.mean(x, axis=-1, keepdims=True)
    var = jnp.mean(jnp.square(x - mu), axis=-1, keepdims=True)
    return (x - mu) * jax.lax.rsqrt(var + eps) * g + b


_SQRT_HALF = 0.7071067811865476


def _erf_approx(z):
    # TODO(synk): Mosaic has no erf lowering; exact-erf GELU is realized with
    # Abramowitz-Stegun 7.1.26 (|abs err| <= 1.5e-7), built from exp/div only.
    a1, a2, a3, a4, a5 = 0.254829592, -0.284496736, 1.421413741, -1.453152027, 1.061405429
    pc = 0.3275911
    az = jnp.abs(z)
    t = 1.0 / (1.0 + pc * az)
    poly = ((((a5 * t + a4) * t + a3) * t + a2) * t + a1) * t
    y = 1.0 - poly * jnp.exp(-az * az)
    return jnp.where(z < 0.0, -y, y)


def _gelu_exact(x):
    return 0.5 * x * (1.0 + _erf_approx(x * _SQRT_HALF))


_DN_QKT = (((1,), (1,)), ((), ()))   # A @ B^T (contract last dims)
_DN_MM = (((1,), (0,)), ((), ()))    # standard matmul


# ----------------------------------------------------------------------------
# Fused per-layer kernel: grid = (batch, layer).  The output tile is the
# residual-stream carry (resident in VMEM across the 'arbitrary' layer axis).
# ----------------------------------------------------------------------------

def _cmt_layer_kernel(obj_ref, qpos_ref, mem_ref, ploc_ref, omask_ref, tmask_ref,
                      n1g_ref, n1b_ref, wqkv_ref, bqkv_ref, wl_ref, bl_ref,
                      wfc_ref, bfc_ref, lng_ref, lnb_ref,
                      n2g_ref, n2b_ref, cwq_ref, cbq_ref, cwkv_ref, cbkv_ref,
                      cwo_ref, cbo_ref,
                      n3g_ref, n3b_ref, w1_ref, b1_ref, w2_ref, b2_ref,
                      o_ref, *, nhead, head_dim, spatial_dim, hidden):
    layer = pl.program_id(1)

    @pl.when(layer == 0)
    def _():
        o_ref[0] = obj_ref[0]                       # initialize residual carry

    carry = o_ref[0]                                # (L, H) f32
    x = carry + qpos_ref[0]                         # obj_loc_encoding='same_all'

    keep_o = omask_ref[0] > 0.0                     # (1, Lo)  True = valid key
    keep_t = tmask_ref[0] > 0.0                     # (1, Lt)
    scale = 1.0 / math.sqrt(head_dim)
    bf = jnp.bfloat16

    # --------------- A) spatial self-attention (MultiHeadAttentionSpatial) ---
    tgt2 = _ln(x, n1g_ref[0], n1b_ref[0])           # norm1; residual of the SA block
    big = jnp.dot(tgt2.astype(bf), wqkv_ref[0],
                  preferred_element_type=jnp.float32) + bqkv_ref[0]   # (L, 3H) q|k|v

    # lang-conditioned spatial weights: (tgt2 + txt_cls) @ Wl + bl
    txt_cls = mem_ref[0][0:1, :]                    # (1, H)
    sw_all = jnp.dot((tgt2 + txt_cls).astype(bf), wl_ref[0],
                     preferred_element_type=jnp.float32) + bl_ref[0]  # (L, nhead*(D+1))

    ploc = ploc_ref[0]                              # (D, L, L) lane-dense planes

    ctxs = []
    for h in range(nhead):
        qh = big[:, h * head_dim:(h + 1) * head_dim].astype(bf)
        kh = big[:, hidden + h * head_dim: hidden + (h + 1) * head_dim].astype(bf)
        vh = big[:, 2 * hidden + h * head_dim: 2 * hidden + (h + 1) * head_dim].astype(bf)

        attn = jax.lax.dot_general(qh, kh, _DN_QKT,
                                   preferred_element_type=jnp.float32) * scale  # (L, L)

        # 'cond' spatial logits: sigmoid(<sw[h,l,1:], ploc[l,t,:]> + sw[h,l,0])
        base = h * (spatial_dim + 1)
        loc = sw_all[:, base:base + 1]              # bias column (L, 1)
        for d in range(spatial_dim):
            loc = loc + sw_all[:, base + 1 + d: base + 2 + d] * ploc[d]
        loc = jax.nn.sigmoid(loc)

        # key_padding_mask: attn <- -inf, loc <- 0 on padded keys
        # TODO(synk): fully-masked rows give a uniform softmax here instead of
        # PyTorch's NaN; padded-query rows are not consumed downstream.
        attn = jnp.where(keep_o, attn, -1e30)
        loc = jnp.where(keep_o, loc, 0.0)

        fused = jnp.log(jnp.maximum(loc, 1e-6)) + attn   # log(clamp(., 1e-6)) + attn
        m = jnp.max(fused, axis=-1, keepdims=True)
        e = jnp.exp(fused - m)
        p = e / jnp.sum(e, axis=-1, keepdims=True)

        ctxs.append(jax.lax.dot_general(p.astype(bf), vh, _DN_MM,
                                        preferred_element_type=jnp.float32))    # (L, Dh)

    ctx_all = jnp.concatenate(ctxs, axis=-1)        # merge heads -> (L, H)
    sa = jnp.dot(ctx_all.astype(bf), wfc_ref[0],
                 preferred_element_type=jnp.float32) + bfc_ref[0]
    sa = _ln(sa + tgt2, lng_ref[0], lnb_ref[0])     # layer_norm(fc(.) + residual=q)
    x = x + sa                                      # tgt + dropout1(.)

    # --------------- B) cross attention over text memory ---------------------
    tgt2 = _ln(x, n2g_ref[0], n2b_ref[0])           # norm2
    mem = mem_ref[0]                                # (Lt, H)
    q2 = jnp.dot(tgt2.astype(bf), cwq_ref[0],
                 preferred_element_type=jnp.float32) + cbq_ref[0]      # (L, H)
    kv = jnp.dot(mem.astype(bf), cwkv_ref[0],
                 preferred_element_type=jnp.float32) + cbkv_ref[0]     # (Lt, 2H)

    ctxs = []
    for h in range(nhead):
        qh = q2[:, h * head_dim:(h + 1) * head_dim].astype(bf)
        kh = kv[:, h * head_dim:(h + 1) * head_dim].astype(bf)
        vh = kv[:, hidden + h * head_dim: hidden + (h + 1) * head_dim].astype(bf)

        attn = jax.lax.dot_general(qh, kh, _DN_QKT,
                                   preferred_element_type=jnp.float32) * scale
        attn = jnp.where(keep_t, attn, -1e30)
        m = jnp.max(attn, axis=-1, keepdims=True)
        e = jnp.exp(attn - m)
        p = e / jnp.sum(e, axis=-1, keepdims=True)
        ctxs.append(jax.lax.dot_general(p.astype(bf), vh, _DN_MM,
                                        preferred_element_type=jnp.float32))

    ctx_all = jnp.concatenate(ctxs, axis=-1)
    ca = jnp.dot(ctx_all.astype(bf), cwo_ref[0],
                 preferred_element_type=jnp.float32) + cbo_ref[0]
    x = x + ca                                      # tgt + dropout2(.)

    # --------------- C) FFN: norm3 -> linear1 -> GELU -> linear2 -> +res -----
    tgt2 = _ln(x, n3g_ref[0], n3b_ref[0])
    hmid = jnp.dot(tgt2.astype(bf), w1_ref[0],
                   preferred_element_type=jnp.float32) + b1_ref[0]     # (L, F) in VMEM
    hmid = _gelu_exact(hmid)
    ffn = jnp.dot(hmid.astype(bf), w2_ref[0],
                  preferred_element_type=jnp.float32) + b2_ref[0]
    o_ref[0] = x + ffn                              # tgt + dropout3(.) -> carry


# ----------------------------------------------------------------------------
# Plain-JAX geometry prep (one-time) and forward orchestration
# ----------------------------------------------------------------------------

def calc_pairwise_locs(centers, eps=1e-10):
    """pairwise_rel_type='center', spatial_dim=5, spatial_dist_norm=True."""
    B = centers.shape[0]
    diff = centers[:, :, None, :] - centers[:, None, :, :]        # (B, L, L, 3)
    dist = jnp.sqrt(jnp.sum(diff ** 2, axis=-1) + eps)            # (B, L, L)
    max_d = jnp.max(dist.reshape(B, -1), axis=1)
    norm_d = dist / max_d[:, None, None]
    dist2d = jnp.sqrt(jnp.sum(diff[..., :2] ** 2, axis=-1) + eps)
    return jnp.stack(
        [norm_d, diff[..., 2] / dist, dist2d / dist,
         diff[..., 1] / dist2d, diff[..., 0] / dist2d],
        axis=3,
    )  # (B, L, L, 5)


def cmt_forward(params, txt_embeds, txt_masks, obj_embeds, obj_locs, obj_masks,
                *, nhead, spatial_dim):
    B, Lo, H = obj_embeds.shape
    Lt = txt_embeds.shape[1]
    D = spatial_dim
    S1 = nhead * (D + 1)
    head_dim = H // nhead
    NL = params['wqkv'].shape[0]
    F = params['w1'].shape[2]

    ploc = calc_pairwise_locs(obj_locs[:, :, :3])                 # (B, L, L, D)
    ploc_planes = jnp.transpose(ploc, (0, 3, 1, 2))               # lane-dense (B, D, L, L)
    omask = obj_masks.astype(jnp.float32)[:, None, :]             # (B, 1, Lo)
    tmask = txt_masks.astype(jnp.float32)[:, None, :]             # (B, 1, Lt)

    # loc_layer (Linear(dim_loc,H) + LayerNorm): one-time, tiny -> plain XLA
    qpos = _ln(obj_locs.astype(jnp.float32) @ params['loc_w'] + params['loc_b'],
               params['loc_g'], params['loc_be'])                 # (B, Lo, H)

    kern = functools.partial(_cmt_layer_kernel, nhead=nhead, head_dim=head_dim,
                             spatial_dim=D, hidden=H)

    def act(shape):                                   # per-batch activations
        return pl.BlockSpec(shape, lambda b, l: (b,) + (0,) * (len(shape) - 1))

    def wgt(shape):                                   # per-layer stacked weights
        return pl.BlockSpec(shape, lambda b, l: (l,) + (0,) * (len(shape) - 1))

    in_specs = [
        act((1, Lo, H)),                              # obj_embeds
        act((1, Lo, H)),                              # query_pos
        act((1, Lt, H)),                              # memory (txt)
        act((1, D, Lo, Lo)),                          # pairwise loc planes
        act((1, 1, Lo)),                              # obj key mask
        act((1, 1, Lt)),                              # txt key mask
        wgt((1, 1, H)), wgt((1, 1, H)),               # norm1 g/b
        wgt((1, H, 3 * H)), wgt((1, 1, 3 * H)),       # fused [Wq|Wk|Wv] + bias
        wgt((1, H, S1)), wgt((1, 1, S1)),             # lang_cond_fc
        wgt((1, H, H)), wgt((1, 1, H)),               # self-attn fc
        wgt((1, 1, H)), wgt((1, 1, H)),               # self-attn layer_norm g/b
        wgt((1, 1, H)), wgt((1, 1, H)),               # norm2 g/b
        wgt((1, H, H)), wgt((1, 1, H)),               # cross Wq
        wgt((1, H, 2 * H)), wgt((1, 1, 2 * H)),       # cross fused [Wk|Wv]
        wgt((1, H, H)), wgt((1, 1, H)),               # cross Wo
        wgt((1, 1, H)), wgt((1, 1, H)),               # norm3 g/b
        wgt((1, H, F)), wgt((1, 1, F)),               # linear1
        wgt((1, F, H)), wgt((1, 1, H)),               # linear2
    ]

    out = pl.pallas_call(
        kern,
        grid=(B, NL),
        in_specs=in_specs,
        out_specs=pl.BlockSpec((1, Lo, H), lambda b, l: (b, 0, 0)),
        out_shape=jax.ShapeDtypeStruct((B, Lo, H), jnp.float32),
        compiler_params=pltpu.CompilerParams(
            dimension_semantics=("parallel", "arbitrary")),
    )(obj_embeds.astype(jnp.float32), qpos, txt_embeds.astype(jnp.float32),
      ploc_planes, omask, tmask,
      params['n1g'], params['n1b'], params['wqkv'], params['bqkv'],
      params['wl'], params['bl'], params['wfc'], params['bfc'],
      params['lng'], params['lnb'],
      params['n2g'], params['n2b'], params['cwq'], params['cbq'],
      params['cwkv'], params['cbkv'], params['cwo'], params['cbo'],
      params['n3g'], params['n3b'], params['w1'], params['b1'],
      params['w2'], params['b2'])
    return {'obj_embeds': out}


# ----------------------------------------------------------------------------
# Deterministic parameter init (CMT._init_weights: N(0,0.02), zero bias,
# LayerNorm gamma=1 / beta=0).  Linear weights stored (in, out); matmul weights
# pre-cast bf16 (f32 accumulation in-kernel); biases / LN params stay f32.
# Per-layer tensors stacked along a leading layer axis.
# ----------------------------------------------------------------------------

def init_linear(key, in_dim, out_dim):
    W = 0.02 * jax.random.normal(key, (in_dim, out_dim), jnp.float32)
    b = jnp.zeros((out_dim,), jnp.float32)
    return W, b


def init_layer_params(key, H, nhead, spatial_dim, F):
    ks = jax.random.split(key, 11)
    wq, bq = init_linear(ks[0], H, H)                               # self-attn w_qs
    wk, bk = init_linear(ks[1], H, H)
    wv, bv = init_linear(ks[2], H, H)
    wl, bl = init_linear(ks[3], H, nhead * (spatial_dim + 1))       # lang_cond_fc
    wfc, bfc = init_linear(ks[4], H, H)                             # self-attn fc
    cwq, cbq = init_linear(ks[5], H, H)                             # cross-attn
    cwk, cbk = init_linear(ks[6], H, H)
    cwv, cbv = init_linear(ks[7], H, H)
    cwo, cbo = init_linear(ks[8], H, H)
    w1, b1 = init_linear(ks[9], H, F)
    w2, b2 = init_linear(ks[10], F, H)
    ones = jnp.ones((1, H), jnp.float32)
    zeros = jnp.zeros((1, H), jnp.float32)
    return {
        'n1g': ones, 'n1b': zeros,
        'wqkv': jnp.concatenate([wq, wk, wv], axis=1).astype(jnp.bfloat16),
        'bqkv': jnp.concatenate([bq, bk, bv]).reshape(1, -1),
        'wl': wl.astype(jnp.bfloat16), 'bl': bl.reshape(1, -1),
        'wfc': wfc.astype(jnp.bfloat16), 'bfc': bfc.reshape(1, H),
        'lng': ones, 'lnb': zeros,
        'n2g': ones, 'n2b': zeros,
        'cwq': cwq.astype(jnp.bfloat16), 'cbq': cbq.reshape(1, H),
        'cwkv': jnp.concatenate([cwk, cwv], axis=1).astype(jnp.bfloat16),
        'cbkv': jnp.concatenate([cbk, cbv]).reshape(1, 2 * H),
        'cwo': cwo.astype(jnp.bfloat16), 'cbo': cbo.reshape(1, H),
        'n3g': ones, 'n3b': zeros,
        'w1': w1.astype(jnp.bfloat16), 'b1': b1.reshape(1, F),
        'w2': w2.astype(jnp.bfloat16), 'b2': b2.reshape(1, H),
    }


def init_params(key, H, nhead, spatial_dim, F, num_layers, dim_loc):
    keys = jax.random.split(key, num_layers + 1)
    loc_w, loc_b = init_linear(keys[0], dim_loc, H)
    per_layer = [init_layer_params(keys[i + 1], H, nhead, spatial_dim, F)
                 for i in range(num_layers)]
    params = {k: jnp.stack([lp[k] for lp in per_layer], axis=0)
              for k in per_layer[0]}
    params.update({
        'loc_w': loc_w, 'loc_b': loc_b.reshape(1, H),
        'loc_g': jnp.ones((1, H), jnp.float32),
        'loc_be': jnp.zeros((1, H), jnp.float32),
    })
    return params


if __name__ == "__main__":
    # Small config consistent with CMTConfig (hidden/heads scaled down).
    H = 64            # hidden_size
    NHEAD = 4         # num_attention_heads
    FFN = 2048        # dim_feedforward (hardcoded in CMT.__init__)
    NUM_LAYERS = 2
    DIM_LOC = 6
    SPATIAL_DIM = 5
    B, Lo, Lt = 2, 16, 8

    key = jax.random.PRNGKey(0)
    k_txt, k_obj, k_loc, k_par = jax.random.split(key, 4)

    txt_embeds = jax.random.normal(k_txt, (B, Lt, H), jnp.float32)
    obj_embeds = jax.random.normal(k_obj, (B, Lo, H), jnp.float32)
    obj_locs = jax.random.normal(k_loc, (B, Lo, DIM_LOC), jnp.float32)

    # boolean masks: True = valid token
    obj_masks = jnp.stack([
        jnp.ones((Lo,), bool),
        jnp.arange(Lo) < 12,
    ])
    txt_masks = jnp.stack([
        jnp.ones((Lt,), bool),
        jnp.arange(Lt) < 6,
    ])

    params = init_params(k_par, H, NHEAD, SPATIAL_DIM, FFN, NUM_LAYERS, DIM_LOC)

    run = jax.jit(functools.partial(cmt_forward, nhead=NHEAD, spatial_dim=SPATIAL_DIM))
    outs = run(params, txt_embeds, txt_masks, obj_embeds, obj_locs, obj_masks)
    obj_out = jax.block_until_ready(outs['obj_embeds'])
    assert obj_out.shape == (B, Lo, H)
    assert bool(jnp.all(jnp.isfinite(obj_out)))
    print("KERNEL_OK")
</pallas_src>

<mosaic_0001>
module attributes {stable_mosaic.version = 11 : i64} {
  func.func @_cmt_layer_kernel(%arg0: i32, %arg1: i32, %arg2: memref<1x16x64xf32, #tpu.memory_space<vmem>>, %arg3: memref<1x16x64xf32, #tpu.memory_space<vmem>>, %arg4: memref<1x8x64xf32, #tpu.memory_space<vmem>>, %arg5: memref<1x5x16x16xf32, #tpu.memory_space<vmem>>, %arg6: memref<1x1x16xf32, #tpu.memory_space<vmem>>, %arg7: memref<1x1x8xf32, #tpu.memory_space<vmem>>, %arg8: memref<1x1x64xf32, #tpu.memory_space<vmem>>, %arg9: memref<1x1x64xf32, #tpu.memory_space<vmem>>, %arg10: memref<1x64x192xbf16, #tpu.memory_space<vmem>>, %arg11: memref<1x1x192xf32, #tpu.memory_space<vmem>>, %arg12: memref<1x64x24xbf16, #tpu.memory_space<vmem>>, %arg13: memref<1x1x24xf32, #tpu.memory_space<vmem>>, %arg14: memref<1x64x64xbf16, #tpu.memory_space<vmem>>, %arg15: memref<1x1x64xf32, #tpu.memory_space<vmem>>, %arg16: memref<1x1x64xf32, #tpu.memory_space<vmem>>, %arg17: memref<1x1x64xf32, #tpu.memory_space<vmem>>, %arg18: memref<1x1x64xf32, #tpu.memory_space<vmem>>, %arg19: memref<1x1x64xf32, #tpu.memory_space<vmem>>, %arg20: memref<1x64x64xbf16, #tpu.memory_space<vmem>>, %arg21: memref<1x1x64xf32, #tpu.memory_space<vmem>>, %arg22: memref<1x64x128xbf16, #tpu.memory_space<vmem>>, %arg23: memref<1x1x128xf32, #tpu.memory_space<vmem>>, %arg24: memref<1x64x64xbf16, #tpu.memory_space<vmem>>, %arg25: memref<1x1x64xf32, #tpu.memory_space<vmem>>, %arg26: memref<1x1x64xf32, #tpu.memory_space<vmem>>, %arg27: memref<1x1x64xf32, #tpu.memory_space<vmem>>, %arg28: memref<1x64x2048xbf16, #tpu.memory_space<vmem>>, %arg29: memref<1x1x2048xf32, #tpu.memory_space<vmem>>, %arg30: memref<1x2048x64xbf16, #tpu.memory_space<vmem>>, %arg31: memref<1x1x64xf32, #tpu.memory_space<vmem>>, %arg32: memref<1x16x64xf32, #tpu.memory_space<vmem>>) attributes {dimension_semantics = [#tpu.dimension_semantics<parallel>, #tpu.dimension_semantics<arbitrary>], iteration_bounds = array<i64: 2, 2>, scalar_prefetch = 0 : i64, scratch_operands = 0 : i64, tpu.core_type = #tpu.core_type<tc>, window_params = [{transform_indices = @transform_0, window_bounds = array<i64: 1, 16, 64>}, {transform_indices = @transform_1, window_bounds = array<i64: 1, 16, 64>}, {transform_indices = @transform_2, window_bounds = array<i64: 1, 8, 64>}, {transform_indices = @transform_3, window_bounds = array<i64: 1, 5, 16, 16>}, {transform_indices = @transform_4, window_bounds = array<i64: 1, 1, 16>}, {transform_indices = @transform_5, window_bounds = array<i64: 1, 1, 8>}, {transform_indices = @transform_6, window_bounds = array<i64: 1, 1, 64>}, {transform_indices = @transform_7, window_bounds = array<i64: 1, 1, 64>}, {transform_indices = @transform_8, window_bounds = array<i64: 1, 64, 192>}, {transform_indices = @transform_9, window_bounds = array<i64: 1, 1, 192>}, {transform_indices = @transform_10, window_bounds = array<i64: 1, 64, 24>}, {transform_indices = @transform_11, window_bounds = array<i64: 1, 1, 24>}, {transform_indices = @transform_12, window_bounds = array<i64: 1, 64, 64>}, {transform_indices = @transform_13, window_bounds = array<i64: 1, 1, 64>}, {transform_indices = @transform_14, window_bounds = array<i64: 1, 1, 64>}, {transform_indices = @transform_15, window_bounds = array<i64: 1, 1, 64>}, {transform_indices = @transform_16, window_bounds = array<i64: 1, 1, 64>}, {transform_indices = @transform_17, window_bounds = array<i64: 1, 1, 64>}, {transform_indices = @transform_18, window_bounds = array<i64: 1, 64, 64>}, {transform_indices = @transform_19, window_bounds = array<i64: 1, 1, 64>}, {transform_indices = @transform_20, window_bounds = array<i64: 1, 64, 128>}, {transform_indices = @transform_21, window_bounds = array<i64: 1, 1, 128>}, {transform_indices = @transform_22, window_bounds = array<i64: 1, 64, 64>}, {transform_indices = @transform_23, window_bounds = array<i64: 1, 1, 64>}, {transform_indices = @transform_24, window_bounds = array<i64: 1, 1, 64>}, {transform_indices = @transform_25, window_bounds = array<i64: 1, 1, 64>}, {transform_indices = @transform_26, window_bounds = array<i64: 1, 64, 2048>}, {transform_indices = @transform_27, window_bounds = array<i64: 1, 1, 2048>}, {transform_indices = @transform_28, window_bounds = array<i64: 1, 2048, 64>}, {transform_indices = @transform_29, window_bounds = array<i64: 1, 1, 64>}, {transform_indices = @transform_30, window_bounds = array<i64: 1, 16, 64>}]} {
    %c0_i32 = arith.constant 0 : i32
    %0 = arith.cmpi eq, %arg1, %c0_i32 : i32
    %1 = arith.extui %0 : i1 to i32
    %c0_i32_0 = arith.constant 0 : i32
    %2 = arith.cmpi ne, %1, %c0_i32_0 : i32
    scf.if %2 {
      %c0_201 = arith.constant 0 : index
      %c0_202 = arith.constant 0 : index
      %c0_203 = arith.constant 0 : index
      %614 = vector.load %arg2[%c0_201, %c0_202, %c0_203] : memref<1x16x64xf32, #tpu.memory_space<vmem>>, vector<1x16x64xf32>
      %615 = vector.shape_cast %614 : vector<1x16x64xf32> to vector<16x64xf32>
      %c0_204 = arith.constant 0 : index
      %c0_205 = arith.constant 0 : index
      %c0_206 = arith.constant 0 : index
      %616 = vector.load %arg32[%c0_204, %c0_205, %c0_206] : memref<1x16x64xf32, #tpu.memory_space<vmem>>, vector<1x16x64xf32>
      %617 = vector.shape_cast %616 : vector<1x16x64xf32> to vector<16x64xf32>
      %618 = vector.shape_cast %615 : vector<16x64xf32> to vector<1x16x64xf32>
      tpu.vector_store %arg32[%c0_204, %c0_205, %c0_206], %618 {strides = array<i32>} : memref<1x16x64xf32, #tpu.memory_space<vmem>>, vector<1x16x64xf32>,
    } else {
    }
    %c0 = arith.constant 0 : index
    %c0_1 = arith.constant 0 : index
    %c0_2 = arith.constant 0 : index
    %3 = vector.load %arg32[%c0, %c0_1, %c0_2] : memref<1x16x64xf32, #tpu.memory_space<vmem>>, vector<1x16x64xf32>
    %4 = vector.shape_cast %3 : vector<1x16x64xf32> to vector<16x64xf32>
    %c0_3 = arith.constant 0 : index
    %c0_4 = arith.constant 0 : index
    %c0_5 = arith.constant 0 : index
    %5 = vector.load %arg3[%c0_3, %c0_4, %c0_5] : memref<1x16x64xf32, #tpu.memory_space<vmem>>, vector<1x16x64xf32>
    %6 = vector.shape_cast %5 : vector<1x16x64xf32> to vector<16x64xf32>
    %7 = arith.addf %4, %6 : vector<16x64xf32>
    %c0_6 = arith.constant 0 : index
    %c0_7 = arith.constant 0 : index
    %c0_8 = arith.constant 0 : index
    %8 = vector.load %arg6[%c0_6, %c0_7, %c0_8] : memref<1x1x16xf32, #tpu.memory_space<vmem>>, vector<1x1x16xf32>
    %9 = vector.shape_cast %8 : vector<1x1x16xf32> to vector<1x16xf32>
    %cst = arith.constant 0.000000e+00 : f32
    %10 = vector.broadcast %cst : f32 to vector<1x16xf32>
    %11 = arith.cmpf ogt, %9, %10 : vector<1x16xf32>
    %c0_9 = arith.constant 0 : index
    %c0_10 = arith.constant 0 : index
    %c0_11 = arith.constant 0 : index
    %12 = vector.load %arg7[%c0_9, %c0_10, %c0_11] : memref<1x1x8xf32, #tpu.memory_space<vmem>>, vector<1x1x8xf32>
    %13 = vector.shape_cast %12 : vector<1x1x8xf32> to vector<1x8xf32>
    %cst_12 = arith.constant 0.000000e+00 : f32
    %14 = vector.broadcast %cst_12 : f32 to vector<1x8xf32>
    %15 = arith.cmpf ogt, %13, %14 : vector<1x8xf32>
    %c0_13 = arith.constant 0 : index
    %c0_14 = arith.constant 0 : index
    %c0_15 = arith.constant 0 : index
    %16 = vector.load %arg8[%c0_13, %c0_14, %c0_15] : memref<1x1x64xf32, #tpu.memory_space<vmem>>, vector<1x1x64xf32>
    %17 = vector.shape_cast %16 : vector<1x1x64xf32> to vector<1x64xf32>
    %c0_16 = arith.constant 0 : index
    %c0_17 = arith.constant 0 : index
    %c0_18 = arith.constant 0 : index
    %18 = vector.load %arg9[%c0_16, %c0_17, %c0_18] : memref<1x1x64xf32, #tpu.memory_space<vmem>>, vector<1x1x64xf32>
    %19 = vector.shape_cast %18 : vector<1x1x64xf32> to vector<1x64xf32>
    %cst_19 = arith.constant dense<0.000000e+00> : vector<16xf32>
    %20 = vector.multi_reduction <add>, %7, %cst_19 [1] : vector<16x64xf32> to vector<16xf32>
    %21 = vector.shape_cast %20 : vector<16xf32> to vector<16x1xf32>
    %cst_20 = arith.constant 6.400000e+01 : f32
    %22 = vector.broadcast %cst_20 : f32 to vector<16x1xf32>
    %23 = arith.divf %21, %22 : vector<16x1xf32>
    %24 = vector.broadcast %23 : vector<16x1xf32> to vector<16x64xf32>
    %25 = arith.subf %7, %24 : vector<16x64xf32>
    %26 = arith.mulf %25, %25 : vector<16x64xf32>
    %cst_21 = arith.constant dense<0.000000e+00> : vector<16xf32>
    %27 = vector.multi_reduction <add>, %26, %cst_21 [1] : vector<16x64xf32> to vector<16xf32>
    %28 = vector.shape_cast %27 : vector<16xf32> to vector<16x1xf32>
    %cst_22 = arith.constant 6.400000e+01 : f32
    %29 = vector.broadcast %cst_22 : f32 to vector<16x1xf32>
    %30 = arith.divf %28, %29 : vector<16x1xf32>
    %31 = vector.broadcast %23 : vector<16x1xf32> to vector<16x64xf32>
    %32 = arith.subf %7, %31 : vector<16x64xf32>
    %cst_23 = arith.constant 9.99999974E-6 : f32
    %33 = vector.broadcast %cst_23 : f32 to vector<16x1xf32>
    %34 = arith.addf %30, %33 : vector<16x1xf32>
    %35 = math.rsqrt %34 : vector<16x1xf32>
    %36 = vector.broadcast %35 : vector<16x1xf32> to vector<16x64xf32>
    %37 = arith.mulf %32, %36 : vector<16x64xf32>
    %38 = vector.broadcast %17 : vector<1x64xf32> to vector<16x64xf32>
    %39 = arith.mulf %37, %38 : vector<16x64xf32>
    %40 = vector.broadcast %19 : vector<1x64xf32> to vector<16x64xf32>
    %41 = arith.addf %39, %40 : vector<16x64xf32>
    %42 = arith.truncf %41 : vector<16x64xf32> to vector<16x64xbf16>
    %c0_24 = arith.constant 0 : index
    %c0_25 = arith.constant 0 : index
    %c0_26 = arith.constant 0 : index
    %43 = vector.load %arg10[%c0_24, %c0_25, %c0_26] : memref<1x64x192xbf16, #tpu.memory_space<vmem>>, vector<1x64x192xbf16>
    %44 = vector.shape_cast %43 : vector<1x64x192xbf16> to vector<64x192xbf16>
    %cst_27 = arith.constant dense<0.000000e+00> : vector<16x192xf32>
    %45 = tpu.matmul %42, %44, %cst_27 {dimension_numbers = #tpu.dot_dimension_numbers<[1], [0], [0], [1], [0, 0, 1, 1], [], []>} : vector<16x64xbf16>, vector<64x192xbf16>, vector<16x192xf32> -> vector<16x192xf32>
    %c0_28 = arith.constant 0 : index
    %c0_29 = arith.constant 0 : index
    %c0_30 = arith.constant 0 : index
    %46 = vector.load %arg11[%c0_28, %c0_29, %c0_30] : memref<1x1x192xf32, #tpu.memory_space<vmem>>, vector<1x1x192xf32>
    %47 = vector.shape_cast %46 : vector<1x1x192xf32> to vector<1x192xf32>
    %48 = vector.broadcast %47 : vector<1x192xf32> to vector<16x192xf32>
    %49 = arith.addf %45, %48 : vector<16x192xf32>
    %c0_31 = arith.constant 0 : index
    %c0_32 = arith.constant 0 : index
    %c0_33 = arith.constant 0 : index
    %50 = vector.load %arg4[%c0_31, %c0_32, %c0_33] : memref<1x8x64xf32, #tpu.memory_space<vmem>>, vector<1x8x64xf32>
    %51 = vector.shape_cast %50 : vector<1x8x64xf32> to vector<8x64xf32>
    %52 = vector.extract_strided_slice %51 {offsets = [0, 0], sizes = [1, 64], strides = [1, 1]} : vector<8x64xf32> to vector<1x64xf32>
    %53 = vector.broadcast %52 : vector<1x64xf32> to vector<16x64xf32>
    %54 = arith.addf %41, %53 : vector<16x64xf32>
    %55 = arith.truncf %54 : vector<16x64xf32> to vector<16x64xbf16>
    %c0_34 = arith.constant 0 : index
    %c0_35 = arith.constant 0 : index
    %c0_36 = arith.constant 0 : index
    %56 = vector.load %arg12[%c0_34, %c0_35, %c0_36] : memref<1x64x24xbf16, #tpu.memory_space<vmem>>, vector<1x64x24xbf16>
    %57 = vector.shape_cast %56 : vector<1x64x24xbf16> to vector<64x24xbf16>
    %cst_37 = arith.constant dense<0.000000e+00> : vector<16x24xf32>
    %58 = tpu.matmul %55, %57, %cst_37 {dimension_numbers = #tpu.dot_dimension_numbers<[1], [0], [0], [1], [0, 0, 1, 1], [], []>} : vector<16x64xbf16>, vector<64x24xbf16>, vector<16x24xf32> -> vector<16x24xf32>
    %c0_38 = arith.constant 0 : index
    %c0_39 = arith.constant 0 : index
    %c0_40 = arith.constant 0 : index
    %59 = vector.load %arg13[%c0_38, %c0_39, %c0_40] : memref<1x1x24xf32, #tpu.memory_space<vmem>>, vector<1x1x24xf32>
    %60 = vector.shape_cast %59 : vector<1x1x24xf32> to vector<1x24xf32>
    %61 = vector.broadcast %60 : vector<1x24xf32> to vector<16x24xf32>
    %62 = arith.addf %58, %61 : vector<16x24xf32>
    %c0_41 = arith.constant 0 : index
    %c0_42 = arith.constant 0 : index
    %c0_43 = arith.constant 0 : index
    %c0_44 = arith.constant 0 : index
    %63 = vector.load %arg5[%c0_41, %c0_42, %c0_43, %c0_44] : memref<1x5x16x16xf32, #tpu.memory_space<vmem>>, vector<1x5x16x16xf32>
    %64 = vector.shape_cast %63 : vector<1x5x16x16xf32> to vector<5x16x16xf32>
    %65 = vector.extract_strided_slice %49 {offsets = [0, 0], sizes = [16, 16], strides = [1, 1]} : vector<16x192xf32> to vector<16x16xf32>
    %66 = arith.truncf %65 : vector<16x16xf32> to vector<16x16xbf16>
    %67 = vector.extract_strided_slice %49 {offsets = [0, 64], sizes = [16, 16], strides = [1, 1]} : vector<16x192xf32> to vector<16x16xf32>
    %68 = arith.truncf %67 : vector<16x16xf32> to vector<16x16xbf16>
    %69 = vector.extract_strided_slice %49 {offsets = [0, 128], sizes = [16, 16], strides = [1, 1]} : vector<16x192xf32> to vector<16x16xf32>
    %70 = arith.truncf %69 : vector<16x16xf32> to vector<16x16xbf16>
    %cst_45 = arith.constant dense<0.000000e+00> : vector<16x16xf32>
    %71 = tpu.matmul %66, %68, %cst_45 {dimension_numbers = #tpu.dot_dimension_numbers<[1], [1], [0], [0], [0, 0, 1, 0], [], []>} : vector<16x16xbf16>, vector<16x16xbf16>, vector<16x16xf32> -> vector<16x16xf32>
    %cst_46 = arith.constant 2.500000e-01 : f32
    %72 = vector.broadcast %cst_46 : f32 to vector<16x16xf32>
    %73 = arith.mulf %71, %72 : vector<16x16xf32>
    %74 = vector.extract_strided_slice %62 {offsets = [0, 0], sizes = [16, 1], strides = [1, 1]} : vector<16x24xf32> to vector<16x1xf32>
    %75 = vector.extract_strided_slice %62 {offsets = [0, 1], sizes = [16, 1], strides = [1, 1]} : vector<16x24xf32> to vector<16x1xf32>
    %76 = vector.extract_strided_slice %64 {offsets = [0, 0, 0], sizes = [1, 16, 16], strides = [1, 1, 1]} : vector<5x16x16xf32> to vector<1x16x16xf32>
    %77 = vector.shape_cast %76 : vector<1x16x16xf32> to vector<16x16xf32>
    %78 = vector.broadcast %75 : vector<16x1xf32> to vector<16x16xf32>
    %79 = arith.mulf %78, %77 : vector<16x16xf32>
    %80 = vector.broadcast %74 : vector<16x1xf32> to vector<16x16xf32>
    %81 = arith.addf %80, %79 : vector<16x16xf32>
    %82 = vector.extract_strided_slice %62 {offsets = [0, 2], sizes = [16, 1], strides = [1, 1]} : vector<16x24xf32> to vector<16x1xf32>
    %83 = vector.extract_strided_slice %64 {offsets = [1, 0, 0], sizes = [1, 16, 16], strides = [1, 1, 1]} : vector<5x16x16xf32> to vector<1x16x16xf32>
    %84 = vector.shape_cast %83 : vector<1x16x16xf32> to vector<16x16xf32>
    %85 = vector.broadcast %82 : vector<16x1xf32> to vector<16x16xf32>
    %86 = arith.mulf %85, %84 : vector<16x16xf32>
    %87 = arith.addf %81, %86 : vector<16x16xf32>
    %88 = vector.extract_strided_slice %62 {offsets = [0, 3], sizes = [16, 1], strides = [1, 1]} : vector<16x24xf32> to vector<16x1xf32>
    %89 = vector.extract_strided_slice %64 {offsets = [2, 0, 0], sizes = [1, 16, 16], strides = [1, 1, 1]} : vector<5x16x16xf32> to vector<1x16x16xf32>
    %90 = vector.shape_cast %89 : vector<1x16x16xf32> to vector<16x16xf32>
    %91 = vector.broadcast %88 : vector<16x1xf32> to vector<16x16xf32>
    %92 = arith.mulf %91, %90 : vector<16x16xf32>
    %93 = arith.addf %87, %92 : vector<16x16xf32>
    %94 = vector.extract_strided_slice %62 {offsets = [0, 4], sizes = [16, 1], strides = [1, 1]} : vector<16x24xf32> to vector<16x1xf32>
    %95 = vector.extract_strided_slice %64 {offsets = [3, 0, 0], sizes = [1, 16, 16], strides = [1, 1, 1]} : vector<5x16x16xf32> to vector<1x16x16xf32>
    %96 = vector.shape_cast %95 : vector<1x16x16xf32> to vector<16x16xf32>
    %97 = vector.broadcast %94 : vector<16x1xf32> to vector<16x16xf32>
    %98 = arith.mulf %97, %96 : vector<16x16xf32>
    %99 = arith.addf %93, %98 : vector<16x16xf32>
    %100 = vector.extract_strided_slice %62 {offsets = [0, 5], sizes = [16, 1], strides = [1, 1]} : vector<16x24xf32> to vector<16x1xf32>
    %101 = vector.extract_strided_slice %64 {offsets = [4, 0, 0], sizes = [1, 16, 16], strides = [1, 1, 1]} : vector<5x16x16xf32> to vector<1x16x16xf32>
    %102 = vector.shape_cast %101 : vector<1x16x16xf32> to vector<16x16xf32>
    %103 = vector.broadcast %100 : vector<16x1xf32> to vector<16x16xf32>
    %104 = arith.mulf %103, %102 : vector<16x16xf32>
    %105 = arith.addf %99, %104 : vector<16x16xf32>
    %106 = arith.negf %105 : vector<16x16xf32>
    %107 = math.exp %106 : vector<16x16xf32>
    %cst_47 = arith.constant 1.000000e+00 : f32
    %108 = vector.broadcast %cst_47 : f32 to vector<16x16xf32>
    %109 = arith.addf %108, %107 : vector<16x16xf32>
    %110 = arith.divf %108, %109 : vector<16x16xf32>
    %cst_48 = arith.constant -1.000000e+30 : f32
    %111 = vector.shape_cast %11 : vector<1x16xi1> to vector<1x16xi1>
    %112 = vector.broadcast %111 : vector<1x16xi1> to vector<16x16xi1>
    %113 = vector.broadcast %cst_48 : f32 to vector<16x16xf32>
    %114 = arith.select %112, %73, %113 : vector<16x16xi1>, vector<16x16xf32>
    %cst_49 = arith.constant 0.000000e+00 : f32
    %115 = vector.shape_cast %11 : vector<1x16xi1> to vector<1x16xi1>
    %116 = vector.broadcast %115 : vector<1x16xi1> to vector<16x16xi1>
    %117 = vector.broadcast %cst_49 : f32 to vector<16x16xf32>
    %118 = arith.select %116, %110, %117 : vector<16x16xi1>, vector<16x16xf32>
    %cst_50 = arith.constant 9.99999997E-7 : f32
    %119 = vector.broadcast %cst_50 : f32 to vector<16x16xf32>
    %120 = arith.maximumf %118, %119 : vector<16x16xf32>
    %121 = math.log %120 : vector<16x16xf32>
    %122 = arith.addf %121, %114 : vector<16x16xf32>
    %cst_51 = arith.constant dense<0xFF800000> : vector<16xf32>
    %123 = vector.multi_reduction <maximumf>, %122, %cst_51 [1] : vector<16x16xf32> to vector<16xf32>
    %124 = vector.shape_cast %123 : vector<16xf32> to vector<16x1xf32>
    %125 = vector.broadcast %124 : vector<16x1xf32> to vector<16x16xf32>
    %126 = arith.subf %122, %125 : vector<16x16xf32>
    %127 = math.exp %126 : vector<16x16xf32>
    %cst_52 = arith.constant dense<0.000000e+00> : vector<16xf32>
    %128 = vector.multi_reduction <add>, %127, %cst_52 [1] : vector<16x16xf32> to vector<16xf32>
    %129 = vector.shape_cast %128 : vector<16xf32> to vector<16x1xf32>
    %130 = vector.broadcast %129 : vector<16x1xf32> to vector<16x16xf32>
    %131 = arith.divf %127, %130 : vector<16x16xf32>
    %132 = arith.truncf %131 : vector<16x16xf32> to vector<16x16xbf16>
    %cst_53 = arith.constant dense<0.000000e+00> : vector<16x16xf32>
    %133 = tpu.matmul %132, %70, %cst_53 {dimension_numbers = #tpu.dot_dimension_numbers<[1], [0], [0], [1], [0, 0, 1, 1], [], []>} : vector<16x16xbf16>, vector<16x16xbf16>, vector<16x16xf32> -> vector<16x16xf32>
    %134 = vector.extract_strided_slice %49 {offsets = [0, 16], sizes = [16, 16], strides = [1, 1]} : vector<16x192xf32> to vector<16x16xf32>
    %135 = arith.truncf %134 : vector<16x16xf32> to vector<16x16xbf16>
    %136 = vector.extract_strided_slice %49 {offsets = [0, 80], sizes = [16, 16], strides = [1, 1]} : vector<16x192xf32> to vector<16x16xf32>
    %137 = arith.truncf %136 : vector<16x16xf32> to vector<16x16xbf16>
    %138 = vector.extract_strided_slice %49 {offsets = [0, 144], sizes = [16, 16], strides = [1, 1]} : vector<16x192xf32> to vector<16x16xf32>
    %139 = arith.truncf %138 : vector<16x16xf32> to vector<16x16xbf16>
    %cst_54 = arith.constant dense<0.000000e+00> : vector<16x16xf32>
    %140 = tpu.matmul %135, %137, %cst_54 {dimension_numbers = #tpu.dot_dimension_numbers<[1], [1], [0], [0], [0, 0, 1, 0], [], []>} : vector<16x16xbf16>, vector<16x16xbf16>, vector<16x16xf32> -> vector<16x16xf32>
    %cst_55 = arith.constant 2.500000e-01 : f32
    %141 = vector.broadcast %cst_55 : f32 to vector<16x16xf32>
    %142 = arith.mulf %140, %141 : vector<16x16xf32>
    %143 = vector.extract_strided_slice %62 {offsets = [0, 6], sizes = [16, 1], strides = [1, 1]} : vector<16x24xf32> to vector<16x1xf32>
    %144 = vector.extract_strided_slice %62 {offsets = [0, 7], sizes = [16, 1], strides = [1, 1]} : vector<16x24xf32> to vector<16x1xf32>
    %145 = vector.extract_strided_slice %64 {offsets = [0, 0, 0], sizes = [1, 16, 16], strides = [1, 1, 1]} : vector<5x16x16xf32> to vector<1x16x16xf32>
    %146 = vector.shape_cast %145 : vector<1x16x16xf32> to vector<16x16xf32>
    %147 = vector.broadcast %144 : vector<16x1xf32> to vector<16x16xf32>
    %148 = arith.mulf %147, %146 : vector<16x16xf32>
    %149 = vector.broadcast %143 : vector<16x1xf32> to vector<16x16xf32>
    %150 = arith.addf %149, %148 : vector<16x16xf32>
    %151 = vector.extract_strided_slice %62 {offsets = [0, 8], sizes = [16, 1], strides = [1, 1]} : vector<16x24xf32> to vector<16x1xf32>
    %152 = vector.extract_strided_slice %64 {offsets = [1, 0, 0], sizes = [1, 16, 16], strides = [1, 1, 1]} : vector<5x16x16xf32> to vector<1x16x16xf32>
    %153 = vector.shape_cast %152 : vector<1x16x16xf32> to vector<16x16xf32>
    %154 = vector.broadcast %151 : vector<16x1xf32> to vector<16x16xf32>
    %155 = arith.mulf %154, %153 : vector<16x16xf32>
    %156 = arith.addf %150, %155 : vector<16x16xf32>
    %157 = vector.extract_strided_slice %62 {offsets = [0, 9], sizes = [16, 1], strides = [1, 1]} : vector<16x24xf32> to vector<16x1xf32>
    %158 = vector.extract_strided_slice %64 {offsets = [2, 0, 0], sizes = [1, 16, 16], strides = [1, 1, 1]} : vector<5x16x16xf32> to vector<1x16x16xf32>
    %159 = vector.shape_cast %158 : vector<1x16x16xf32> to vector<16x16xf32>
    %160 = vector.broadcast %157 : vector<16x1xf32> to vector<16x16xf32>
    %161 = arith.mulf %160, %159 : vector<16x16xf32>
    %162 = arith.addf %156, %161 : vector<16x16xf32>
    %163 = vector.extract_strided_slice %62 {offsets = [0, 10], sizes = [16, 1], strides = [1, 1]} : vector<16x24xf32> to vector<16x1xf32>
    %164 = vector.extract_strided_slice %64 {offsets = [3, 0, 0], sizes = [1, 16, 16], strides = [1, 1, 1]} : vector<5x16x16xf32> to vector<1x16x16xf32>
    %165 = vector.shape_cast %164 : vector<1x16x16xf32> to vector<16x16xf32>
    %166 = vector.broadcast %163 : vector<16x1xf32> to vector<16x16xf32>
    %167 = arith.mulf %166, %165 : vector<16x16xf32>
    %168 = arith.addf %162, %167 : vector<16x16xf32>
    %169 = vector.extract_strided_slice %62 {offsets = [0, 11], sizes = [16, 1], strides = [1, 1]} : vector<16x24xf32> to vector<16x1xf32>
    %170 = vector.extract_strided_slice %64 {offsets = [4, 0, 0], sizes = [1, 16, 16], strides = [1, 1, 1]} : vector<5x16x16xf32> to vector<1x16x16xf32>
    %171 = vector.shape_cast %170 : vector<1x16x16xf32> to vector<16x16xf32>
    %172 = vector.broadcast %169 : vector<16x1xf32> to vector<16x16xf32>
    %173 = arith.mulf %172, %171 : vector<16x16xf32>
    %174 = arith.addf %168, %173 : vector<16x16xf32>
    %175 = arith.negf %174 : vector<16x16xf32>
    %176 = math.exp %175 : vector<16x16xf32>
    %cst_56 = arith.constant 1.000000e+00 : f32
    %177 = vector.broadcast %cst_56 : f32 to vector<16x16xf32>
    %178 = arith.addf %177, %176 : vector<16x16xf32>
    %179 = arith.divf %177, %178 : vector<16x16xf32>
    %cst_57 = arith.constant -1.000000e+30 : f32
    %180 = vector.shape_cast %11 : vector<1x16xi1> to vector<1x16xi1>
    %181 = vector.broadcast %180 : vector<1x16xi1> to vector<16x16xi1>
    %182 = vector.broadcast %cst_57 : f32 to vector<16x16xf32>
    %183 = arith.select %181, %142, %182 : vector<16x16xi1>, vector<16x16xf32>
    %cst_58 = arith.constant 0.000000e+00 : f32
    %184 = vector.shape_cast %11 : vector<1x16xi1> to vector<1x16xi1>
    %185 = vector.broadcast %184 : vector<1x16xi1> to vector<16x16xi1>
    %186 = vector.broadcast %cst_58 : f32 to vector<16x16xf32>
    %187 = arith.select %185, %179, %186 : vector<16x16xi1>, vector<16x16xf32>
    %cst_59 = arith.constant 9.99999997E-7 : f32
    %188 = vector.broadcast %cst_59 : f32 to vector<16x16xf32>
    %189 = arith.maximumf %187, %188 : vector<16x16xf32>
    %190 = math.log %189 : vector<16x16xf32>
    %191 = arith.addf %190, %183 : vector<16x16xf32>
    %cst_60 = arith.constant dense<0xFF800000> : vector<16xf32>
    %192 = vector.multi_reduction <maximumf>, %191, %cst_60 [1] : vector<16x16xf32> to vector<16xf32>
    %193 = vector.shape_cast %192 : vector<16xf32> to vector<16x1xf32>
    %194 = vector.broadcast %193 : vector<16x1xf32> to vector<16x16xf32>
    %195 = arith.subf %191, %194 : vector<16x16xf32>
    %196 = math.exp %195 : vector<16x16xf32>
    %cst_61 = arith.constant dense<0.000000e+00> : vector<16xf32>
    %197 = vector.multi_reduction <add>, %196, %cst_61 [1] : vector<16x16xf32> to vector<16xf32>
    %198 = vector.shape_cast %197 : vector<16xf32> to vector<16x1xf32>
    %199 = vector.broadcast %198 : vector<16x1xf32> to vector<16x16xf32>
    %200 = arith.divf %196, %199 : vector<16x16xf32>
    %201 = arith.truncf %200 : vector<16x16xf32> to vector<16x16xbf16>
    %cst_62 = arith.constant dense<0.000000e+00> : vector<16x16xf32>
    %202 = tpu.matmul %201, %139, %cst_62 {dimension_numbers = #tpu.dot_dimension_numbers<[1], [0], [0], [1], [0, 0, 1, 1], [], []>} : vector<16x16xbf16>, vector<16x16xbf16>, vector<16x16xf32> -> vector<16x16xf32>
    %203 = vector.extract_strided_slice %49 {offsets = [0, 32], sizes = [16, 16], strides = [1, 1]} : vector<16x192xf32> to vector<16x16xf32>
    %204 = arith.truncf %203 : vector<16x16xf32> to vector<16x16xbf16>
    %205 = vector.extract_strided_slice %49 {offsets = [0, 96], sizes = [16, 16], strides = [1, 1]} : vector<16x192xf32> to vector<16x16xf32>
    %206 = arith.truncf %205 : vector<16x16xf32> to vector<16x16xbf16>
    %207 = vector.extract_strided_slice %49 {offsets = [0, 160], sizes = [16, 16], strides = [1, 1]} : vector<16x192xf32> to vector<16x16xf32>
    %208 = arith.truncf %207 : vector<16x16xf32> to vector<16x16xbf16>
    %cst_63 = arith.constant dense<0.000000e+00> : vector<16x16xf32>
    %209 = tpu.matmul %204, %206, %cst_63 {dimension_numbers = #tpu.dot_dimension_numbers<[1], [1], [0], [0], [0, 0, 1, 0], [], []>} : vector<16x16xbf16>, vector<16x16xbf16>, vector<16x16xf32> -> vector<16x16xf32>
    %cst_64 = arith.constant 2.500000e-01 : f32
    %210 = vector.broadcast %cst_64 : f32 to vector<16x16xf32>
    %211 = arith.mulf %209, %210 : vector<16x16xf32>
    %212 = vector.extract_strided_slice %62 {offsets = [0, 12], sizes = [16, 1], strides = [1, 1]} : vector<16x24xf32> to vector<16x1xf32>
    %213 = vector.extract_strided_slice %62 {offsets = [0, 13], sizes = [16, 1], strides = [1, 1]} : vector<16x24xf32> to vector<16x1xf32>
    %214 = vector.extract_strided_slice %64 {offsets = [0, 0, 0], sizes = [1, 16, 16], strides = [1, 1, 1]} : vector<5x16x16xf32> to vector<1x16x16xf32>
    %215 = vector.shape_cast %214 : vector<1x16x16xf32> to vector<16x16xf32>
    %216 = vector.broadcast %213 : vector<16x1xf32> to vector<16x16xf32>
    %217 = arith.mulf %216, %215 : vector<16x16xf32>
    %218 = vector.broadcast %212 : vector<16x1xf32> to vector<16x16xf32>
    %219 = arith.addf %218, %217 : vector<16x16xf32>
    %220 = vector.extract_strided_slice %62 {offsets = [0, 14], sizes = [16, 1], strides = [1, 1]} : vector<16x24xf32> to vector<16x1xf32>
    %221 = vector.extract_strided_slice %64 {offsets = [1, 0, 0], sizes = [1, 16, 16], strides = [1, 1, 1]} : vector<5x16x16xf32> to vector<1x16x16xf32>
    %222 = vector.shape_cast %221 : vector<1x16x16xf32> to vector<16x16xf32>
    %223 = vector.broadcast %220 : vector<16x1xf32> to vector<16x16xf32>
    %224 = arith.mulf %223, %222 : vector<16x16xf32>
    %225 = arith.addf %219, %224 : vector<16x16xf32>
    %226 = vector.extract_strided_slice %62 {offsets = [0, 15], sizes = [16, 1], strides = [1, 1]} : vector<16x24xf32> to vector<16x1xf32>
    %227 = vector.extract_strided_slice %64 {offsets = [2, 0, 0], sizes = [1, 16, 16], strides = [1, 1, 1]} : vector<5x16x16xf32> to vector<1x16x16xf32>
    %228 = vector.shape_cast %227 : vector<1x16x16xf32> to vector<16x16xf32>
    %229 = vector.broadcast %226 : vector<16x1xf32> to vector<16x16xf32>
    %230 = arith.mulf %229, %228 : vector<16x16xf32>
    %231 = arith.addf %225, %230 : vector<16x16xf32>
    %232 = vector.extract_strided_slice %62 {offsets = [0, 16], sizes = [16, 1], strides = [1, 1]} : vector<16x24xf32> to vector<16x1xf32>
    %233 = vector.extract_strided_slice %64 {offsets = [3, 0, 0], sizes = [1, 16, 16], strides = [1, 1, 1]} : vector<5x16x16xf32> to vector<1x16x16xf32>
    %234 = vector.shape_cast %233 : vector<1x16x16xf32> to vector<16x16xf32>
    %235 = vector.broadcast %232 : vector<16x1xf32> to vector<16x16xf32>
    %236 = arith.mulf %235, %234 : vector<16x16xf32>
    %237 = arith.addf %231, %236 : vector<16x16xf32>
    %238 = vector.extract_strided_slice %62 {offsets = [0, 17], sizes = [16, 1], strides = [1, 1]} : vector<16x24xf32> to vector<16x1xf32>
    %239 = vector.extract_strided_slice %64 {offsets = [4, 0, 0], sizes = [1, 16, 16], strides = [1, 1, 1]} : vector<5x16x16xf32> to vector<1x16x16xf32>
    %240 = vector.shape_cast %239 : vector<1x16x16xf32> to vector<16x16xf32>
    %241 = vector.broadcast %238 : vector<16x1xf32> to vector<16x16xf32>
    %242 = arith.mulf %241, %240 : vector<16x16xf32>
    %243 = arith.addf %237, %242 : vector<16x16xf32>
    %244 = arith.negf %243 : vector<16x16xf32>
    %245 = math.exp %244 : vector<16x16xf32>
    %cst_65 = arith.constant 1.000000e+00 : f32
    %246 = vector.broadcast %cst_65 : f32 to vector<16x16xf32>
    %247 = arith.addf %246, %245 : vector<16x16xf32>
    %248 = arith.divf %246, %247 : vector<16x16xf32>
    %cst_66 = arith.constant -1.000000e+30 : f32
    %249 = vector.shape_cast %11 : vector<1x16xi1> to vector<1x16xi1>
    %250 = vector.broadcast %249 : vector<1x16xi1> to vector<16x16xi1>
    %251 = vector.broadcast %cst_66 : f32 to vector<16x16xf32>
    %252 = arith.select %250, %211, %251 : vector<16x16xi1>, vector<16x16xf32>
    %cst_67 = arith.constant 0.000000e+00 : f32
    %253 = vector.shape_cast %11 : vector<1x16xi1> to vector<1x16xi1>
    %254 = vector.broadcast %253 : vector<1x16xi1> to vector<16x16xi1>
    %255 = vector.broadcast %cst_67 : f32 to vector<16x16xf32>
    %256 = arith.select %254, %248, %255 : vector<16x16xi1>, vector<16x16xf32>
    %cst_68 = arith.constant 9.99999997E-7 : f32
    %257 = vector.broadcast %cst_68 : f32 to vector<16x16xf32>
    %258 = arith.maximumf %256, %257 : vector<16x16xf32>
    %259 = math.log %258 : vector<16x16xf32>
    %260 = arith.addf %259, %252 : vector<16x16xf32>
    %cst_69 = arith.constant dense<0xFF800000> : vector<16xf32>
    %261 = vector.multi_reduction <maximumf>, %260, %cst_69 [1] : vector<16x16xf32> to vector<16xf32>
    %262 = vector.shape_cast %261 : vector<16xf32> to vector<16x1xf32>
    %263 = vector.broadcast %262 : vector<16x1xf32> to vector<16x16xf32>
    %264 = arith.subf %260, %263 : vector<16x16xf32>
    %265 = math.exp %264 : vector<16x16xf32>
    %cst_70 = arith.constant dense<0.000000e+00> : vector<16xf32>
    %266 = vector.multi_reduction <add>, %265, %cst_70 [1] : vector<16x16xf32> to vector<16xf32>
    %267 = vector.shape_cast %266 : vector<16xf32> to vector<16x1xf32>
    %268 = vector.broadcast %267 : vector<16x1xf32> to vector<16x16xf32>
    %269 = arith.divf %265, %268 : vector<16x16xf32>
    %270 = arith.truncf %269 : vector<16x16xf32> to vector<16x16xbf16>
    %cst_71 = arith.constant dense<0.000000e+00> : vector<16x16xf32>
    %271 = tpu.matmul %270, %208, %cst_71 {dimension_numbers = #tpu.dot_dimension_numbers<[1], [0], [0], [1], [0, 0, 1, 1], [], []>} : vector<16x16xbf16>, vector<16x16xbf16>, vector<16x16xf32> -> vector<16x16xf32>
    %272 = vector.extract_strided_slice %49 {offsets = [0, 48], sizes = [16, 16], strides = [1, 1]} : vector<16x192xf32> to vector<16x16xf32>
    %273 = arith.truncf %272 : vector<16x16xf32> to vector<16x16xbf16>
    %274 = vector.extract_strided_slice %49 {offsets = [0, 112], sizes = [16, 16], strides = [1, 1]} : vector<16x192xf32> to vector<16x16xf32>
    %275 = arith.truncf %274 : vector<16x16xf32> to vector<16x16xbf16>
    %276 = vector.extract_strided_slice %49 {offsets = [0, 176], sizes = [16, 16], strides = [1, 1]} : vector<16x192xf32> to vector<16x16xf32>
    %277 = arith.truncf %276 : vector<16x16xf32> to vector<16x16xbf16>
    %cst_72 = arith.constant dense<0.000000e+00> : vector<16x16xf32>
    %278 = tpu.matmul %273, %275, %cst_72 {dimension_numbers = #tpu.dot_dimension_numbers<[1], [1], [0], [0], [0, 0, 1, 0], [], []>} : vector<16x16xbf16>, vector<16x16xbf16>, vector<16x16xf32> -> vector<16x16xf32>
    %cst_73 = arith.constant 2.500000e-01 : f32
    %279 = vector.broadcast %cst_73 : f32 to vector<16x16xf32>
    %280 = arith.mulf %278, %279 : vector<16x16xf32>
    %281 = vector.extract_strided_slice %62 {offsets = [0, 18], sizes = [16, 1], strides = [1, 1]} : vector<16x24xf32> to vector<16x1xf32>
    %282 = vector.extract_strided_slice %62 {offsets = [0, 19], sizes = [16, 1], strides = [1, 1]} : vector<16x24xf32> to vector<16x1xf32>
    %283 = vector.extract_strided_slice %64 {offsets = [0, 0, 0], sizes = [1, 16, 16], strides = [1, 1, 1]} : vector<5x16x16xf32> to vector<1x16x16xf32>
    %284 = vector.shape_cast %283 : vector<1x16x16xf32> to vector<16x16xf32>
    %285 = vector.broadcast %282 : vector<16x1xf32> to vector<16x16xf32>
    %286 = arith.mulf %285, %284 : vector<16x16xf32>
    %287 = vector.broadcast %281 : vector<16x1xf32> to vector<16x16xf32>
    %288 = arith.addf %287, %286 : vector<16x16xf32>
    %289 = vector.extract_strided_slice %62 {offsets = [0, 20], sizes = [16, 1], strides = [1, 1]} : vector<16x24xf32> to vector<16x1xf32>
    %290 = vector.extract_strided_slice %64 {offsets = [1, 0, 0], sizes = [1, 16, 16], strides = [1, 1, 1]} : vector<5x16x16xf32> to vector<1x16x16xf32>
    %291 = vector.shape_cast %290 : vector<1x16x16xf32> to vector<16x16xf32>
    %292 = vector.broadcast %289 : vector<16x1xf32> to vector<16x16xf32>
    %293 = arith.mulf %292, %291 : vector<16x16xf32>
    %294 = arith.addf %288, %293 : vector<16x16xf32>
    %295 = vector.extract_strided_slice %62 {offsets = [0, 21], sizes = [16, 1], strides = [1, 1]} : vector<16x24xf32> to vector<16x1xf32>
    %296 = vector.extract_strided_slice %64 {offsets = [2, 0, 0], sizes = [1, 16, 16], strides = [1, 1, 1]} : vector<5x16x16xf32> to vector<1x16x16xf32>
    %297 = vector.shape_cast %296 : vector<1x16x16xf32> to vector<16x16xf32>
    %298 = vector.broadcast %295 : vector<16x1xf32> to vector<16x16xf32>
    %299 = arith.mulf %298, %297 : vector<16x16xf32>
    %300 = arith.addf %294, %299 : vector<16x16xf32>
    %301 = vector.extract_strided_slice %62 {offsets = [0, 22], sizes = [16, 1], strides = [1, 1]} : vector<16x24xf32> to vector<16x1xf32>
    %302 = vector.extract_strided_slice %64 {offsets = [3, 0, 0], sizes = [1, 16, 16], strides = [1, 1, 1]} : vector<5x16x16xf32> to vector<1x16x16xf32>
    %303 = vector.shape_cast %302 : vector<1x16x16xf32> to vector<16x16xf32>
    %304 = vector.broadcast %301 : vector<16x1xf32> to vector<16x16xf32>
    %305 = arith.mulf %304, %303 : vector<16x16xf32>
    %306 = arith.addf %300, %305 : vector<16x16xf32>
    %307 = vector.extract_strided_slice %62 {offsets = [0, 23], sizes = [16, 1], strides = [1, 1]} : vector<16x24xf32> to vector<16x1xf32>
    %308 = vector.extract_strided_slice %64 {offsets = [4, 0, 0], sizes = [1, 16, 16], strides = [1, 1, 1]} : vector<5x16x16xf32> to vector<1x16x16xf32>
    %309 = vector.shape_cast %308 : vector<1x16x16xf32> to vector<16x16xf32>
    %310 = vector.broadcast %307 : vector<16x1xf32> to vector<16x16xf32>
    %311 = arith.mulf %310, %309 : vector<16x16xf32>
    %312 = arith.addf %306, %311 : vector<16x16xf32>
    %313 = arith.negf %312 : vector<16x16xf32>
    %314 = math.exp %313 : vector<16x16xf32>
    %cst_74 = arith.constant 1.000000e+00 : f32
    %315 = vector.broadcast %cst_74 : f32 to vector<16x16xf32>
    %316 = arith.addf %315, %314 : vector<16x16xf32>
    %317 = arith.divf %315, %316 : vector<16x16xf32>
    %cst_75 = arith.constant -1.000000e+30 : f32
    %318 = vector.shape_cast %11 : vector<1x16xi1> to vector<1x16xi1>
    %319 = vector.broadcast %318 : vector<1x16xi1> to vector<16x16xi1>
    %320 = vector.broadcast %cst_75 : f32 to vector<16x16xf32>
    %321 = arith.select %319, %280, %320 : vector<16x16xi1>, vector<16x16xf32>
    %cst_76 = arith.constant 0.000000e+00 : f32
    %322 = vector.shape_cast %11 : vector<1x16xi1> to vector<1x16xi1>
    %323 = vector.broadcast %322 : vector<1x16xi1> to vector<16x16xi1>
    %324 = vector.broadcast %cst_76 : f32 to vector<16x16xf32>
    %325 = arith.select %323, %317, %324 : vector<16x16xi1>, vector<16x16xf32>
    %cst_77 = arith.constant 9.99999997E-7 : f32
    %326 = vector.broadcast %cst_77 : f32 to vector<16x16xf32>
    %327 = arith.maximumf %325, %326 : vector<16x16xf32>
    %328 = math.log %327 : vector<16x16xf32>
    %329 = arith.addf %328, %321 : vector<16x16xf32>
    %cst_78 = arith.constant dense<0xFF800000> : vector<16xf32>
    %330 = vector.multi_reduction <maximumf>, %329, %cst_78 [1] : vector<16x16xf32> to vector<16xf32>
    %331 = vector.shape_cast %330 : vector<16xf32> to vector<16x1xf32>
    %332 = vector.broadcast %331 : vector<16x1xf32> to vector<16x16xf32>
    %333 = arith.subf %329, %332 : vector<16x16xf32>
    %334 = math.exp %333 : vector<16x16xf32>
    %cst_79 = arith.constant dense<0.000000e+00> : vector<16xf32>
    %335 = vector.multi_reduction <add>, %334, %cst_79 [1] : vector<16x16xf32> to vector<16xf32>
    %336 = vector.shape_cast %335 : vector<16xf32> to vector<16x1xf32>
    %337 = vector.broadcast %336 : vector<16x1xf32> to vector<16x16xf32>
    %338 = arith.divf %334, %337 : vector<16x16xf32>
    %339 = arith.truncf %338 : vector<16x16xf32> to vector<16x16xbf16>
    %cst_80 = arith.constant dense<0.000000e+00> : vector<16x16xf32>
    %340 = tpu.matmul %339, %277, %cst_80 {dimension_numbers = #tpu.dot_dimension_numbers<[1], [0], [0], [1], [0, 0, 1, 1], [], []>} : vector<16x16xbf16>, vector<16x16xbf16>, vector<16x16xf32> -> vector<16x16xf32>
    %341 = tpu.concatenate %133, %202, %271, %340 in 1 : vector<16x16xf32>, vector<16x16xf32>, vector<16x16xf32>, vector<16x16xf32> -> vector<16x64xf32>
    %342 = arith.truncf %341 : vector<16x64xf32> to vector<16x64xbf16>
    %c0_81 = arith.constant 0 : index
    %c0_82 = arith.constant 0 : index
    %c0_83 = arith.constant 0 : index
    %343 = vector.load %arg14[%c0_81, %c0_82, %c0_83] : memref<1x64x64xbf16, #tpu.memory_space<vmem>>, vector<1x64x64xbf16>
    %344 = vector.shape_cast %343 : vector<1x64x64xbf16> to vector<64x64xbf16>
    %cst_84 = arith.constant dense<0.000000e+00> : vector<16x64xf32>
    %345 = tpu.matmul %342, %344, %cst_84 {dimension_numbers = #tpu.dot_dimension_numbers<[1], [0], [0], [1], [0, 0, 1, 1], [], []>} : vector<16x64xbf16>, vector<64x64xbf16>, vector<16x64xf32> -> vector<16x64xf32>
    %c0_85 = arith.constant 0 : index
    %c0_86 = arith.constant 0 : index
    %c0_87 = arith.constant 0 : index
    %346 = vector.load %arg15[%c0_85, %c0_86, %c0_87] : memref<1x1x64xf32, #tpu.memory_space<vmem>>, vector<1x1x64xf32>
    %347 = vector.shape_cast %346 : vector<1x1x64xf32> to vector<1x64xf32>
    %348 = vector.broadcast %347 : vector<1x64xf32> to vector<16x64xf32>
    %349 = arith.addf %345, %348 : vector<16x64xf32>
    %350 = arith.addf %349, %41 : vector<16x64xf32>
    %c0_88 = arith.constant 0 : index
    %c0_89 = arith.constant 0 : index
    %c0_90 = arith.constant 0 : index
    %351 = vector.load %arg16[%c0_88, %c0_89, %c0_90] : memref<1x1x64xf32, #tpu.memory_space<vmem>>, vector<1x1x64xf32>
    %352 = vector.shape_cast %351 : vector<1x1x64xf32> to vector<1x64xf32>
    %c0_91 = arith.constant 0 : index
    %c0_92 = arith.constant 0 : index
    %c0_93 = arith.constant 0 : index
    %353 = vector.load %arg17[%c0_91, %c0_92, %c0_93] : memref<1x1x64xf32, #tpu.memory_space<vmem>>, vector<1x1x64xf32>
    %354 = vector.shape_cast %353 : vector<1x1x64xf32> to vector<1x64xf32>
    %cst_94 = arith.constant dense<0.000000e+00> : vector<16xf32>
    %355 = vector.multi_reduction <add>, %350, %cst_94 [1] : vector<16x64xf32> to vector<16xf32>
    %356 = vector.shape_cast %355 : vector<16xf32> to vector<16x1xf32>
    %cst_95 = arith.constant 6.400000e+01 : f32
    %357 = vector.broadcast %cst_95 : f32 to vector<16x1xf32>
    %358 = arith.divf %356, %357 : vector<16x1xf32>
    %359 = vector.broadcast %358 : vector<16x1xf32> to vector<16x64xf32>
    %360 = arith.subf %350, %359 : vector<16x64xf32>
    %361 = arith.mulf %360, %360 : vector<16x64xf32>
    %cst_96 = arith.constant dense<0.000000e+00> : vector<16xf32>
    %362 = vector.multi_reduction <add>, %361, %cst_96 [1] : vector<16x64xf32> to vector<16xf32>
    %363 = vector.shape_cast %362 : vector<16xf32> to vector<16x1xf32>
    %cst_97 = arith.constant 6.400000e+01 : f32
    %364 = vector.broadcast %cst_97 : f32 to vector<16x1xf32>
    %365 = arith.divf %363, %364 : vector<16x1xf32>
    %366 = vector.broadcast %358 : vector<16x1xf32> to vector<16x64xf32>
    %367 = arith.subf %350, %366 : vector<16x64xf32>
    %cst_98 = arith.constant 9.99999974E-6 : f32
    %368 = vector.broadcast %cst_98 : f32 to vector<16x1xf32>
    %369 = arith.addf %365, %368 : vector<16x1xf32>
    %370 = math.rsqrt %369 : vector<16x1xf32>
    %371 = vector.broadcast %370 : vector<16x1xf32> to vector<16x64xf32>
    %372 = arith.mulf %367, %371 : vector<16x64xf32>
    %373 = vector.broadcast %352 : vector<1x64xf32> to vector<16x64xf32>
    %374 = arith.mulf %372, %373 : vector<16x64xf32>
    %375 = vector.broadcast %354 : vector<1x64xf32> to vector<16x64xf32>
    %376 = arith.addf %374, %375 : vector<16x64xf32>
    %377 = arith.addf %7, %376 : vector<16x64xf32>
    %c0_99 = arith.constant 0 : index
    %c0_100 = arith.constant 0 : index
    %c0_101 = arith.constant 0 : index
    %378 = vector.load %arg18[%c0_99, %c0_100, %c0_101] : memref<1x1x64xf32, #tpu.memory_space<vmem>>, vector<1x1x64xf32>
    %379 = vector.shape_cast %378 : vector<1x1x64xf32> to vector<1x64xf32>
    %c0_102 = arith.constant 0 : index
    %c0_103 = arith.constant 0 : index
    %c0_104 = arith.constant 0 : index
    %380 = vector.load %arg19[%c0_102, %c0_103, %c0_104] : memref<1x1x64xf32, #tpu.memory_space<vmem>>, vector<1x1x64xf32>
    %381 = vector.shape_cast %380 : vector<1x1x64xf32> to vector<1x64xf32>
    %cst_105 = arith.constant dense<0.000000e+00> : vector<16xf32>
    %382 = vector.multi_reduction <add>, %377, %cst_105 [1] : vector<16x64xf32> to vector<16xf32>
    %383 = vector.shape_cast %382 : vector<16xf32> to vector<16x1xf32>
    %cst_106 = arith.constant 6.400000e+01 : f32
    %384 = vector.broadcast %cst_106 : f32 to vector<16x1xf32>
    %385 = arith.divf %383, %384 : vector<16x1xf32>
    %386 = vector.broadcast %385 : vector<16x1xf32> to vector<16x64xf32>
    %387 = arith.subf %377, %386 : vector<16x64xf32>
    %388 = arith.mulf %387, %387 : vector<16x64xf32>
    %cst_107 = arith.constant dense<0.000000e+00> : vector<16xf32>
    %389 = vector.multi_reduction <add>, %388, %cst_107 [1] : vector<16x64xf32> to vector<16xf32>
    %390 = vector.shape_cast %389 : vector<16xf32> to vector<16x1xf32>
    %cst_108 = arith.constant 6.400000e+01 : f32
    %391 = vector.broadcast %cst_108 : f32 to vector<16x1xf32>
    %392 = arith.divf %390, %391 : vector<16x1xf32>
    %393 = vector.broadcast %385 : vector<16x1xf32> to vector<16x64xf32>
    %394 = arith.subf %377, %393 : vector<16x64xf32>
    %cst_109 = arith.constant 9.99999974E-6 : f32
    %395 = vector.broadcast %cst_109 : f32 to vector<16x1xf32>
    %396 = arith.addf %392, %395 : vector<16x1xf32>
    %397 = math.rsqrt %396 : vector<16x1xf32>
    %398 = vector.broadcast %397 : vector<16x1xf32> to vector<16x64xf32>
    %399 = arith.mulf %394, %398 : vector<16x64xf32>
    %400 = vector.broadcast %379 : vector<1x64xf32> to vector<16x64xf32>
    %401 = arith.mulf %399, %400 : vector<16x64xf32>
    %402 = vector.broadcast %381 : vector<1x64xf32> to vector<16x64xf32>
    %403 = arith.addf %401, %402 : vector<16x64xf32>
    %c0_110 = arith.constant 0 : index
    %c0_111 = arith.constant 0 : index
    %c0_112 = arith.constant 0 : index
    %404 = vector.load %arg4[%c0_110, %c0_111, %c0_112] : memref<1x8x64xf32, #tpu.memory_space<vmem>>, vector<1x8x64xf32>
    %405 = vector.shape_cast %404 : vector<1x8x64xf32> to vector<8x64xf32>
    %406 = arith.truncf %403 : vector<16x64xf32> to vector<16x64xbf16>
    %c0_113 = arith.constant 0 : index
    %c0_114 = arith.constant 0 : index
    %c0_115 = arith.constant 0 : index
    %407 = vector.load %arg20[%c0_113, %c0_114, %c0_115] : memref<1x64x64xbf16, #tpu.memory_space<vmem>>, vector<1x64x64xbf16>
    %408 = vector.shape_cast %407 : vector<1x64x64xbf16> to vector<64x64xbf16>
    %cst_116 = arith.constant dense<0.000000e+00> : vector<16x64xf32>
    %409 = tpu.matmul %406, %408, %cst_116 {dimension_numbers = #tpu.dot_dimension_numbers<[1], [0], [0], [1], [0, 0, 1, 1], [], []>} : vector<16x64xbf16>, vector<64x64xbf16>, vector<16x64xf32> -> vector<16x64xf32>
    %c0_117 = arith.constant 0 : index
    %c0_118 = arith.constant 0 : index
    %c0_119 = arith.constant 0 : index
    %410 = vector.load %arg21[%c0_117, %c0_118, %c0_119] : memref<1x1x64xf32, #tpu.memory_space<vmem>>, vector<1x1x64xf32>
    %411 = vector.shape_cast %410 : vector<1x1x64xf32> to vector<1x64xf32>
    %412 = vector.broadcast %411 : vector<1x64xf32> to vector<16x64xf32>
    %413 = arith.addf %409, %412 : vector<16x64xf32>
    %414 = arith.truncf %405 : vector<8x64xf32> to vector<8x64xbf16>
    %c0_120 = arith.constant 0 : index
    %c0_121 = arith.constant 0 : index
    %c0_122 = arith.constant 0 : index
    %415 = vector.load %arg22[%c0_120, %c0_121, %c0_122] : memref<1x64x128xbf16, #tpu.memory_space<vmem>>, vector<1x64x128xbf16>
    %416 = vector.shape_cast %415 : vector<1x64x128xbf16> to vector<64x128xbf16>
    %cst_123 = arith.constant dense<0.000000e+00> : vector<8x128xf32>
    %417 = tpu.matmul %414, %416, %cst_123 {dimension_numbers = #tpu.dot_dimension_numbers<[1], [0], [0], [1], [0, 0, 1, 1], [], []>} : vector<8x64xbf16>, vector<64x128xbf16>, vector<8x128xf32> -> vector<8x128xf32>
    %c0_124 = arith.constant 0 : index
    %c0_125 = arith.constant 0 : index
    %c0_126 = arith.constant 0 : index
    %418 = vector.load %arg23[%c0_124, %c0_125, %c0_126] : memref<1x1x128xf32, #tpu.memory_space<vmem>>, vector<1x1x128xf32>
    %419 = vector.shape_cast %418 : vector<1x1x128xf32> to vector<1x128xf32>
    %420 = vector.broadcast %419 : vector<1x128xf32> to vector<8x128xf32>
    %421 = arith.addf %417, %420 : vector<8x128xf32>
    %422 = vector.extract_strided_slice %413 {offsets = [0, 0], sizes = [16, 16], strides = [1, 1]} : vector<16x64xf32> to vector<16x16xf32>
    %423 = arith.truncf %422 : vector<16x16xf32> to vector<16x16xbf16>
    %424 = vector.extract_strided_slice %421 {offsets = [0, 0], sizes = [8, 16], strides = [1, 1]} : vector<8x128xf32> to vector<8x16xf32>
    %425 = arith.truncf %424 : vector<8x16xf32> to vector<8x16xbf16>
    %426 = vector.extract_strided_slice %421 {offsets = [0, 64], sizes = [8, 16], strides = [1, 1]} : vector<8x128xf32> to vector<8x16xf32>
    %427 = arith.truncf %426 : vector<8x16xf32> to vector<8x16xbf16>
    %cst_127 = arith.constant dense<0.000000e+00> : vector<16x8xf32>
    %428 = tpu.matmul %423, %425, %cst_127 {dimension_numbers = #tpu.dot_dimension_numbers<[1], [1], [0], [0], [0, 0, 1, 0], [], []>} : vector<16x16xbf16>, vector<8x16xbf16>, vector<16x8xf32> -> vector<16x8xf32>
    %cst_128 = arith.constant 2.500000e-01 : f32
    %429 = vector.broadcast %cst_128 : f32 to vector<16x8xf32>
    %430 = arith.mulf %428, %429 : vector<16x8xf32>
    %cst_129 = arith.constant -1.000000e+30 : f32
    %431 = vector.shape_cast %15 : vector<1x8xi1> to vector<1x8xi1>
    %432 = vector.broadcast %431 : vector<1x8xi1> to vector<16x8xi1>
    %433 = vector.broadcast %cst_129 : f32 to vector<16x8xf32>
    %434 = arith.select %432, %430, %433 : vector<16x8xi1>, vector<16x8xf32>
    %cst_130 = arith.constant dense<0xFF800000> : vector<16xf32>
    %435 = vector.multi_reduction <maximumf>, %434, %cst_130 [1] : vector<16x8xf32> to vector<16xf32>
    %436 = vector.shape_cast %435 : vector<16xf32> to vector<16x1xf32>
    %437 = vector.broadcast %436 : vector<16x1xf32> to vector<16x8xf32>
    %438 = arith.subf %434, %437 : vector<16x8xf32>
    %439 = math.exp %438 : vector<16x8xf32>
    %cst_131 = arith.constant dense<0.000000e+00> : vector<16xf32>
    %440 = vector.multi_reduction <add>, %439, %cst_131 [1] : vector<16x8xf32> to vector<16xf32>
    %441 = vector.shape_cast %440 : vector<16xf32> to vector<16x1xf32>
    %442 = vector.broadcast %441 : vector<16x1xf32> to vector<16x8xf32>
    %443 = arith.divf %439, %442 : vector<16x8xf32>
    %444 = arith.truncf %443 : vector<16x8xf32> to vector<16x8xbf16>
    %cst_132 = arith.constant dense<0.000000e+00> : vector<16x16xf32>
    %445 = tpu.matmul %444, %427, %cst_132 {dimension_numbers = #tpu.dot_dimension_numbers<[1], [0], [0], [1], [0, 0, 1, 1], [], []>} : vector<16x8xbf16>, vector<8x16xbf16>, vector<16x16xf32> -> vector<16x16xf32>
    %446 = vector.extract_strided_slice %413 {offsets = [0, 16], sizes = [16, 16], strides = [1, 1]} : vector<16x64xf32> to vector<16x16xf32>
    %447 = arith.truncf %446 : vector<16x16xf32> to vector<16x16xbf16>
    %448 = vector.extract_strided_slice %421 {offsets = [0, 16], sizes = [8, 16], strides = [1, 1]} : vector<8x128xf32> to vector<8x16xf32>
    %449 = arith.truncf %448 : vector<8x16xf32> to vector<8x16xbf16>
    %450 = vector.extract_strided_slice %421 {offsets = [0, 80], sizes = [8, 16], strides = [1, 1]} : vector<8x128xf32> to vector<8x16xf32>
    %451 = arith.truncf %450 : vector<8x16xf32> to vector<8x16xbf16>
    %cst_133 = arith.constant dense<0.000000e+00> : vector<16x8xf32>
    %452 = tpu.matmul %447, %449, %cst_133 {dimension_numbers = #tpu.dot_dimension_numbers<[1], [1], [0], [0], [0, 0, 1, 0], [], []>} : vector<16x16xbf16>, vector<8x16xbf16>, vector<16x8xf32> -> vector<16x8xf32>
    %cst_134 = arith.constant 2.500000e-01 : f32
    %453 = vector.broadcast %cst_134 : f32 to vector<16x8xf32>
    %454 = arith.mulf %452, %453 : vector<16x8xf32>
    %cst_135 = arith.constant -1.000000e+30 : f32
    %455 = vector.shape_cast %15 : vector<1x8xi1> to vector<1x8xi1>
    %456 = vector.broadcast %455 : vector<1x8xi1> to vector<16x8xi1>
    %457 = vector.broadcast %cst_135 : f32 to vector<16x8xf32>
    %458 = arith.select %456, %454, %457 : vector<16x8xi1>, vector<16x8xf32>
    %cst_136 = arith.constant dense<0xFF800000> : vector<16xf32>
    %459 = vector.multi_reduction <maximumf>, %458, %cst_136 [1] : vector<16x8xf32> to vector<16xf32>
    %460 = vector.shape_cast %459 : vector<16xf32> to vector<16x1xf32>
    %461 = vector.broadcast %460 : vector<16x1xf32> to vector<16x8xf32>
    %462 = arith.subf %458, %461 : vector<16x8xf32>
    %463 = math.exp %462 : vector<16x8xf32>
    %cst_137 = arith.constant dense<0.000000e+00> : vector<16xf32>
    %464 = vector.multi_reduction <add>, %463, %cst_137 [1] : vector<16x8xf32> to vector<16xf32>
    %465 = vector.shape_cast %464 : vector<16xf32> to vector<16x1xf32>
    %466 = vector.broadcast %465 : vector<16x1xf32> to vector<16x8xf32>
    %467 = arith.divf %463, %466 : vector<16x8xf32>
    %468 = arith.truncf %467 : vector<16x8xf32> to vector<16x8xbf16>
    %cst_138 = arith.constant dense<0.000000e+00> : vector<16x16xf32>
    %469 = tpu.matmul %468, %451, %cst_138 {dimension_numbers = #tpu.dot_dimension_numbers<[1], [0], [0], [1], [0, 0, 1, 1], [], []>} : vector<16x8xbf16>, vector<8x16xbf16>, vector<16x16xf32> -> vector<16x16xf32>
    %470 = vector.extract_strided_slice %413 {offsets = [0, 32], sizes = [16, 16], strides = [1, 1]} : vector<16x64xf32> to vector<16x16xf32>
    %471 = arith.truncf %470 : vector<16x16xf32> to vector<16x16xbf16>
    %472 = vector.extract_strided_slice %421 {offsets = [0, 32], sizes = [8, 16], strides = [1, 1]} : vector<8x128xf32> to vector<8x16xf32>
    %473 = arith.truncf %472 : vector<8x16xf32> to vector<8x16xbf16>
    %474 = vector.extract_strided_slice %421 {offsets = [0, 96], sizes = [8, 16], strides = [1, 1]} : vector<8x128xf32> to vector<8x16xf32>
    %475 = arith.truncf %474 : vector<8x16xf32> to vector<8x16xbf16>
    %cst_139 = arith.constant dense<0.000000e+00> : vector<16x8xf32>
    %476 = tpu.matmul %471, %473, %cst_139 {dimension_numbers = #tpu.dot_dimension_numbers<[1], [1], [0], [0], [0, 0, 1, 0], [], []>} : vector<16x16xbf16>, vector<8x16xbf16>, vector<16x8xf32> -> vector<16x8xf32>
    %cst_140 = arith.constant 2.500000e-01 : f32
    %477 = vector.broadcast %cst_140 : f32 to vector<16x8xf32>
    %478 = arith.mulf %476, %477 : vector<16x8xf32>
    %cst_141 = arith.constant -1.000000e+30 : f32
    %479 = vector.shape_cast %15 : vector<1x8xi1> to vector<1x8xi1>
    %480 = vector.broadcast %479 : vector<1x8xi1> to vector<16x8xi1>
    %481 = vector.broadcast %cst_141 : f32 to vector<16x8xf32>
    %482 = arith.select %480, %478, %481 : vector<16x8xi1>, vector<16x8xf32>
    %cst_142 = arith.constant dense<0xFF800000> : vector<16xf32>
    %483 = vector.multi_reduction <maximumf>, %482, %cst_142 [1] : vector<16x8xf32> to vector<16xf32>
    %484 = vector.shape_cast %483 : vector<16xf32> to vector<16x1xf32>
    %485 = vector.broadcast %484 : vector<16x1xf32> to vector<16x8xf32>
    %486 = arith.subf %482, %485 : vector<16x8xf32>
    %487 = math.exp %486 : vector<16x8xf32>
    %cst_143 = arith.constant dense<0.000000e+00> : vector<16xf32>
    %488 = vector.multi_reduction <add>, %487, %cst_143 [1] : vector<16x8xf32> to vector<16xf32>
    %489 = vector.shape_cast %488 : vector<16xf32> to vector<16x1xf32>
    %490 = vector.broadcast %489 : vector<16x1xf32> to vector<16x8xf32>
    %491 = arith.divf %487, %490 : vector<16x8xf32>
    %492 = arith.truncf %491 : vector<16x8xf32> to vector<16x8xbf16>
    %cst_144 = arith.constant dense<0.000000e+00> : vector<16x16xf32>
    %493 = tpu.matmul %492, %475, %cst_144 {dimension_numbers = #tpu.dot_dimension_numbers<[1], [0], [0], [1], [0, 0, 1, 1], [], []>} : vector<16x8xbf16>, vector<8x16xbf16>, vector<16x16xf32> -> vector<16x16xf32>
    %494 = vector.extract_strided_slice %413 {offsets = [0, 48], sizes = [16, 16], strides = [1, 1]} : vector<16x64xf32> to vector<16x16xf32>
    %495 = arith.truncf %494 : vector<16x16xf32> to vector<16x16xbf16>
    %496 = vector.extract_strided_slice %421 {offsets = [0, 48], sizes = [8, 16], strides = [1, 1]} : vector<8x128xf32> to vector<8x16xf32>
    %497 = arith.truncf %496 : vector<8x16xf32> to vector<8x16xbf16>
    %498 = vector.extract_strided_slice %421 {offsets = [0, 112], sizes = [8, 16], strides = [1, 1]} : vector<8x128xf32> to vector<8x16xf32>
    %499 = arith.truncf %498 : vector<8x16xf32> to vector<8x16xbf16>
    %cst_145 = arith.constant dense<0.000000e+00> : vector<16x8xf32>
    %500 = tpu.matmul %495, %497, %cst_145 {dimension_numbers = #tpu.dot_dimension_numbers<[1], [1], [0], [0], [0, 0, 1, 0], [], []>} : vector<16x16xbf16>, vector<8x16xbf16>, vector<16x8xf32> -> vector<16x8xf32>
    %cst_146 = arith.constant 2.500000e-01 : f32
    %501 = vector.broadcast %cst_146 : f32 to vector<16x8xf32>
    %502 = arith.mulf %500, %501 : vector<16x8xf32>
    %cst_147 = arith.constant -1.000000e+30 : f32
    %503 = vector.shape_cast %15 : vector<1x8xi1> to vector<1x8xi1>
    %504 = vector.broadcast %503 : vector<1x8xi1> to vector<16x8xi1>
    %505 = vector.broadcast %cst_147 : f32 to vector<16x8xf32>
    %506 = arith.select %504, %502, %505 : vector<16x8xi1>, vector<16x8xf32>
    %cst_148 = arith.constant dense<0xFF800000> : vector<16xf32>
    %507 = vector.multi_reduction <maximumf>, %506, %cst_148 [1] : vector<16x8xf32> to vector<16xf32>
    %508 = vector.shape_cast %507 : vector<16xf32> to vector<16x1xf32>
    %509 = vector.broadcast %508 : vector<16x1xf32> to vector<16x8xf32>
    %510 = arith.subf %506, %509 : vector<16x8xf32>
    %511 = math.exp %510 : vector<16x8xf32>
    %cst_149 = arith.constant dense<0.000000e+00> : vector<16xf32>
    %512 = vector.multi_reduction <add>, %511, %cst_149 [1] : vector<16x8xf32> to vector<16xf32>
    %513 = vector.shape_cast %512 : vector<16xf32> to vector<16x1xf32>
    %514 = vector.broadcast %513 : vector<16x1xf32> to vector<16x8xf32>
    %515 = arith.divf %511, %514 : vector<16x8xf32>
    %516 = arith.truncf %515 : vector<16x8xf32> to vector<16x8xbf16>
    %cst_150 = arith.constant dense<0.000000e+00> : vector<16x16xf32>
    %517 = tpu.matmul %516, %499, %cst_150 {dimension_numbers = #tpu.dot_dimension_numbers<[1], [0], [0], [1], [0, 0, 1, 1], [], []>} : vector<16x8xbf16>, vector<8x16xbf16>, vector<16x16xf32> -> vector<16x16xf32>
    %518 = tpu.concatenate %445, %469, %493, %517 in 1 : vector<16x16xf32>, vector<16x16xf32>, vector<16x16xf32>, vector<16x16xf32> -> vector<16x64xf32>
    %519 = arith.truncf %518 : vector<16x64xf32> to vector<16x64xbf16>
    %c0_151 = arith.constant 0 : index
    %c0_152 = arith.constant 0 : index
    %c0_153 = arith.constant 0 : index
    %520 = vector.load %arg24[%c0_151, %c0_152, %c0_153] : memref<1x64x64xbf16, #tpu.memory_space<vmem>>, vector<1x64x64xbf16>
    %521 = vector.shape_cast %520 : vector<1x64x64xbf16> to vector<64x64xbf16>
    %cst_154 = arith.constant dense<0.000000e+00> : vector<16x64xf32>
    %522 = tpu.matmul %519, %521, %cst_154 {dimension_numbers = #tpu.dot_dimension_numbers<[1], [0], [0], [1], [0, 0, 1, 1], [], []>} : vector<16x64xbf16>, vector<64x64xbf16>, vector<16x64xf32> -> vector<16x64xf32>
    %c0_155 = arith.constant 0 : index
    %c0_156 = arith.constant 0 : index
    %c0_157 = arith.constant 0 : index
    %523 = vector.load %arg25[%c0_155, %c0_156, %c0_157] : memref<1x1x64xf32, #tpu.memory_space<vmem>>, vector<1x1x64xf32>
    %524 = vector.shape_cast %523 : vector<1x1x64xf32> to vector<1x64xf32>
    %525 = vector.broadcast %524 : vector<1x64xf32> to vector<16x64xf32>
    %526 = arith.addf %522, %525 : vector<16x64xf32>
    %527 = arith.addf %377, %526 : vector<16x64xf32>
    %c0_158 = arith.constant 0 : index
    %c0_159 = arith.constant 0 : index
    %c0_160 = arith.constant 0 : index
    %528 = vector.load %arg26[%c0_158, %c0_159, %c0_160] : memref<1x1x64xf32, #tpu.memory_space<vmem>>, vector<1x1x64xf32>
    %529 = vector.shape_cast %528 : vector<1x1x64xf32> to vector<1x64xf32>
    %c0_161 = arith.constant 0 : index
    %c0_162 = arith.constant 0 : index
    %c0_163 = arith.constant 0 : index
    %530 = vector.load %arg27[%c0_161, %c0_162, %c0_163] : memref<1x1x64xf32, #tpu.memory_space<vmem>>, vector<1x1x64xf32>
    %531 = vector.shape_cast %530 : vector<1x1x64xf32> to vector<1x64xf32>
    %cst_164 = arith.constant dense<0.000000e+00> : vector<16xf32>
    %532 = vector.multi_reduction <add>, %527, %cst_164 [1] : vector<16x64xf32> to vector<16xf32>
    %533 = vector.shape_cast %532 : vector<16xf32> to vector<16x1xf32>
    %cst_165 = arith.constant 6.400000e+01 : f32
    %534 = vector.broadcast %cst_165 : f32 to vector<16x1xf32>
    %535 = arith.divf %533, %534 : vector<16x1xf32>
    %536 = vector.broadcast %535 : vector<16x1xf32> to vector<16x64xf32>
    %537 = arith.subf %527, %536 : vector<16x64xf32>
    %538 = arith.mulf %537, %537 : vector<16x64xf32>
    %cst_166 = arith.constant dense<0.000000e+00> : vector<16xf32>
    %539 = vector.multi_reduction <add>, %538, %cst_166 [1] : vector<16x64xf32> to vector<16xf32>
    %540 = vector.shape_cast %539 : vector<16xf32> to vector<16x1xf32>
    %cst_167 = arith.constant 6.400000e+01 : f32
    %541 = vector.broadcast %cst_167 : f32 to vector<16x1xf32>
    %542 = arith.divf %540, %541 : vector<16x1xf32>
    %543 = vector.broadcast %535 : vector<16x1xf32> to vector<16x64xf32>
    %544 = arith.subf %527, %543 : vector<16x64xf32>
    %cst_168 = arith.constant 9.99999974E-6 : f32
    %545 = vector.broadcast %cst_168 : f32 to vector<16x1xf32>
    %546 = arith.addf %542, %545 : vector<16x1xf32>
    %547 = math.rsqrt %546 : vector<16x1xf32>
    %548 = vector.broadcast %547 : vector<16x1xf32> to vector<16x64xf32>
    %549 = arith.mulf %544, %548 : vector<16x64xf32>
    %550 = vector.broadcast %529 : vector<1x64xf32> to vector<16x64xf32>
    %551 = arith.mulf %549, %550 : vector<16x64xf32>
    %552 = vector.broadcast %531 : vector<1x64xf32> to vector<16x64xf32>
    %553 = arith.addf %551, %552 : vector<16x64xf32>
    %554 = arith.truncf %553 : vector<16x64xf32> to vector<16x64xbf16>
    %c0_169 = arith.constant 0 : index
    %c0_170 = arith.constant 0 : index
    %c0_171 = arith.constant 0 : index
    %555 = vector.load %arg28[%c0_169, %c0_170, %c0_171] : memref<1x64x2048xbf16, #tpu.memory_space<vmem>>, vector<1x64x2048xbf16>
    %556 = vector.shape_cast %555 : vector<1x64x2048xbf16> to vector<64x2048xbf16>
    %cst_172 = arith.constant dense<0.000000e+00> : vector<16x2048xf32>
    %557 = tpu.matmul %554, %556, %cst_172 {dimension_numbers = #tpu.dot_dimension_numbers<[1], [0], [0], [1], [0, 0, 1, 1], [], []>} : vector<16x64xbf16>, vector<64x2048xbf16>, vector<16x2048xf32> -> vector<16x2048xf32>
    %c0_173 = arith.constant 0 : index
    %c0_174 = arith.constant 0 : index
    %c0_175 = arith.constant 0 : index
    %558 = vector.load %arg29[%c0_173, %c0_174, %c0_175] : memref<1x1x2048xf32, #tpu.memory_space<vmem>>, vector<1x1x2048xf32>
    %559 = vector.shape_cast %558 : vector<1x1x2048xf32> to vector<1x2048xf32>
    %560 = vector.broadcast %559 : vector<1x2048xf32> to vector<16x2048xf32>
    %561 = arith.addf %557, %560 : vector<16x2048xf32>
    %cst_176 = arith.constant 5.000000e-01 : f32
    %562 = vector.broadcast %cst_176 : f32 to vector<16x2048xf32>
    %563 = arith.mulf %562, %561 : vector<16x2048xf32>
    %cst_177 = arith.constant 0.707106769 : f32
    %564 = vector.broadcast %cst_177 : f32 to vector<16x2048xf32>
    %565 = arith.mulf %561, %564 : vector<16x2048xf32>
    %566 = math.absf %565 : vector<16x2048xf32>
    %cst_178 = arith.constant 0.327591091 : f32
    %567 = vector.broadcast %cst_178 : f32 to vector<16x2048xf32>
    %568 = arith.mulf %567, %566 : vector<16x2048xf32>
    %cst_179 = arith.constant 1.000000e+00 : f32
    %569 = vector.broadcast %cst_179 : f32 to vector<16x2048xf32>
    %570 = arith.addf %569, %568 : vector<16x2048xf32>
    %cst_180 = arith.constant 1.000000e+00 : f32
    %571 = vector.broadcast %cst_180 : f32 to vector<16x2048xf32>
    %572 = arith.divf %571, %570 : vector<16x2048xf32>
    %cst_181 = arith.constant 1.06140542 : f32
    %573 = vector.broadcast %cst_181 : f32 to vector<16x2048xf32>
    %574 = arith.mulf %573, %572 : vector<16x2048xf32>
    %cst_182 = arith.constant -1.45315206 : f32
    %575 = vector.broadcast %cst_182 : f32 to vector<16x2048xf32>
    %576 = arith.addf %574, %575 : vector<16x2048xf32>
    %577 = arith.mulf %576, %572 : vector<16x2048xf32>
    %cst_183 = arith.constant 1.42141378 : f32
    %578 = vector.broadcast %cst_183 : f32 to vector<16x2048xf32>
    %579 = arith.addf %577, %578 : vector<16x2048xf32>
    %580 = arith.mulf %579, %572 : vector<16x2048xf32>
    %cst_184 = arith.constant -0.284496725 : f32
    %581 = vector.broadcast %cst_184 : f32 to vector<16x2048xf32>
    %582 = arith.addf %580, %581 : vector<16x2048xf32>
    %583 = arith.mulf %582, %572 : vector<16x2048xf32>
    %cst_185 = arith.constant 0.254829586 : f32
    %584 = vector.broadcast %cst_185 : f32 to vector<16x2048xf32>
    %585 = arith.addf %583, %584 : vector<16x2048xf32>
    %586 = arith.mulf %585, %572 : vector<16x2048xf32>
    %cst_186 = arith.constant 0.000000e+00 : f32
    %587 = vector.broadcast %cst_186 : f32 to vector<16x2048xf32>
    %588 = arith.subf %587, %566 : vector<16x2048xf32>
    %589 = arith.mulf %588, %566 : vector<16x2048xf32>
    %590 = math.exp %589 : vector<16x2048xf32>
    %591 = arith.mulf %586, %590 : vector<16x2048xf32>
    %cst_187 = arith.constant 1.000000e+00 : f32
    %592 = vector.broadcast %cst_187 : f32 to vector<16x2048xf32>
    %593 = arith.subf %592, %591 : vector<16x2048xf32>
    %cst_188 = arith.constant 0.000000e+00 : f32
    %594 = vector.broadcast %cst_188 : f32 to vector<16x2048xf32>
    %595 = arith.cmpf olt, %565, %594 : vector<16x2048xf32>
    %cst_189 = arith.constant 0.000000e+00 : f32
    %596 = vector.broadcast %cst_189 : f32 to vector<16x2048xf32>
    %597 = arith.subf %596, %593 : vector<16x2048xf32>
    %598 = arith.select %595, %597, %593 : vector<16x2048xi1>, vector<16x2048xf32>
    %cst_190 = arith.constant 1.000000e+00 : f32
    %599 = vector.broadcast %cst_190 : f32 to vector<16x2048xf32>
    %600 = arith.addf %599, %598 : vector<16x2048xf32>
    %601 = arith.mulf %563, %600 : vector<16x2048xf32>
    %602 = arith.truncf %601 : vector<16x2048xf32> to vector<16x2048xbf16>
    %c0_191 = arith.constant 0 : index
    %c0_192 = arith.constant 0 : index
    %c0_193 = arith.constant 0 : index
    %603 = vector.load %arg30[%c0_191, %c0_192, %c0_193] : memref<1x2048x64xbf16, #tpu.memory_space<vmem>>, vector<1x2048x64xbf16>
    %604 = vector.shape_cast %603 : vector<1x2048x64xbf16> to vector<2048x64xbf16>
    %cst_194 = arith.constant dense<0.000000e+00> : vector<16x64xf32>
    %605 = tpu.matmul %602, %604, %cst_194 {dimension_numbers = #tpu.dot_dimension_numbers<[1], [0], [0], [1], [0, 0, 1, 1], [], []>} : vector<16x2048xbf16>, vector<2048x64xbf16>, vector<16x64xf32> -> vector<16x64xf32>
    %c0_195 = arith.constant 0 : index
    %c0_196 = arith.constant 0 : index
    %c0_197 = arith.constant 0 : index
    %606 = vector.load %arg31[%c0_195, %c0_196, %c0_197] : memref<1x1x64xf32, #tpu.memory_space<vmem>>, vector<1x1x64xf32>
    %607 = vector.shape_cast %606 : vector<1x1x64xf32> to vector<1x64xf32>
    %608 = vector.broadcast %607 : vector<1x64xf32> to vector<16x64xf32>
    %609 = arith.addf %605, %608 : vector<16x64xf32>
    %610 = arith.addf %527, %609 : vector<16x64xf32>
    %c0_198 = arith.constant 0 : index
    %c0_199 = arith.constant 0 : index
    %c0_200 = arith.constant 0 : index
    %611 = vector.load %arg32[%c0_198, %c0_199, %c0_200] : memref<1x16x64xf32, #tpu.memory_space<vmem>>, vector<1x16x64xf32>
    %612 = vector.shape_cast %611 : vector<1x16x64xf32> to vector<16x64xf32>
    %613 = vector.shape_cast %610 : vector<16x64xf32> to vector<1x16x64xf32>
    tpu.vector_store %arg32[%c0_198, %c0_199, %c0_200], %613 {strides = array<i32>} : memref<1x16x64xf32, #tpu.memory_space<vmem>>, vector<1x16x64xf32>,
    return
  }
  func.func @transform_0(%arg0: i32, %arg1: i32) -> (i32, i32, i32) {
    %c0_i32 = arith.constant 0 : i32
    %c0_i32_0 = arith.constant 0 : i32
    %c0_i32_1 = arith.constant 0 : i32
    return %arg0, %c0_i32, %c0_i32_0 : i32, i32, i32
  }
  func.func @transform_1(%arg0: i32, %arg1: i32) -> (i32, i32, i32) {
    %c0_i32 = arith.constant 0 : i32
    %c0_i32_0 = arith.constant 0 : i32
    %c0_i32_1 = arith.constant 0 : i32
    return %arg0, %c0_i32, %c0_i32_0 : i32, i32, i32
  }
  func.func @transform_2(%arg0: i32, %arg1: i32) -> (i32, i32, i32) {
    %c0_i32 = arith.constant 0 : i32
    %c0_i32_0 = arith.constant 0 : i32
    %c0_i32_1 = arith.constant 0 : i32
    return %arg0, %c0_i32, %c0_i32_0 : i32, i32, i32
  }
  func.func @transform_3(%arg0: i32, %arg1: i32) -> (i32, i32, i32, i32) {
    %c0_i32 = arith.constant 0 : i32
    %c0_i32_0 = arith.constant 0 : i32
    %c0_i32_1 = arith.constant 0 : i32
    %c0_i32_2 = arith.constant 0 : i32
    return %arg0, %c0_i32, %c0_i32_0, %c0_i32_1 : i32, i32, i32, i32
  }
  func.func @transform_4(%arg0: i32, %arg1: i32) -> (i32, i32, i32) {
    %c0_i32 = arith.constant 0 : i32
    %c0_i32_0 = arith.constant 0 : i32
    %c0_i32_1 = arith.constant 0 : i32
    return %arg0, %c0_i32, %c0_i32_0 : i32, i32, i32
  }
  func.func @transform_5(%arg0: i32, %arg1: i32) -> (i32, i32, i32) {
    %c0_i32 = arith.constant 0 : i32
    %c0_i32_0 = arith.constant 0 : i32
    %c0_i32_1 = arith.constant 0 : i32
    return %arg0, %c0_i32, %c0_i32_0 : i32, i32, i32
  }
  func.func @transform_6(%arg0: i32, %arg1: i32) -> (i32, i32, i32) {
    %c0_i32 = arith.constant 0 : i32
    %c0_i32_0 = arith.constant 0 : i32
    %c0_i32_1 = arith.constant 0 : i32
    return %arg1, %c0_i32, %c0_i32_0 : i32, i32, i32
  }
  func.func @transform_7(%arg0: i32, %arg1: i32) -> (i32, i32, i32) {
    %c0_i32 = arith.constant 0 : i32
    %c0_i32_0 = arith.constant 0 : i32
    %c0_i32_1 = arith.constant 0 : i32
    return %arg1, %c0_i32, %c0_i32_0 : i32, i32, i32
  }
  func.func @transform_8(%arg0: i32, %arg1: i32) -> (i32, i32, i32) {
    %c0_i32 = arith.constant 0 : i32
    %c0_i32_0 = arith.constant 0 : i32
    %c0_i32_1 = arith.constant 0 : i32
    return %arg1, %c0_i32, %c0_i32_0 : i32, i32, i32
  }
  func.func @transform_9(%arg0: i32, %arg1: i32) -> (i32, i32, i32) {
    %c0_i32 = arith.constant 0 : i32
    %c0_i32_0 = arith.constant 0 : i32
    %c0_i32_1 = arith.constant 0 : i32
    return %arg1, %c0_i32, %c0_i32_0 : i32, i32, i32
  }
  func.func @transform_10(%arg0: i32, %arg1: i32) -> (i32, i32, i32) {
    %c0_i32 = arith.constant 0 : i32
    %c0_i32_0 = arith.constant 0 : i32
    %c0_i32_1 = arith.constant 0 : i32
    return %arg1, %c0_i32, %c0_i32_0 : i32, i32, i32
  }
  func.func @transform_11(%arg0: i32, %arg1: i32) -> (i32, i32, i32) {
    %c0_i32 = arith.constant 0 : i32
    %c0_i32_0 = arith.constant 0 : i32
    %c0_i32_1 = arith.constant 0 : i32
    return %arg1, %c0_i32, %c0_i32_0 : i32, i32, i32
  }
  func.func @transform_12(%arg0: i32, %arg1: i32) -> (i32, i32, i32) {
    %c0_i32 = arith.constant 0 : i32
    %c0_i32_0 = arith.constant 0 : i32
    %c0_i32_1 = arith.constant 0 : i32
    return %arg1, %c0_i32, %c0_i32_0 : i32, i32, i32
  }
  func.func @transform_13(%arg0: i32, %arg1: i32) -> (i32, i32, i32) {
    %c0_i32 = arith.constant 0 : i32
    %c0_i32_0 = arith.constant 0 : i32
    %c0_i32_1 = arith.constant 0 : i32
    return %arg1, %c0_i32, %c0_i32_0 : i32, i32, i32
  }
  func.func @transform_14(%arg0: i32, %arg1: i32) -> (i32, i32, i32) {
    %c0_i32 = arith.constant 0 : i32
    %c0_i32_0 = arith.constant 0 : i32
    %c0_i32_1 = arith.constant 0 : i32
    return %arg1, %c0_i32, %c0_i32_0 : i32, i32, i32
  }
  func.func @transform_15(%arg0: i32, %arg1: i32) -> (i32, i32, i32) {
    %c0_i32 = arith.constant 0 : i32
    %c0_i32_0 = arith.constant 0 : i32
    %c0_i32_1 = arith.constant 0 : i32
    return %arg1, %c0_i32, %c0_i32_0 : i32, i32, i32
  }
  func.func @transform_16(%arg0: i32, %arg1: i32) -> (i32, i32, i32) {
    %c0_i32 = arith.constant 0 : i32
    %c0_i32_0 = arith.constant 0 : i32
    %c0_i32_1 = arith.constant 0 : i32
    return %arg1, %c0_i32, %c0_i32_0 : i32, i32, i32
  }
  func.func @transform_17(%arg0: i32, %arg1: i32) -> (i32, i32, i32) {
    %c0_i32 = arith.constant 0 : i32
    %c0_i32_0 = arith.constant 0 : i32
    %c0_i32_1 = arith.constant 0 : i32
    return %arg1, %c0_i32, %c0_i32_0 : i32, i32, i32
  }
  func.func @transform_18(%arg0: i32, %arg1: i32) -> (i32, i32, i32) {
    %c0_i32 = arith.constant 0 : i32
    %c0_i32_0 = arith.constant 0 : i32
    %c0_i32_1 = arith.constant 0 : i32
    return %arg1, %c0_i32, %c0_i32_0 : i32, i32, i32
  }
  func.func @transform_19(%arg0: i32, %arg1: i32) -> (i32, i32, i32) {
    %c0_i32 = arith.constant 0 : i32
    %c0_i32_0 = arith.constant 0 : i32
    %c0_i32_1 = arith.constant 0 : i32
    return %arg1, %c0_i32, %c0_i32_0 : i32, i32, i32
  }
  func.func @transform_20(%arg0: i32, %arg1: i32) -> (i32, i32, i32) {
    %c0_i32 = arith.constant 0 : i32
    %c0_i32_0 = arith.constant 0 : i32
    %c0_i32_1 = arith.constant 0 : i32
    return %arg1, %c0_i32, %c0_i32_0 : i32, i32, i32
  }
  func.func @transform_21(%arg0: i32, %arg1: i32) -> (i32, i32, i32) {
    %c0_i32 = arith.constant 0 : i32
    %c0_i32_0 = arith.constant 0 : i32
    %c0_i32_1 = arith.constant 0 : i32
    return %arg1, %c0_i32, %c0_i32_0 : i32, i32, i32
  }
  func.func @transform_22(%arg0: i32, %arg1: i32) -> (i32, i32, i32) {
    %c0_i32 = arith.constant 0 : i32
    %c0_i32_0 = arith.constant 0 : i32
    %c0_i32_1 = arith.constant 0 : i32
    return %arg1, %c0_i32, %c0_i32_0 : i32, i32, i32
  }
  func.func @transform_23(%arg0: i32, %arg1: i32) -> (i32, i32, i32) {
    %c0_i32 = arith.constant 0 : i32
    %c0_i32_0 = arith.constant 0 : i32
    %c0_i32_1 = arith.constant 0 : i32
    return %arg1, %c0_i32, %c0_i32_0 : i32, i32, i32
  }
  func.func @transform_24(%arg0: i32, %arg1: i32) -> (i32, i32, i32) {
    %c0_i32 = arith.constant 0 : i32
    %c0_i32_0 = arith.constant 0 : i32
    %c0_i32_1 = arith.constant 0 : i32
    return %arg1, %c0_i32, %c0_i32_0 : i32, i32, i32
  }
  func.func @transform_25(%arg0: i32, %arg1: i32) -> (i32, i32, i32) {
    %c0_i32 = arith.constant 0 : i32
    %c0_i32_0 = arith.constant 0 : i32
    %c0_i32_1 = arith.constant 0 : i32
    return %arg1, %c0_i32, %c0_i32_0 : i32, i32, i32
  }
  func.func @transform_26(%arg0: i32, %arg1: i32) -> (i32, i32, i32) {
    %c0_i32 = arith.constant 0 : i32
    %c0_i32_0 = arith.constant 0 : i32
    %c0_i32_1 = arith.constant 0 : i32
    return %arg1, %c0_i32, %c0_i32_0 : i32, i32, i32
  }
  func.func @transform_27(%arg0: i32, %arg1: i32) -> (i32, i32, i32) {
    %c0_i32 = arith.constant 0 : i32
    %c0_i32_0 = arith.constant 0 : i32
    %c0_i32_1 = arith.constant 0 : i32
    return %arg1, %c0_i32, %c0_i32_0 : i32, i32, i32
  }
  func.func @transform_28(%arg0: i32, %arg1: i32) -> (i32, i32, i32) {
    %c0_i32 = arith.constant 0 : i32
    %c0_i32_0 = arith.constant 0 : i32
    %c0_i32_1 = arith.constant 0 : i32
    return %arg1, %c0_i32, %c0_i32_0 : i32, i32, i32
  }
  func.func @transform_29(%arg0: i32, %arg1: i32) -> (i32, i32, i32) {
    %c0_i32 = arith.constant 0 : i32
    %c0_i32_0 = arith.constant 0 : i32
    %c0_i32_1 = arith.constant 0 : i32
    return %arg1, %c0_i32, %c0_i32_0 : i32, i32, i32
  }
  func.func @transform_30(%arg0: i32, %arg1: i32) -> (i32, i32, i32) {
    %c0_i32 = arith.constant 0 : i32
    %c0_i32_0 = arith.constant 0 : i32
    %c0_i32_1 = arith.constant 0 : i32
    return %arg0, %c0_i32, %c0_i32_0 : i32, i32, i32
  }
}

</mosaic_0001>

<bundles_post_ra>
// kernel: cmt_forward.1
= control target key start
LH: loop header
LB: loop body
LE: loop exit
PB: predicated region body
PF: predicated region fallthrough
CT: control target
= control target key end

     0   :  { %s8520_s6 = smov 1   ;;  %s8521_s10 = smov 2   ;;  %s10858_s0 = inlined_call_operand.smem [shape: u32[31], index: -1, kind: input, shape index: {}] }
   0x1   :  { %s8594_s5 = sld [smem:[%s10858_s0]]   ;;  %s8522_s14 = smov 3  }
   0x2   :  { %s8599_s9 = sld [smem:[%s10858_s0 + %s8520_s6]]   ;;  %s8523_s18 = smov 4  }
   0x3   :  { %s8604_s13 = sld [smem:[%s10858_s0 + %s8521_s10]]   ;;  %s8524_s22 = smov 5  }
   0x4   :  { %s8609_s17 = sld [smem:[%s10858_s0 + %s8522_s14]]   ;;  %s8525_s26 = smov 6  }
   0x5   :  { %s8614_s21 = sld [smem:[%s10858_s0 + %s8523_s18]]   ;;  %s8526_s30 = smov 7  }
   0x6   :  { %s8619_s25 = sld [smem:[%s10858_s0 + %s8524_s22]]   ;;  %s8527_s4 = smov 8  }
   0x7   :  { %10941 = sst [smem:[#allocation5_spill]] %s8594_s5  ;;  %s8528_s10 = smov 9  }
   0x8   :  { %10942 = sst [smem:[#allocation6_spill]] %s8599_s9  ;;  %s8529_s15 = smov 10  }
   0x9   :  { %10943 = sst [smem:[#allocation7_spill]] %s8604_s13  ;;  %s8530_s20 = smov 11  }
   0xa   :  { %10944 = sst [smem:[#allocation8_spill]] %s8609_s17  ;;  %s8532_s1 = smov 13  }
   0xb   :  { %10945 = sst [smem:[#allocation9_spill]] %s8614_s21  ;;  %s8533_s7 = smov 14  }
   0xc   :  { %10946 = sst [smem:[#allocation10_spill]] %s8619_s25  ;;  %s8535_s22 = smov 16  }
   0xd   :  { %s8624_s29 = sld [smem:[%s10858_s0 + %s8525_s26]]   ;;  %s8531_s26 = smov 12  }
   0xe   :  { %s8629_s3 = sld [smem:[%s10858_s0 + %s8526_s30]]   ;;  %s8536_s28 = smov 17  }
   0xf   :  { %s8634_s8 = sld [smem:[%s10858_s0 + %s8527_s4]]  }
  0x10   :  { %s8639_s14 = sld [smem:[%s10858_s0 + %s8528_s10]]  }
  0x11   :  { %s8644_s19 = sld [smem:[%s10858_s0 + %s8529_s15]]   ;;  %s8534_s15 = smov 15  }
  0x12   :  { %s8649_s24 = sld [smem:[%s10858_s0 + %s8530_s20]]  }
  0x13   :  { %10947 = sst [smem:[#allocation11_spill]] %s8624_s29 }
  0x14   :  { %10948 = sst [smem:[#allocation12_spill]] %s8629_s3 }
  0x15   :  { %10949 = sst [smem:[#allocation13_spill]] %s8634_s8 }
  0x16   :  { %10950 = sst [smem:[#allocation14_spill]] %s8639_s14 }
  0x17   :  { %10951 = sst [smem:[#allocation15_spill]] %s8644_s19 }
  0x18   :  { %10952 = sst [smem:[#allocation16_spill]] %s8649_s24 }
  0x19   :  { %s8654_s30 = sld [smem:[%s10858_s0 + %s8531_s26]]  }
  0x1a   :  { %s8659_s6 = sld [smem:[%s10858_s0 + %s8532_s1]]  }
  0x1b   :  { %s8664_s12 = sld [smem:[%s10858_s0 + %s8533_s7]]   ;;  %s8537_s7 = smov 18  }
  0x1c   :  { %s8669_s20 = sld [smem:[%s10858_s0 + %s8534_s15]]   ;;  %s8538_s15 = smov 19  }
  0x1d   :  { %s8674_s27 = sld [smem:[%s10858_s0 + %s8535_s22]]   ;;  %s8539_s22 = smov 20  }
  0x1e   :  { %s8679_s4 = sld [smem:[%s10858_s0 + %s8536_s28]]   ;;  %s8540_s28 = smov 21  }
  0x1f   :  { %10953 = sst [smem:[#allocation17_spill]] %s8654_s30 }
  0x20   :  { %10954 = sst [smem:[#allocation18_spill]] %s8659_s6 }
  0x21   :  { %10955 = sst [smem:[#allocation19_spill]] %s8664_s12 }
  0x22   :  { %10956 = sst [smem:[#allocation20_spill]] %s8669_s20 }
  0x23   :  { %10957 = sst [smem:[#allocation21_spill]] %s8674_s27 }
  0x24   :  { %10958 = sst [smem:[#allocation22_spill]] %s8679_s4 }
  0x25   :  { %s8684_s12 = sld [smem:[%s10858_s0 + %s8537_s7]]   ;;  %s8541_s7 = smov 22  }
  0x26   :  { %s8689_s20 = sld [smem:[%s10858_s0 + %s8538_s15]]   ;;  %s8542_s15 = smov 23  }
  0x27   :  { %s8694_s27 = sld [smem:[%s10858_s0 + %s8539_s22]]   ;;  %s8543_s22 = smov 24  }
  0x28   :  { %s8699_s4 = sld [smem:[%s10858_s0 + %s8540_s28]]   ;;  %s8544_s28 = smov 25  }
  0x2b   :  { %10959 = sst [smem:[#allocation23_spill]] %s8684_s12 }
  0x2c   :  { %10960 = sst [smem:[#allocation24_spill]] %s8689_s20 }
  0x2d   :  { %10961 = sst [smem:[#allocation25_spill]] %s8694_s27 }
  0x2e   :  { %10962 = sst [smem:[#allocation26_spill]] %s8699_s4 }
  0x2f   :  { %s8704_s12 = sld [smem:[%s10858_s0 + %s8541_s7]]   ;;  %s8545_s7 = smov 26  }
  0x30   :  { %s8709_s20 = sld [smem:[%s10858_s0 + %s8542_s15]]   ;;  %s8546_s15 = smov 27  }
  0x31   :  { %s8714_s27 = sld [smem:[%s10858_s0 + %s8543_s22]]   ;;  %s8547_s22 = smov 28  }
  0x32   :  { %s8719_s4 = sld [smem:[%s10858_s0 + %s8544_s28]]   ;;  %s8548_s28 = smov 29  }
  0x35   :  { %10963 = sst [smem:[#allocation27_spill]] %s8704_s12 }
  0x36   :  { %10964 = sst [smem:[#allocation28_spill]] %s8709_s20 }
  0x37   :  { %10965 = sst [smem:[#allocation29_spill]] %s8714_s27 }
  0x38   :  { %10966 = sst [smem:[#allocation30_spill]] %s8719_s4 }
  0x39   :  { %s8724_s12 = sld [smem:[%s10858_s0 + %s8545_s7]]   ;;  %s8549_s7 = smov 30  }
  0x3a   :  { %s8729_s20 = sld [smem:[%s10858_s0 + %s8546_s15]]  }
  0x3b   :  { %s8734_s27 = sld [smem:[%s10858_s0 + %s8547_s22]]  }
  0x3c   :  { %s8739_s4 = sld [smem:[%s10858_s0 + %s8548_s28]]  }
  0x3f   :  { %10967 = sst [smem:[#allocation31_spill]] %s8724_s12 }
  0x40   :  { %s8744_s12 = sld [smem:[%s10858_s0 + %s8549_s7]]  }
  0x41   :  { %10968 = sst [smem:[#allocation32_spill]] %s8734_s27 }
  0x42   :  { %10969 = sst [smem:[#allocation33_spill]] %s8739_s4 }
  0x46   :  { %10970 = sst [smem:[#allocation34_spill]] %s8744_s12 }
  0x47   :  { %66 = vsyncpa [#allocation3], 0 }
  0x48   :  { %68 = vsyncpa [#allocation3 + $0x1], 0  ;;  %s8746_s15 = smov 0   ;;  %s8748_s16 = smov 0  }
  0x49   :  { %s8750_s18 = smov 0   ;;  %s8752_s22 = smov 0  }
  0x4a   :  { %s8754_s23 = smov 0   ;;  %s8756_s26 = smov 0  }
  0x4b   :  { %s8758_s28 = smov 0   ;;  %s8760_s1 = smov 0  }
  0x4c LB: > { %10971 = sst [smem:[#allocation35_spill]] %s8490_s15  ;;  %s7085_s0 = sadd.s32 4294967295, %s8518_s1   ;;  %s8518_s1 = sphi %s8760_s1, %s74_s1   ;;  %s8514_s28 = sphi %s8758_s28, %s11171_s28   ;;  %s8510_s26 = sphi %s8756_s26, %s11170_s26   ;;  %s8506_s23 = sphi %s8754_s23, %s11169_s23   ;;  %s8502_s22 = sphi %s8752_s22, %s11168_s22   ;;  %s8498_s18 = sphi %s8750_s18, %s11167_s18   ;;  %s8494_s16 = sphi %s8748_s16, %s11166_s16   ;;  %s8490_s15 = sphi %s8746_s15, %s11165_s15  }
  0x4d   : > { %10972 = sst [smem:[#allocation36_spill]] %s8494_s16  ;;  %s7086_s2 = sadd.s32 4294967294, %s8518_s1  }
  0x4e   : > { %10973 = sst [smem:[#allocation37_spill]] %s8498_s18  ;;  %s83_s7 = sadd.s32 1, %s8510_s26 }
  0x4f   : > { %10974 = sst [smem:[#allocation38_spill]] %s8502_s22  ;;  %p84_p0 = scmp.ge.s32.totalorder %s83_s7, 2 }
  0x50   : > { %10975 = sst [smem:[#allocation39_spill]] %s8506_s23  ;;  %s86_s10 = sadd.s32 1, %s8514_s28 }
  0x51   : > { %10976 = sst [smem:[#allocation40_spill]] %s8510_s26  ;;  %p883_p1 = scmp.ne.s32.totalorder %s8498_s18, %s8494_s16 }
  0x52   : > { %10977 = sst [smem:[#allocation41_spill]] %s8514_s28  ;;  %p884_p2 = scmp.eq.s32.totalorder %s7085_s0, 3 }
  0x53   : > { %10978 = sst [smem:[#allocation42_spill]] %s8518_s1  ;;  %s11173_s7 = smov (%p84_p0, %s83_s7), 0 }
  0x54   : > { %10979 = sst [smem:[#allocation43_spill]] %s11173_s7  ;;  %s11175_s10 = smov (!%p84_p0, %s86_s10), %s8514_s28 }
  0x55   : > { %p8795_p3 = por %p884_p2, %p883_p1  ;;  %p889_p4 = scmp.ne.s32.totalorder %s8494_s16, %s8490_s15 }
  0x56   : > { %p88_p5 = scmp.ge.s32.totalorder %s11175_s10, 2  ;;  %p890_p6 = scmp.eq.s32.totalorder %s7086_s2, 3 }
  0x57   : > { %s10980_s11 = scalar_select %p8795_p3, 1, 0 }
  0x58   : > { %p7089_p7 = scmp.ge.s32.totalorder %s8518_s1, 1  ;;  %p1113_p8 = scmp.lt.s32.totalorder %s8518_s1, 5 }
  0x59   : > { %10981 = sst [smem:[#allocation44_spill]] %s10980_s11  ;;  %s11177_s10 = smov (%p88_p5, %s11175_s10), 0 }
  0x5a   : > { %10982 = sst [smem:[#allocation45_spill]] %s11177_s10  ;;  %p8805_p9 = por %p890_p6, %p889_p4 }
  0x5b   : > { %p1114_p10 = pnand %p7089_p7, %p1113_p8  ;;  %s870_s0 = ssub.s32 %s8514_s28, %s11177_s10 }
  0x5c   : > { %s10983_s26 = scalar_select %p8805_p9, 1, 0 }
  0x5d   : > { %s873_s7 = sadd.s32 1, %s8498_s18  ;;  %p871_p11 = scmp.eq.s32.totalorder %s870_s0, 0 }
  0x5e   : > { %10984 = sst [smem:[#allocation46_spill]] %s10983_s26  ;;  %1117 = sbr.rel (%p1114_p10) target bundleno = 4867 (0x1303), region = 140 }
  0x5f   : > { %s8813_s12 = scalar_select %p871_p11, %s8498_s18, %s873_s7  }
  0x61   : > { %10985 = sst [smem:[#allocation47_spill]] %s8813_s12 }
  0x63   : > { %s10986_s5 = sld [smem:[#allocation5_spill]]  ;;  %s10863_s2 = sand.u32 1, %s8494_s16  }
  0x64   : > { %s10987_s9 = sld [smem:[#allocation6_spill]]  ;;  %p1301_p12 = scmp.lt.s32.totalorder %s8506_s23, 1 }
  0x65   : > { %s10988_s13 = sld [smem:[#allocation7_spill]]  ;;  %s8819_s7 = sshll.u32 %s10863_s2, 4 }
  0x66   : > { %s10991_s17 = sld [smem:[#allocation8_spill]]  ;;  %p1326_p13 = scmp.lt.s32.totalorder %s8502_s22, 1 }
  0x67   : > { %10994 = sst [smem:[#allocation48_spill]] %s8819_s7 }
  0x68   : > { %s10995_s8 = sld [smem:[#allocation13_spill]] }
  0x69   : > { %s8823_s0 = scalar_select %p1301_p12, %s8506_s23, 1 }
  0x6a   : > { %s10997_s14 = sld [smem:[#allocation14_spill]] }
  0x6b   : > { %10996 = sst [smem:[#allocation49_spill]] %s8823_s0  ;;  %s7393_s28 = sshll.u32 %s8823_s0, 4 }
  0x6c   : > { %s8826_s10 = scalar_select %p1326_p13, %s8502_s22, 1 }
  0x6d   : > { %s10998_s19 = sld [smem:[#allocation15_spill]]  ;;  %s7095_s2 = sshll.u32 %s8823_s0, 3 }
  0x6e   : > { %s8831_s12 = scalar_lea.vmem %s10986_s5, %s7393_s28  ;;  %s11001_s30 = sld [smem:[#allocation17_spill]] }
  0x6f   : > { %11000 = sst [smem:[#allocation50_spill]] %s8831_s12  ;;  %s8834_s18 = scalar_lea.vmem %s10987_s9, %s7393_s28 }
  0x70   : > { %11002 = sst [smem:[#allocation51_spill]] %s8834_s18  ;;  %s8837_s26 = scalar_lea.vmem %s10988_s13, %s7095_s2 }
  0x71   : > { %11004 = sst [smem:[#allocation52_spill]] %s8837_s26  ;;  %s7793_s1 = smul.u32 80, %s8823_s0 }
  0x72   : > { %s11007_s23 = sld [smem:[#allocation21_spill]]  ;;  %s7395_s13 = sshll.u32 %s8826_s10, 6 }
  0x73   : > { %s8845_s5 = scalar_lea.vmem %s10991_s17, %s7793_s1  ;;  %s11010_s12 = sld [smem:[#allocation23_spill]] }
  0x74   : > { %11009 = sst [smem:[#allocation53_spill]] %s8845_s5  ;;  %s8853_s27 = scalar_lea.vmem %s10995_s8, %s7395_s13 }
  0x75   : > { %s11011_s9 = sld [smem:[#allocation24_spill]]  ;;  %s7099_s16 = sshll.u32 %s8826_s10, 1 }
  0x76   : > { %s11012_s2 = sld [smem:[#allocation25_spill]]  ;;  %s8857_s22 = scalar_lea.vmem %s10997_s14, %s7099_s16 }
  0x77   : > { %s11013_s26 = sld [smem:[#allocation26_spill]]  ;;  %s7396_s17 = sshll.u32 %s8826_s10, 5 }
  0x78   : > { %11014 = sst [smem:[#allocation54_spill]] %s8853_s27  ;;  %s8861_s25 = scalar_lea.vmem %s10998_s19, %s7396_s17 }
  0x79   : > { %s11015_s4 = sld [smem:[#allocation27_spill]]  ;;  %s8866_s0 = scalar_lea.vmem %s11001_s30, %s7396_s17 }
  0x7a   : > { %s11016_s21 = sld [smem:[#allocation28_spill]]  ;;  %s1365_s14 = scalar_lea.vmem %s11007_s23, %s8826_s10 }
  0x7b   : > { %11017 = sst [smem:[#allocation55_spill]] %s8857_s22  ;;  %s8879_s19 = scalar_lea.vmem %s11010_s12, %s7396_s17 }
  0x7c   : > { %s11018_s1 = sld [smem:[#allocation29_spill]]  ;;  %s8884_s18 = scalar_lea.vmem %s11012_s2, %s7396_s17 }
  0x7d   : > { %s11019_s28 = sld [smem:[#allocation30_spill]]  ;;  %s1384_s24 = scalar_lea.vmem %s11013_s26, %s8826_s10 }
  0x7e   : > { %11020 = sst [smem:[#allocation56_spill]] %s8861_s25  ;;  %s1376_s25 = scalar_lea.vmem %s11011_s9, %s8826_s10 }
  0x7f   : > { %11021 = sst [smem:[#allocation57_spill]] %s8866_s0  ;;  %s8889_s30 = scalar_lea.vmem %s11015_s4, %s7396_s17 }
  0x80   : > { %s11022_s13 = sld [smem:[#allocation31_spill]]  ;;  %s1392_s0 = scalar_lea.vmem %s11016_s21, %s8826_s10 }
  0x81   : > { %s11023_s16 = sld [smem:[#allocation33_spill]]  ;;  %s7401_s15 = sshll.u32 %s8826_s10, 9 }
  0x82   : > { %s11024_s22 = sld [smem:[#allocation32_spill]]  ;;  %s1395_s8 = scalar_lea.vmem %s11018_s1, %s8826_s10 }
  0x83   : > { %s11025_s27 = sld [smem:[#allocation48_spill]]  ;;  %s1398_s6 = scalar_lea.vmem %s11019_s28, %s8826_s10 }
  0x84   : > { %s7112_s5 = sshll.u32 %s8826_s10, 4  ;;  %s7402_s23 = sshll.u32 %s8826_s10, 10 }
  0x85   : > { %s8903_s3 = scalar_lea.vmem %s8729_s20, %s7112_s5  ;;  %s11026_s9 = sld [smem:[#allocation38_spill]] }
  0x86   : > { %s8900_s11 = scalar_lea.vmem %s11022_s13, %s7401_s15 }
  0x87   : > { %s1415_s7 = scalar_lea.vmem %s11023_s16, %s8826_s10 }
  0x88   : > { %s8909_s29 = scalar_lea.vmem %s11024_s22, %s7402_s23 }
  0x89   : > { %s8912_s12 = scalar_lea.vmem [#allocation2], %s11025_s27 }
  0x8b   : > { %p7115_p0 = scmp.ne.s32.totalorder %s11026_s9, 0 }
  0x8c   : > { %s11027_s17 = sld [smem:[#allocation50_spill]] (!%p7115_p0) }
  0x8d   : > { %1420 = sbr.rel (%p7115_p0) target bundleno = 148 (0x94), region = 144 }
  0x92   : > { %v1421_v0 = vld [vmem:[%s11027_s17] sm:$0xff]  ;;  %vm1423_vm0 = vcmask 523264   ;;  %v1422_v1 = vld [vmem:[%s11027_s17 + $0x8] sm:$0xff] }
  0x93   : > { %1424 = vst.msk [vmem:[%s8912_s12] sm:$0xff] %vm1423_vm0, %v1421_v0  ;;  %1425 = vst.msk [vmem:[%s8912_s12 + $0x8] sm:$0xff] %vm1423_vm0, %v1422_v1 }
  0x94 PF: > { %s11028_s5 = sld [smem:[#allocation51_spill]]  ;;  %vm1438_vm1 = vcmask 523264   ;;  %v8550_v23 = vmov 0.0   ;;  %v8551_v28 = vmov 0   ;;  %vm8552_vm2 = vmmov 0   ;;  %s8555_s16 = smov 48  }
  0x95   : > { %s11029_s21 = sld [smem:[#allocation54_spill]]  ;;  %7637 = vmatprep.subr.bf16.mxu1 %v8550_v23  ;;  %1578 = vmatprep.mubr.bf16.mxu0 %v8551_v28  ;;  %v1493_v40 = vlaneseq  ;;  %v8553_v59 = vmov 2   ;;  %v8554_v60 = vmov 1   ;;  %s8556_s15 = smov 64   ;;  %vm1695_vm3 = vcmask 130048  }
  0x96   : > { %s11030_s27 = sld [smem:[#allocation56_spill]]  ;;  %7645 = vmatprep.mubr.msk.bf16.mxu1 %vm8552_vm2, %v8550_v23  ;;  %7932 = vset.pattern.permute.xlu0 %v8553_v59  ;;  %s8557_s23 = smov 112   ;;  %vm2584_vm6 = vcmask 261120   ;;  %vm2587_vm7 = vcmask 392192   ;;  %vm2992_vm10 = vcmask 64512   ;;  %vm3022_vm11 = vcmask 1043456  }
  0x97   : > { %s11031_s4 = sld [smem:[#allocation11_spill]]  ;;  %v8956_v41 = vshrl.u32 %v1493_v40, 7  ;;  %7930 = vset.pattern.permute.xlu1 %v8554_v60  ;;  %s8558_s9 = smov 96  }
  0x98   : > { %s11032_s22 = sld [smem:[#allocation12_spill]] }
  0x99   : > { %s11033_s26 = sld [smem:[#allocation52_spill]]  ;;  %11034 = vst [vmem:[#allocation58_spill] sm:$0xff] %v8956_v41  ;;  %v8962_v46 = vsub.s32 0, %v8956_v41 }
  0x9a   : > { %v1426_v2 = vld [vmem:[%s8912_s12] sm:$0xff]  ;;  %v1427_v4 = vld [vmem:[%s8912_s12 + $0x8] sm:$0xff]  ;;  %s11037_s1 = sld [smem:[#allocation55_spill]] }
  0x9b   : > { %v1428_v3 = vld [vmem:[%s11028_s5] sm:$0xff]  ;;  %v1429_v6 = vld [vmem:[%s11028_s5 + $0x8] sm:$0xff]  ;;  %v8008_v20 = vld [vmem:[%s11029_s21 + $0x34] ss:$8 sps:$4 sm:$0xff]   ;;  %s11038_s13 = sld [smem:[#allocation16_spill]]  ;;  %s8559_s5 = smov 32  }
  0x9c   : > { %v8922_v5 = vadd.f32 %v1428_v3, %v1426_v2  ;;  %v8925_v7 = vadd.f32 %v1429_v6, %v1427_v4  ;;  %v8010_v21 = vld [vmem:[%s11029_s21 + $0x30] ss:$8 sps:$4 sm:$0xff]   ;;  %v8012_v24 = vld [vmem:[%s11029_s21 + $0x24] ss:$8 sps:$4 sm:$0xff]   ;;  %1554 = vmatprep.subr.bf16.mxu0 %v8008_v20  ;;  %v8014_v26 = vld [vmem:[%s11029_s21 + $0x20] ss:$8 sps:$4 sm:$0xff]  }
  0x9d   : > { %v8011_v22 = vld [vmem:[%s11030_s27 + $0x18] sm:$0xff]   ;;  %v8015_v25 = vld [vmem:[%s11030_s27 + $0x10] sm:$0xff]   ;;  %1555 = vmatpush1.bf16.msra.mxu0 %v8010_v21  ;;  %v8019_v29 = vld [vmem:[%s11030_s27 + $0x8] sm:$0xff]   ;;  %s11035_s28 = scalar_lea.vmem %s11031_s4, %s8826_s10  ;;  %v8569_v20 = vmov 17   ;;  %v8570_v21 = vmov 6   ;;  %s11040_s4 = sld [smem:[#allocation53_spill]] }
  0x9e   : > { %v1439_v8 = vsel %vm1438_vm1, %v8922_v5, 0.0  ;;  %v1442_v9 = vsel %vm1438_vm1, %v8925_v7, 0.0  ;;  %7638 = vmatpush3.bf16.msra.mxu1 %v8011_v22  ;;  %1556 = vmatprep.subr.bf16.mxu0 %v8012_v24  ;;  %v8016_v27 = vld [vmem:[%s11029_s21 + $0x14] ss:$8 sps:$4 sm:$0xff]   ;;  %v8018_v30 = vld [vmem:[%s11029_s21 + $0x10] ss:$8 sps:$4 sm:$0xff]   ;;  %s11036_s2 = scalar_lea.vmem %s11032_s22, %s8826_s10 }
  0x9f   : > { %1440 = vadd.xlane.f32.xlu0 %v1439_v8  ;;  %7639 = vmatprep.subr.bf16.mxu1 %v8550_v23  ;;  %v8020_v31 = vld [vmem:[%s11029_s21 + $0x4] ss:$8 sps:$4 sm:$0xff]   ;;  %v8022_v33 = vld [vmem:[%s11029_s21] ss:$8 sps:$4 sm:$0xff]   ;;  %s8560_s21 = smov 80   ;;  %v8571_v22 = vmov 20  }
  0xa0   : > { %v8023_v32 = vld [vmem:[%s11030_s27] sm:$0xff]   ;;  %s8561_s27 = smov 16   ;;  %s11041_s22 = sld [smem:[#allocation9_spill]] }
  0xa1   : > { %1557 = vmatpush1.bf16.msra.mxu0 %v8014_v26  ;;  %v7116_v43 = vld [vmem:[%s11035_s28] ss:$0 sm:$0xff]  ;;  %s11039_s17 = scalar_lea.vmem %s11038_s13, %s8826_s10  ;;  %v8573_v26 = vmov 10   ;;  %s11042_s28 = sld [smem:[#allocation49_spill]] }
  0xa2   : > { %7640 = vmatpush3.bf16.msra.mxu1 %v8015_v25  ;;  %1558 = vmatprep.subr.bf16.mxu0 %v8016_v27  ;;  %v7117_v48 = vld [vmem:[%s11036_s2] ss:$0 sm:$0xff]  ;;  %v8572_v25 = vmov 9   ;;  %v8574_v27 = vmov 13   ;;  %s11047_s13 = sld [smem:[#allocation18_spill]] }
  0xa3   : > { %1443 = vadd.xlane.f32.xlu0 %v1442_v9  ;;  %7641 = vmatprep.subr.bf16.mxu1 %v8550_v23  ;;  %v1589_v49 = vld [vmem:[%s11033_s26] sm:$0xff] }
  0xa4   : > { %v1593_v53 = vrot.slane %v1589_v49, %v8962_v46  ;;  %v8986_v61 = vld [vmem:[%s11037_s1] sm:$0x3]  ;;  %s11046_s1 = sld [smem:[#allocation57_spill]] }
  0xa5   : > { %1559 = vmatpush1.bf16.msra.mxu0 %v8018_v30  ;;  %v1496_v63 = vrot.slane %v8986_v61, %v8962_v46  ;;  %v8576_v30 = vmov 15  }
  0xa6   : > { %7642 = vmatpush3.bf16.msra.mxu1 %v8019_v29  ;;  %1560 = vmatprep.subr.bf16.mxu0 %v8020_v31  ;;  %v8575_v29 = vmov 12   ;;  %v8577_v31 = vmov 16  }
  0xa7   : > { %7643 = vmatprep.subr.bf16.mxu1 %v8550_v23  ;;  %s11043_s2 = scalar_lea.vmem %s11041_s22, %s11042_s28  ;;  %s11050_s22 = sld [smem:[#allocation20_spill]] }
  0xa9   : > { %1561 = vmatpush1.bf16.msra.mxu0 %v8022_v33  ;;  %v8579_v33 = vmov 18  }
  0xaa   : > { %7644 = vmatpush3.bf16.msra.mxu1 %v8023_v32  ;;  %7661 = vmatprep.subr.bf16.mxu0 %v8550_v23  ;;  %v8578_v32 = vmov 19  }
  0xab   : > { %7649 = vmatprep.subr.bf16.mxu1 %v8550_v23 }
 0x128   : > { %v1441_v10 = vpop.xlane.xlu0 %1440 }
 0x129   : > { %v1446_v11 = vmul.f32 0.015625, %v1441_v10 }
 0x12b   : > { %v1448_v12 = vsub.f32 %v8922_v5, %v1446_v11  ;;  %v7127_v11 = vld [vmem:[%s11039_s17] ss:$0 sm:$0xff]  ;;  %s11048_s17 = scalar_lea.vmem %s11047_s13, %s8826_s10 }
 0x12c   : > { %v1444_v13 = vpop.xlane.xlu0 %1443 }
 0x12d   : > { %v1447_v14 = vmul.f32 0.015625, %v1444_v13  ;;  %v1450_v15 = vmul.f32 %v1448_v12, %v1448_v12  ;;  %v8562_v13 = vmov 5  }
 0x12f   : > { %v1449_v16 = vsub.f32 %v8925_v7, %v1447_v14  ;;  %v1452_v17 = vsel %vm1438_vm1, %v1450_v15, 0.0  ;;  %v8563_v14 = vmov 8   ;;  %v8564_v15 = vmov 3  }
 0x130   : > { %1453 = vadd.xlane.f32.xlu1 %v1452_v17  ;;  %v8566_v17 = vmov 4  }
 0x131   : > { %v1451_v18 = vmul.f32 %v1449_v16, %v1449_v16 }
 0x133   : > { %v1455_v19 = vsel %vm1438_vm1, %v1451_v18, 0.0  ;;  %v8567_v18 = vmov 14  }
 0x134   : > { %1456 = vadd.xlane.f32.xlu1 %v1455_v19  ;;  %v8568_v19 = vmov 7  }
 0x1b9   : > { %v1454_v34 = vpop.xlane.xlu1 %1453 }
 0x1ba   : > { %v1458_v35 = vmul.f32 0.015625, %v1454_v34  ;;  %v8580_v34 = vmov 21  }
 0x1bc   : > { %v1460_v36 = vadd.f32 1e-05, %v1458_v35  ;;  %v8581_v35 = vmov 23  }
 0x1bd   : > { %v1457_v37 = vpop.xlane.xlu1 %1456 }
 0x1be   : > { %8168 = vrsqrt.f32 %v1460_v36  ;;  %v1459_v38 = vmul.f32 0.015625, %v1457_v37  ;;  %v8582_v36 = vmov 22   ;;  %v9072_v37 = vsub.s32 1, %v8956_v41 }
 0x1c0   : > { %v1461_v39 = vadd.f32 1e-05, %v1459_v38 }
 0x1c2   : > { %8170 = vrsqrt.f32 %v1461_v39 }
 0x1cb   : > { %v8169_v42 = vpop.eup %8168 }
 0x1cc   : > { %v1464_v44 = vmul.f32 %v8169_v42, %v1448_v12 }
 0x1ce   : > { %v1472_v45 = vmul.f32 %v7116_v43, %v1464_v44  ;;  %v1500_v44 = vrot.slane %v8986_v61, %v9072_v37 }
 0x1cf   : > { %v8171_v47 = vpop.eup %8170 }
 0x1d0   : > { %v1465_v50 = vmul.f32 %v8171_v47, %v1449_v16  ;;  %v8968_v52 = vadd.f32 %v7117_v48, %v1472_v45  ;;  %v8565_v16 = vmov 11  }
 0x1d2   : > { %v1473_v51 = vmul.f32 %v7116_v43, %v1465_v50  ;;  %v1594_v56 = vadd.f32 %v1593_v53, %v8968_v52 }
 0x1d4   : > { %v8971_v54 = vadd.f32 %v7117_v48, %v1473_v51 }
 0x1d6   : > { %v1482_v55 = vpack.c.bf16 %v8971_v54, %v8968_v52  ;;  %v1595_v57 = vadd.f32 %v1593_v53, %v8971_v54 }
 0x1d8   : > { %7126 = vmatmul.mubr.msk.bf16.vlgmr.msra.gmra.mxu0 %vm1438_vm1, %v1482_v55  ;;  %v1596_v58 = vpack.c.bf16 %v1595_v57, %v1594_v56 }
 0x1d9   : > { %7663 = vmatprep.mubr.msk.bf16.mxu0 %vm8552_vm2, %v8550_v23 }
 0x1da   : > { %7646 = vmatmul.mubr.msk.bf16.vlgmr.msra.gmra.mxu1 %vm1438_vm1, %v1596_v58 }
 0x1db   : > { %7651 = vmatprep.mubr.msk.bf16.mxu1 %vm8552_vm2, %v8550_v23 }
 0x298   : > { %v1580_v62 = vpop.f32.mrf.mxu0 }
 0x299   : > { %v1581_v4 = vadd.f32 %v1580_v62, %v1496_v63 }
 0x29a   : > { %v8990_v0 = vpop.f32.mrf.mxu0  ;;  %v1673_v1 = vpop.f32.mrf.mxu1 }
 0x29b   : > { %v9009_v12 = vadd.f32 %v7127_v11, %v1673_v1  ;;  %v1583_v48 = vadd.f32 %v8990_v0, %v1500_v44 }
 0x29c   : > { %v1584_v2 = vpop.f32.mrf.mxu0  ;;  %v7647_v3 = vpop.f32.mrf.mxu1 }
 0x29d   : > { %v1585_v6 = vadd.f32 %v1584_v2, %v1496_v63 }
 0x29e   : > { %v1676_v8 = vpop.f32.mrf.mxu1  ;;  %v1586_v40 = vpop.f32.mrf.mxu0 }
 0x29f   : > { %v8992_v9 = vpack.c.bf16 %v1585_v6, %v1581_v4  ;;  %v9035_v24 = vadd.f32 %v7127_v11, %v1676_v8  ;;  %v1587_v45 = vadd.f32 %v1586_v40, %v1500_v44 }
 0x2a0   : > { %v7648_v10 = vpop.f32.mrf.mxu1 }
 0x2a1   : > { %1914 = vrot.lane.b32.xlu1 %v8992_v9, %s8555_s16  ;;  %1693 = vrot.lane.b32.xlu0 %v8992_v9, %s8556_s15  ;;  %v9085_v49 = vpack.c.bf16 %v1587_v45, %v1583_v48 }
 0x2a5   : > { %1912 = vrot.lane.b32.xlu1 %v8992_v9, %s8557_s23  ;;  %2128 = vrot.lane.b32.xlu0 %v8992_v9, %s8558_s9 }
 0x2a9   : > { %2130 = vrot.lane.b32.xlu1 %v8992_v9, %s8559_s5  ;;  %2343 = vrot.lane.b32.xlu0 %v8992_v9, %s8560_s21 }
 0x2ad   : > { %2345 = vrot.lane.b32.xlu1 %v8992_v9, %s8561_s27  ;;  %1768 = vperm.xlu0 %7932, %v9009_v12  }
 0x2b1   : > { %1747 = vperm.xlu1 %7930, %v9009_v12   ;;  %7935 = vset.pattern.permute.xlu0 %v8562_v13 }
 0x2b2   : > { %1804 = vperm.xlu0 %7935, %v9009_v12  }
 0x2b5   : > { %7931 = vset.pattern.permute.xlu1 %v8551_v28 }
 0x2b6   : > { %1758 = vperm.xlu1 %7931, %v9009_v12   ;;  %7938 = vset.pattern.permute.xlu0 %v8563_v14 }
 0x2b7   : > { %1986 = vperm.xlu0 %7938, %v9009_v12  }
 0x2ba   : > { %7933 = vset.pattern.permute.xlu1 %v8564_v15 }
 0x2bb   : > { %1780 = vperm.xlu1 %7933, %v9009_v12   ;;  %7941 = vset.pattern.permute.xlu0 %v8565_v16 }
 0x2bc   : > { %2022 = vperm.xlu0 %7941, %v9009_v12  }
 0x2bf   : > { %7934 = vset.pattern.permute.xlu1 %v8566_v17 }
 0x2c0   : > { %1792 = vperm.xlu1 %7934, %v9009_v12   ;;  %7944 = vset.pattern.permute.xlu0 %v8567_v18 }
 0x2c1   : > { %2202 = vperm.xlu0 %7944, %v9009_v12  }
 0x2c4   : > { %7936 = vset.pattern.permute.xlu1 %v8568_v19 }
 0x2c5   : > { %1966 = vperm.xlu1 %7936, %v9009_v12   ;;  %7947 = vset.pattern.permute.xlu0 %v8569_v20 }
 0x2c6   : > { %2238 = vperm.xlu0 %7947, %v9009_v12  }
 0x2c9   : > { %7937 = vset.pattern.permute.xlu1 %v8570_v21 }
 0x2ca   : > { %1976 = vperm.xlu1 %7937, %v9009_v12   ;;  %7950 = vset.pattern.permute.xlu0 %v8571_v22 }
 0x2cb   : > { %2417 = vperm.xlu0 %7950, %v9009_v12  }
 0x2ce   : > { %7939 = vset.pattern.permute.xlu1 %v8572_v25 }
 0x2cf   : > { %1998 = vperm.xlu1 %7939, %v9009_v12   ;;  %7953 = vset.pattern.permute.xlu0 %v8554_v60 }
 0x2d0   : > { %1752 = vperm.xlu0 %7953, %v9035_v24  }
 0x2d3   : > { %7940 = vset.pattern.permute.xlu1 %v8573_v26 }
 0x2d4   : > { %2010 = vperm.xlu1 %7940, %v9009_v12   ;;  %7956 = vset.pattern.permute.xlu0 %v8564_v15 }
 0x2d5   : > { %1784 = vperm.xlu0 %7956, %v9035_v24  }
 0x2d8   : > { %7942 = vset.pattern.permute.xlu1 %v8574_v27 }
 0x2d9   : > { %2182 = vperm.xlu1 %7942, %v9009_v12   ;;  %7959 = vset.pattern.permute.xlu0 %v8568_v19 }
 0x2da   : > { %1970 = vperm.xlu0 %7959, %v9035_v24  }
 0x2dd   : > { %7943 = vset.pattern.permute.xlu1 %v8575_v29 }
 0x2de   : > { %2192 = vperm.xlu1 %7943, %v9009_v12   ;;  %7962 = vset.pattern.permute.xlu0 %v8572_v25 }
 0x2df   : > { %2002 = vperm.xlu0 %7962, %v9035_v24  }
 0x2e2   : > { %7945 = vset.pattern.permute.xlu1 %v8576_v30 }
 0x2e3   : > { %2214 = vperm.xlu1 %7945, %v9009_v12   ;;  %7965 = vset.pattern.permute.xlu0 %v8574_v27 }
 0x2e4   : > { %2186 = vperm.xlu0 %7965, %v9035_v24  }
 0x2e7   : > { %7946 = vset.pattern.permute.xlu1 %v8577_v31 }
 0x2e8   : > { %2226 = vperm.xlu1 %7946, %v9009_v12   ;;  %7968 = vset.pattern.permute.xlu0 %v8576_v30 }
 0x2e9   : > { %2218 = vperm.xlu0 %7968, %v9035_v24  }
 0x2ec   : > { %7948 = vset.pattern.permute.xlu1 %v8578_v32 }
 0x2ed   : > { %2397 = vperm.xlu1 %7948, %v9009_v12   ;;  %7971 = vset.pattern.permute.xlu0 %v8578_v32  ;;  %v9147_v32 = vld [vmem:[%s11040_s4 + $0x20] sm:$0xff] }
 0x2ee   : > { %2401 = vperm.xlu0 %7971, %v9035_v24  }
 0x2f1   : > { %7949 = vset.pattern.permute.xlu1 %v8579_v33 }
 0x2f2   : > { %2407 = vperm.xlu1 %7949, %v9009_v12   ;;  %7974 = vset.pattern.permute.xlu0 %v8580_v34 }
 0x2f3   : > { %2433 = vperm.xlu0 %7974, %v9035_v24  }
 0x2f6   : > { %7951 = vset.pattern.permute.xlu1 %v8580_v34  ;;  %v9150_v34 = vld [vmem:[%s11040_s4 + $0x8] sm:$0xff] }
 0x2f7   : > { %2429 = vperm.xlu1 %7951, %v9009_v12   ;;  %7975 = vset.pattern.permute.xlu0 %v8581_v35 }
 0x2f8   : > { %2453 = vperm.xlu0 %7975, %v9009_v12  }
 0x2fb   : > { %7952 = vset.pattern.permute.xlu1 %v8582_v36 }
 0x2fc   : > { %2441 = vperm.xlu1 %7952, %v9009_v12  }
 0x300   : > { %7954 = vset.pattern.permute.xlu1 %v8551_v28 }
 0x301   : > { %1762 = vperm.xlu1 %7954, %v9035_v24  }
 0x305   : > { %7955 = vset.pattern.permute.xlu1 %v8553_v59 }
 0x306   : > { %1772 = vperm.xlu1 %7955, %v9035_v24  }
 0x30a   : > { %7957 = vset.pattern.permute.xlu1 %v8566_v17 }
 0x30b   : > { %1796 = vperm.xlu1 %7957, %v9035_v24  }
 0x30f   : > { %7958 = vset.pattern.permute.xlu1 %v8562_v13 }
 0x310   : > { %1808 = vperm.xlu1 %7958, %v9035_v24  }
 0x313   : > { %v1915_v38 = vpop.permute.xlu1 %1914  ;;  %v1694_v39 = vpop.permute.xlu0 %1693 }
 0x314   : > { %v1920_v42 = vsel %vm1695_vm3, %v1915_v38, 0  ;;  %v1700_v43 = vsel %vm1695_vm3, %v1694_v39, 0  ;;  %7960 = vset.pattern.permute.xlu1 %v8570_v21 }
 0x315   : > { %1980 = vperm.xlu1 %7960, %v9035_v24   ;;  %7650 = vmatpush3.bf16.xpose.msra.mxu1 %v1700_v43 }
 0x316   : > { %7662 = vmatpush3.bf16.xpose.msra.mxu0 %v1920_v42  ;;  %7655 = vmatprep.subr.bf16.mxu1 %v8550_v23 }
 0x317   : > { %v1913_v47 = vpop.permute.xlu1 %1912  ;;  %7673 = vmatprep.subr.bf16.mxu0 %v8550_v23  ;;  %v2129_v55 = vpop.permute.xlu0 %2128 }
 0x319   : > { %7961 = vset.pattern.permute.xlu1 %v8563_v14 }
 0x31a   : > { %1990 = vperm.xlu1 %7961, %v9035_v24  }
 0x31b   : > { %v2131_v50 = vpop.permute.xlu1 %2130  ;;  %v2344_v57 = vpop.permute.xlu0 %2343 }
 0x31c   : > { %v2136_v51 = vsel %vm1695_vm3, %v2131_v50, 0  ;;  %7652 = vmatmul.mubr.msk.bf16.vlgmr.msra.gmra.mxu1 %vm1695_vm3, %v8992_v9 }
 0x31d   : > { %7664 = vmatmul.mubr.msk.bf16.vlgmr.msra.gmra.mxu0 %vm1695_vm3, %v1913_v47  ;;  %7656 = vmatpush3.bf16.msra.mxu1 %v9085_v49 }
 0x31e   : > { %7674 = vmatpush3.bf16.xpose.msra.mxu0 %v2136_v51  ;;  %7963 = vset.pattern.permute.xlu1 %v8573_v26  ;;  %v1680_v26 = vld [vmem:[%s11040_s4] sm:$0xff] }
 0x31f   : > { %2014 = vperm.xlu1 %7963, %v9035_v24   ;;  %7675 = vmatprep.mubr.msk.bf16.mxu0 %vm8552_vm2, %v8550_v23  ;;  %v2346_v53 = vpop.permute.xlu1 %2345 }
 0x320   : > { %7685 = vmatprep.subr.bf16.mxu0 %v8550_v23  ;;  %7657 = vmatprep.mubr.msk.bf16.mxu1 %vm8552_vm2, %v8550_v23  ;;  %v2351_v56 = vsel %vm1695_vm3, %v2346_v53, 0 }
 0x321   : > { %7667 = vmatprep.subr.bf16.mxu1 %v8550_v23 }
 0x323   : > { %7964 = vset.pattern.permute.xlu1 %v8565_v16 }
 0x324   : > { %2026 = vperm.xlu1 %7964, %v9035_v24  }
 0x325   : > { %7676 = vmatmul.mubr.msk.bf16.vlgmr.msra.gmra.mxu0 %vm1695_vm3, %v2129_v55  ;;  %v9166_v55 = vld [vmem:[%s11040_s4 + $0x28] sm:$0xff] }
 0x326   : > { %7686 = vmatpush3.bf16.xpose.msra.mxu0 %v2351_v56  ;;  %7687 = vmatprep.mubr.msk.bf16.mxu0 %vm8552_vm2, %v8550_v23  ;;  %v9169_v56 = vld [vmem:[%s11040_s4 + $0x40] sm:$0xff] }
 0x327   : > { %7697 = vmatprep.subr.bf16.mxu0 %v8550_v23 }
 0x328   : > { %7966 = vset.pattern.permute.xlu1 %v8575_v29  ;;  %v1769_v1 = vpop.permute.xlu0 %1768 }
 0x329   : > { %2196 = vperm.xlu1 %7966, %v9035_v24  }
 0x32c   : > { %v1748_v58 = vpop.permute.xlu1 %1747 }
 0x32d   : > { %7688 = vmatmul.mubr.msk.bf16.vlgmr.msra.gmra.mxu0 %vm1695_vm3, %v2344_v57  ;;  %7967 = vset.pattern.permute.xlu1 %v8567_v18  ;;  %v1805_v3 = vpop.permute.xlu0 %1804  ;;  %v1755_v30 = vmul.f32 %v1748_v58, %v1680_v26 }
 0x32e   : > { %2206 = vperm.xlu1 %7967, %v9035_v24   ;;  %7705 = vmatprep.mubr.msk.bf16.mxu0 %vm8552_vm2, %v8550_v23 }
 0x331   : > { %v1759_v59 = vpop.permute.xlu1 %1758 }
 0x332   : > { %7969 = vset.pattern.permute.xlu1 %v8577_v31  ;;  %v1987_v6 = vpop.permute.xlu0 %1986  ;;  %v9144_v31 = vld [vmem:[%s11040_s4 + $0x10] sm:$0xff] }
 0x333   : > { %2230 = vperm.xlu1 %7969, %v9035_v24   ;;  %v1775_v39 = vmul.f32 %v1769_v1, %v9144_v31 }
 0x336   : > { %v1781_v60 = vpop.permute.xlu1 %1780 }
 0x337   : > { %7970 = vset.pattern.permute.xlu1 %v8569_v20  ;;  %v9126_v10 = vpop.permute.xlu0 %2022  ;;  %v1787_v40 = vmul.f32 %v1781_v60, %v9147_v32  ;;  %v1993_v60 = vmul.f32 %v1987_v6, %v9144_v31 }
 0x338   : > { %2242 = vperm.xlu1 %7970, %v9035_v24  }
 0x33b   : > { %v1793_v61 = vpop.permute.xlu1 %1792 }
 0x33c   : > { %7972 = vset.pattern.permute.xlu1 %v8579_v33  ;;  %v2203_v12 = vpop.permute.xlu0 %2202  ;;  %v1765_v33 = vadd.f32 %v1759_v59, %v1755_v30  ;;  %v1811_v30 = vmul.f32 %v1805_v3, %v9169_v56 }
 0x33d   : > { %2411 = vperm.xlu1 %7972, %v9035_v24  }
 0x33e   : > { %v1777_v45 = vadd.f32 %v1775_v39, %v1765_v33 }
 0x340   : > { %v1967_v62 = vpop.permute.xlu1 %1966  ;;  %v1789_v51 = vadd.f32 %v1787_v40, %v1777_v45  ;;  %v9183_v40 = vld [vmem:[%s11040_s4 + $0x48] sm:$0xff] }
 0x341   : > { %7973 = vset.pattern.permute.xlu1 %v8571_v22  ;;  %v9132_v14 = vpop.permute.xlu0 %2238  ;;  %v1973_v48 = vmul.f32 %v1967_v62, %v1680_v26 }
 0x342   : > { %2421 = vperm.xlu1 %7973, %v9035_v24  }
 0x345   : > { %v1977_v63 = vpop.permute.xlu1 %1976 }
 0x346   : > { %7976 = vset.pattern.permute.xlu1 %v8582_v36  ;;  %v9136_v16 = vpop.permute.xlu0 %2417  ;;  %v9156_v36 = vld [vmem:[%s11040_s4 + $0x30] sm:$0xff]  ;;  %v1983_v53 = vadd.f32 %v1977_v63, %v1973_v48 }
 0x347   : > { %2445 = vperm.xlu1 %7976, %v9035_v24   ;;  %v1799_v47 = vmul.f32 %v1793_v61, %v9156_v36 }
 0x348   : > { %v1995_v33 = vadd.f32 %v1993_v60, %v1983_v53 }
 0x349   : > { %v1801_v1 = vadd.f32 %v1799_v47, %v1789_v51 }
 0x34a   : > { %v1999_v0 = vpop.permute.xlu1 %1998 }
 0x34b   : > { %7977 = vset.pattern.permute.xlu1 %v8581_v35  ;;  %v1753_v18 = vpop.permute.xlu0 %1752  ;;  %v9153_v35 = vld [vmem:[%s11040_s4 + $0x18] sm:$0xff]  ;;  %v2005_v61 = vmul.f32 %v1999_v0, %v9147_v32  ;;  %v1813_v45 = vadd.f32 %v1811_v30, %v1801_v1  ;;  %v2209_v0 = vmul.f32 %v2203_v12, %v9144_v31 }
 0x34c   : > { %2457 = vperm.xlu1 %7977, %v9035_v24   ;;  %v1756_v43 = vmul.f32 %v1753_v18, %v9150_v34 }
 0x34d   : > { %v2007_v47 = vadd.f32 %v2005_v61, %v1995_v33  ;;  %v7134_v53 = vmul.f32 -1.442695, %v1813_v45 }
 0x34f   : > { %v2011_v2 = vpop.permute.xlu1 %2010  ;;  %8172 = vpow2.f32 %v7134_v53 }
 0x350   : > { %v1785_v21 = vpop.permute.xlu0 %1784  ;;  %v2017_v6 = vmul.f32 %v2011_v2, %v9156_v36 }
 0x351   : > { %v1788_v62 = vmul.f32 %v1785_v21, %v9166_v55 }
 0x352   : > { %v2019_v51 = vadd.f32 %v2017_v6, %v2007_v47 }
 0x354   : > { %v2183_v4 = vpop.permute.xlu1 %2182 }
 0x355   : > { %v1971_v24 = vpop.permute.xlu0 %1970  ;;  %v2189_v18 = vmul.f32 %v2183_v4, %v1680_v26 }
 0x356   : > { %v1974_v63 = vmul.f32 %v1971_v24, %v9150_v34 }
 0x359   : > { %v2193_v8 = vpop.permute.xlu1 %2192 }
 0x35a   : > { %v2003_v27 = vpop.permute.xlu0 %2002  ;;  %v2199_v39 = vadd.f32 %v2193_v8, %v2189_v18 }
 0x35c   : > { %v8173_v47 = vpop.eup %8172 }
 0x35e   : > { %v2215_v9 = vpop.permute.xlu1 %2214 }
 0x35f   : > { %v9158_v38 = vpop.permute.xlu0 %2186  ;;  %v2221_v21 = vmul.f32 %v2215_v9, %v9147_v32  ;;  %v2029_v9 = vmul.f32 %v9126_v10, %v9169_v56  ;;  %v2424_v10 = vmul.f32 %v9136_v16, %v9144_v31 }
 0x363   : > { %v9128_v11 = vpop.permute.xlu1 %2226 }
 0x364   : > { %v9171_v57 = vpop.permute.xlu0 %2218  ;;  %v2233_v2 = vmul.f32 %v9128_v11, %v9156_v36  ;;  %v2031_v11 = vadd.f32 %v2029_v9, %v2019_v51 }
 0x366   : > { %v7138_v6 = vmul.f32 -1.442695, %v2031_v11 }
 0x368   : > { %v9130_v13 = vpop.permute.xlu1 %2397 }
 0x369   : > { %v9189_v48 = vpop.permute.xlu0 %2401  ;;  %v2404_v12 = vmul.f32 %v9130_v13, %v1680_v26  ;;  %v2245_v13 = vmul.f32 %v9132_v14, %v9169_v56  ;;  %v2190_v14 = vmul.f32 %v9158_v38, %v9150_v34 }
 0x36a   : > { %v2405_v11 = vmul.f32 %v9189_v48, %v9150_v34 }
 0x36d   : > { %v9134_v15 = vpop.permute.xlu1 %2407 }
 0x36e   : > { %v2414_v61 = vadd.f32 %v9134_v15, %v2404_v12 }
 0x370   : > { %v2426_v33 = vadd.f32 %v2424_v10, %v2414_v61 }
 0x372   : > { %v9138_v17 = vpop.permute.xlu1 %2429 }
 0x373   : > { %v2436_v26 = vmul.f32 %v9138_v17, %v9147_v32 }
 0x377   : > { %v9140_v19 = vpop.permute.xlu1 %2441 }
 0x378   : > { %v2448_v15 = vmul.f32 %v9140_v19, %v9156_v36 }
 0x37c   : > { %v1763_v20 = vpop.permute.xlu1 %1762 }
 0x37d   : > { %v1766_v50 = vadd.f32 %v1763_v20, %v1756_v43 }
 0x381   : > { %v1773_v22 = vpop.permute.xlu1 %1772 }
 0x382   : > { %v1776_v44 = vmul.f32 %v1773_v22, %v9153_v35  ;;  %v9175_v22 = vld [vmem:[%s11040_s4 + $0x38] sm:$0xff]  ;;  %s11049_s4 = sld [smem:[#allocation19_spill]] }
 0x384   : > { %v1778_v58 = vadd.f32 %v1776_v44, %v1766_v50  ;;  %v2211_v50 = vadd.f32 %v2209_v0, %v2199_v39 }
 0x386   : > { %v1797_v25 = vpop.permute.xlu1 %1796  ;;  %v1790_v43 = vadd.f32 %v1788_v62, %v1778_v58  ;;  %v2223_v58 = vadd.f32 %v2221_v21, %v2211_v50  ;;  %v9200_v62 = vpop.permute.xlu0 %2433 }
 0x387   : > { %v1800_v4 = vmul.f32 %v1797_v25, %v9175_v22  ;;  %v2006_v25 = vmul.f32 %v2003_v27, %v9166_v55 }
 0x388   : > { %v2235_v18 = vadd.f32 %v2233_v2, %v2223_v58  ;;  %v1821_v2 = vadd.f32 1.0, %v8173_v47  ;;  %v1432_v58 = vld [vmem:[%s11043_s2] sm:$0x1]  ;;  %s11051_s2 = scalar_lea.vmem %s11049_s4, %s8826_s10 }
 0x389   : > { %vm1433_vm4 = vcmp.gt.f32.partialorder %v1432_v58, 0.0 }
 0x38a   : > { %v2247_v30 = vadd.f32 %v2245_v13, %v2235_v18  ;;  %v1827_v18 = vsel %vm1433_vm4, 1, %v8551_v28 }
 0x38b   : > { %v1809_v29 = vpop.permute.xlu1 %1808 }
 0x38c   : > { %v1812_v3 = vmul.f32 %v1809_v29, %v9183_v40  ;;  %v7142_v16 = vmul.f32 -1.442695, %v2247_v30 }
 0x390   : > { %v1981_v42 = vpop.permute.xlu1 %1980 }
 0x391   : > { %v1984_v44 = vadd.f32 %v1981_v42, %v1974_v63  ;;  %v1802_v42 = vadd.f32 %v1800_v4, %v1790_v43  ;;  %v2438_v4 = vadd.f32 %v2436_v26, %v2426_v33  ;;  %v2437_v33 = vmul.f32 %v9200_v62, %v9166_v55 }
 0x393   : > { %v2450_v31 = vadd.f32 %v2448_v15, %v2438_v4 }
 0x395   : > { %v1991_v59 = vpop.permute.xlu1 %1990 }
 0x396   : > { %v1994_v20 = vmul.f32 %v1991_v59, %v9153_v35  ;;  %v1814_v59 = vadd.f32 %v1812_v3, %v1802_v42 }
 0x398   : > { %v1996_v8 = vadd.f32 %v1994_v20, %v1984_v44  ;;  %v7135_v63 = vmul.f32 -1.442695, %v1814_v59  ;;  %v2454_v44 = vpop.permute.xlu0 %2453 }
 0x399   : > { %v2460_v45 = vmul.f32 %v2454_v44, %v9169_v56 }
 0x39a   : > { %v2015_v24 = vpop.permute.xlu1 %2014  ;;  %v2008_v60 = vadd.f32 %v2006_v25, %v1996_v8  ;;  %8174 = vpow2.f32 %v7135_v63  ;;  %v1831_v63 = vrot.slane %v1827_v18, %v8962_v46 }
 0x39b   : > { %v2018_v29 = vmul.f32 %v2015_v24, %v9175_v22  ;;  %8176 = vpow2.f32 %v7138_v6  ;;  %v2462_v19 = vadd.f32 %v2460_v45, %v2450_v31  ;;  %v2222_v24 = vmul.f32 %v9171_v57, %v9166_v55 }
 0x39c   : > { %8178 = vpow2.f32 %v7142_v16  ;;  %vm9229_vm5 = vcmp.eq.s32.totalorder %v1831_v63, 1 }
 0x39d   : > { %v2020_v20 = vadd.f32 %v2018_v29, %v2008_v60  ;;  %v7146_v3 = vmul.f32 -1.442695, %v2462_v19 }
 0x39f   : > { %v2027_v1 = vpop.permute.xlu1 %2026 }
 0x3a0   : > { %v2030_v27 = vmul.f32 %v2027_v1, %v9183_v40 }
 0x3a2   : > { %v2032_v43 = vadd.f32 %v2030_v27, %v2020_v20 }
 0x3a4   : > { %v2197_v39 = vpop.permute.xlu1 %2196  ;;  %v7139_v17 = vmul.f32 -1.442695, %v2032_v43 }
 0x3a5   : > { %v2200_v0 = vadd.f32 %v2197_v39, %v2190_v14 }
 0x3a6   : > { %8180 = vpow2.f32 %v7139_v17 }
 0x3a7   : > { %v8175_v51 = vpop.eup %8174  ;;  %8182 = vpow2.f32 %v7146_v3 }
 0x3a8   : > { %v8177_v53 = vpop.eup %8176  ;;  %8184 = vrcp.f32 %v1821_v2  ;;  %v1822_v9 = vadd.f32 1.0, %v8175_v51 }
 0x3a9   : > { %v2207_v32 = vpop.permute.xlu1 %2206  ;;  %v8179_v60 = vpop.eup %8178  ;;  %v2039_v29 = vadd.f32 1.0, %v8177_v53 }
 0x3aa   : > { %v2210_v21 = vmul.f32 %v2207_v32, %v9153_v35  ;;  %v2255_v61 = vadd.f32 1.0, %v8179_v60 }
 0x3ac   : > { %v2212_v36 = vadd.f32 %v2210_v21, %v2200_v0 }
 0x3ae   : > { %v2231_v38 = vpop.permute.xlu1 %2230  ;;  %v2224_v8 = vadd.f32 %v2222_v24, %v2212_v36 }
 0x3af   : > { %v2234_v50 = vmul.f32 %v2231_v38, %v9175_v22 }
 0x3b1   : > { %v2236_v25 = vadd.f32 %v2234_v50, %v2224_v8 }
 0x3b3   : > { %v2243_v56 = vpop.permute.xlu1 %2242  ;;  %v8181_v1 = vpop.eup %8180 }
 0x3b4   : > { %v2246_v42 = vmul.f32 %v2243_v56, %v9183_v40  ;;  %v2040_v27 = vadd.f32 1.0, %v8181_v1  ;;  %v8183_v30 = vpop.eup %8182 }
 0x3b5   : > { %v8185_v39 = vpop.eup %8184  ;;  %v2470_v34 = vadd.f32 1.0, %v8183_v30 }
 0x3b6   : > { %v2248_v12 = vadd.f32 %v2246_v42, %v2236_v25 }
 0x3b8   : > { %v7143_v57 = vmul.f32 -1.442695, %v2248_v12  ;;  %v2412_v59 = vpop.permute.xlu1 %2411 }
 0x3b9   : > { %v2415_v10 = vadd.f32 %v2412_v59, %v2405_v11 }
 0x3ba   : > { %8186 = vpow2.f32 %v7143_v57 }
 0x3bb   : > { %8188 = vrcp.f32 %v1822_v9 }
 0x3bc   : > { %8190 = vrcp.f32 %v2039_v29 }
 0x3bd   : > { %v2422_v13 = vpop.permute.xlu1 %2421  ;;  %8192 = vrcp.f32 %v2255_v61 }
 0x3be   : > { %v2425_v26 = vmul.f32 %v2422_v13, %v9153_v35  ;;  %8194 = vrcp.f32 %v2040_v27  ;;  %v1835_v35 = vsel %vm9229_vm5, %v8185_v39, 0.0 }
 0x3bf   : > { %8196 = vrcp.f32 %v2470_v34  ;;  %v1837_v62 = vmax.f32 %v1835_v35, 1e-06 }
 0x3c0   : > { %v2427_v20 = vadd.f32 %v2425_v26, %v2415_v10 }
 0x3c2   : > { %v2446_v15 = vpop.permute.xlu1 %2445  ;;  %v2439_v48 = vadd.f32 %v2437_v33, %v2427_v20 }
 0x3c3   : > { %v2449_v43 = vmul.f32 %v2446_v15, %v9175_v22 }
 0x3c5   : > { %v2451_v31 = vadd.f32 %v2449_v43, %v2439_v48 }
 0x3c7   : > { %v8187_v4 = vpop.eup %8186  ;;  %v2458_v44 = vpop.permute.xlu1 %2457 }
 0x3c8   : > { %v8189_v14 = vpop.eup %8188  ;;  %v2256_v16 = vadd.f32 1.0, %v8187_v4  ;;  %v2461_v55 = vmul.f32 %v2458_v44, %v9183_v40 }
 0x3c9   : > { %v8191_v17 = vpop.eup %8190  ;;  %v1836_v45 = vsel %vm9229_vm5, %v8189_v14, 0.0 }
 0x3ca   : > { %8198 = vrcp.f32 %v2256_v16  ;;  %v2463_v32 = vadd.f32 %v2461_v55, %v2451_v31  ;;  %v8193_v22 = vpop.eup %8192  ;;  %v2047_v21 = vsel %vm9229_vm5, %v8191_v17, 0.0  ;;  %v1838_v36 = vmax.f32 %v1836_v45, 1e-06 }
 0x3cb   : > { %8200 = vlog2.f32 %v1837_v62  ;;  %v8195_v19 = vpop.eup %8194  ;;  %v2263_v24 = vsel %vm9229_vm5, %v8193_v22, 0.0  ;;  %v2049_v40 = vmax.f32 %v2047_v21, 1e-06 }
 0x3cc   : > { %v7147_v0 = vmul.f32 -1.442695, %v2463_v32  ;;  %v2048_v38 = vsel %vm9229_vm5, %v8195_v19, 0.0  ;;  %v2265_v47 = vmax.f32 %v2263_v24, 1e-06  ;;  %v8197_v8 = vpop.eup %8196 }
 0x3cd   : > { %v2050_v3 = vmax.f32 %v2048_v38, 1e-06  ;;  %v2478_v56 = vsel %vm9229_vm5, %v8197_v8, 0.0 }
 0x3ce   : > { %8202 = vpow2.f32 %v7147_v0  ;;  %v2480_v53 = vmax.f32 %v2478_v56, 1e-06 }
 0x3cf   : > { %8204 = vlog2.f32 %v1838_v36 }
 0x3d0   : > { %8206 = vlog2.f32 %v2049_v40 }
 0x3d1   : > { %8208 = vlog2.f32 %v2265_v47 }
 0x3d2   : > { %8210 = vlog2.f32 %v2050_v3 }
 0x3d7   : > { %v8199_v50 = vpop.eup %8198 }
 0x3d8   : > { %v2264_v2 = vsel %vm9229_vm5, %v8199_v50, 0.0  ;;  %v8201_v25 = vpop.eup %8200 }
 0x3d9   : > { %v2266_v51 = vmax.f32 %v2264_v2, 1e-06  ;;  %v1840_v60 = vmul.f32 0.6931472, %v8201_v25 }
 0x3db   : > { %v8203_v42 = vpop.eup %8202  ;;  %8212 = vlog2.f32 %v2266_v51 }
 0x3dc   : > { %v2471_v58 = vadd.f32 1.0, %v8203_v42  ;;  %v1736_v12 = vpop.f32.mrf.mxu1  ;;  %v8205_v29 = vpop.eup %8204 }
 0x3dd   : > { %v1743_v9 = vmul.f32 0.25, %v1736_v12  ;;  %v1956_v57 = vpop.f32.mrf.mxu0  ;;  %v8207_v13 = vpop.eup %8206  ;;  %v1842_v30 = vmul.f32 0.6931472, %v8205_v29 }
 0x3de   : > { %8214 = vrcp.f32 %v2471_v58  ;;  %v7653_v59 = vpop.f32.mrf.mxu1  ;;  %v1963_v18 = vmul.f32 0.25, %v1956_v57  ;;  %v8209_v48 = vpop.eup %8208  ;;  %v2052_v35 = vmul.f32 0.6931472, %v8207_v13 }
 0x3df   : > { %v1833_v1 = vsel %vm9229_vm5, %v1743_v9, -1e+30  ;;  %v7665_v61 = vpop.f32.mrf.mxu0  ;;  %8216 = vlog2.f32 %v2480_v53  ;;  %v8211_v4 = vpop.eup %8210  ;;  %v2268_v17 = vmul.f32 0.6931472, %v8209_v48 }
 0x3e0   : > { %v1739_v11 = vpop.f32.mrf.mxu1  ;;  %v9251_v27 = vadd.f32 %v1840_v60, %v1833_v1  ;;  %v2045_v33 = vsel %vm9229_vm5, %v1963_v18, -1e+30  ;;  %v2054_v0 = vmul.f32 0.6931472, %v8211_v4 }
 0x3e1   : > { %v1744_v10 = vmul.f32 0.25, %v1739_v11  ;;  %v1959_v26 = vpop.f32.mrf.mxu0  ;;  %v9260_v31 = vadd.f32 %v2052_v35, %v2045_v33 }
 0x3e2   : > { %v7654_v63 = vpop.f32.mrf.mxu1  ;;  %v1845_v20 = vsel %vm1695_vm3, %v9251_v27, -inf  ;;  %v1964_v39 = vmul.f32 0.25, %v1959_v26 }
 0x3e3   : > { %v1834_v15 = vsel %vm9229_vm5, %v1744_v10, -1e+30  ;;  %v7666_v34 = vpop.f32.mrf.mxu0  ;;  %1846 = vmax.xlane.f32.xlu1 %v1845_v20  ;;  %v2057_v36 = vsel %vm1695_vm3, %v9260_v31, -inf }
 0x3e4   : > { %v1844_v43 = vadd.f32 %v1842_v30, %v1834_v15  ;;  %v2046_v55 = vsel %vm9229_vm5, %v1964_v39, -1e+30 }
 0x3e5   : > { %v2172_v44 = vpop.f32.mrf.mxu0  ;;  %v2056_v24 = vadd.f32 %v2054_v0, %v2046_v55 }
 0x3e6   : > { %v2179_v14 = vmul.f32 0.25, %v2172_v44  ;;  %v1848_v16 = vsel %vm1695_vm3, %v1844_v43, -inf }
 0x3e7   : > { %v7677_v62 = vpop.f32.mrf.mxu0  ;;  %1849 = vmax.xlane.f32.xlu0 %v1848_v16  ;;  %v2060_v42 = vsel %vm1695_vm3, %v2056_v24, -inf }
 0x3e8   : > { %v8213_v32 = vpop.eup %8212  ;;  %v2261_v45 = vsel %vm9229_vm5, %v2179_v14, -1e+30 }
 0x3e9   : > { %v2175_v22 = vpop.f32.mrf.mxu0  ;;  %v9266_v21 = vadd.f32 %v2268_v17, %v2261_v45  ;;  %v2270_v40 = vmul.f32 0.6931472, %v8213_v32 }
 0x3ea   : > { %v2180_v19 = vmul.f32 0.25, %v2175_v22 }
 0x3eb   : > { %v8215_v38 = vpop.eup %8214  ;;  %v7678_v47 = vpop.f32.mrf.mxu0  ;;  %v2273_v3 = vsel %vm1695_vm3, %v9266_v21, -inf  ;;  %2058 = vmax.xlane.f32.xlu0 %v2057_v36 }
 0x3ec   : > { %v8217_v8 = vpop.eup %8216  ;;  %v2262_v50 = vsel %vm9229_vm5, %v2180_v19, -1e+30  ;;  %2274 = vmax.xlane.f32.xlu1 %v2273_v3  ;;  %v2479_v2 = vsel %vm9229_vm5, %v8215_v38, 0.0 }
 0x3ed   : > { %v2387_v56 = vpop.f32.mrf.mxu0  ;;  %v2481_v51 = vmax.f32 %v2479_v2, 1e-06  ;;  %v2272_v53 = vadd.f32 %v2270_v40, %v2262_v50  ;;  %v2483_v12 = vmul.f32 0.6931472, %v8217_v8 }
 0x3ee   : > { %v2394_v25 = vmul.f32 0.25, %v2387_v56 }
 0x3ef   : > { %v7689_v58 = vpop.f32.mrf.mxu0  ;;  %2061 = vmax.xlane.f32.xlu0 %v2060_v42  ;;  %8218 = vlog2.f32 %v2481_v51  ;;  %v2276_v60 = vsel %vm1695_vm3, %v2272_v53, -inf }
 0x3f0   : > { %v2476_v9 = vsel %vm9229_vm5, %v2394_v25, -1e+30 }
 0x3f1   : > { %v2390_v57 = vpop.f32.mrf.mxu0  ;;  %v2486_v59 = vadd.f32 %v2483_v12, %v2476_v9 }
 0x3f2   : > { %v2395_v18 = vmul.f32 0.25, %v2390_v57 }
 0x3f3   : > { %v7690_v29 = vpop.f32.mrf.mxu0  ;;  %2277 = vmax.xlane.f32.xlu0 %v2276_v60  ;;  %v2488_v1 = vsel %vm1695_vm3, %v2486_v59, -inf }
 0x3f4   : > { %2489 = vmax.xlane.f32.xlu1 %v2488_v1  ;;  %v2477_v13 = vsel %vm9229_vm5, %v2395_v18, -1e+30 }
 0x3fc   : > { %v8219_v61 = vpop.eup %8218 }
 0x3fd   : > { %v2485_v11 = vmul.f32 0.6931472, %v8219_v61 }
 0x3ff   : > { %v2487_v10 = vadd.f32 %v2485_v11, %v2477_v13 }
 0x401   : > { %v2491_v26 = vsel %vm1695_vm3, %v2487_v10, -inf }
 0x402   : > { %2492 = vmax.xlane.f32.xlu0 %v2491_v26 }
 0x46c   : > { %v1847_v63 = vpop.xlane.xlu1 %1846 }
 0x46d   : > { %v1851_v20 = vsub.f32 %v9251_v27, %v1847_v63 }
 0x46f   : > { %v1853_v30 = vmul.f32 1.442695, %v1851_v20 }
 0x470   : > { %v1850_v33 = vpop.xlane.xlu0 %1849 }
 0x471   : > { %8220 = vpow2.f32 %v1853_v30  ;;  %v1852_v15 = vsub.f32 %v1844_v43, %v1850_v33 }
 0x473   : > { %v1855_v39 = vmul.f32 1.442695, %v1852_v15 }
 0x474   : > { %v2059_v34 = vpop.xlane.xlu0 %2058 }
 0x475   : > { %8222 = vpow2.f32 %v1855_v39  ;;  %v2063_v36 = vsub.f32 %v9260_v31, %v2059_v34  ;;  %v2275_v40 = vpop.xlane.xlu1 %2274 }
 0x476   : > { %v2279_v47 = vsub.f32 %v9266_v21, %v2275_v40  ;;  %v8026_v40 = vld [vmem:[%s11046_s1 + $0x8] sm:$0xff]  }
 0x477   : > { %v2065_v3 = vmul.f32 1.442695, %v2063_v36 }
 0x478   : > { %v2062_v48 = vpop.xlane.xlu0 %2061  ;;  %v2281_v50 = vmul.f32 1.442695, %v2279_v47 }
 0x479   : > { %v2064_v35 = vsub.f32 %v2056_v24, %v2062_v48 }
 0x47b   : > { %v2067_v4 = vmul.f32 1.442695, %v2064_v35 }
 0x47c   : > { %v2278_v44 = vpop.xlane.xlu0 %2277 }
 0x47d   : > { %8224 = vpow2.f32 %v2067_v4  ;;  %v2280_v6 = vsub.f32 %v2272_v53, %v2278_v44  ;;  %v2490_v8 = vpop.xlane.xlu1 %2489 }
 0x47e   : > { %v8221_v14 = vpop.eup %8220  ;;  %v2494_v2 = vsub.f32 %v2486_v59, %v2490_v8  ;;  %v8027_v8 = vld [vmem:[%s11046_s1] sm:$0xff]  }
 0x47f   : > { %v2283_v16 = vmul.f32 1.442695, %v2280_v6  ;;  %v1857_v55 = vsel %vm1695_vm3, %v8221_v14, 0.0 }
 0x480   : > { %1858 = vadd.xlane.f32.xlu1 %v1857_v55  ;;  %v2496_v56 = vmul.f32 1.442695, %v2494_v2 }
 0x481   : > { %8226 = vpow2.f32 %v2283_v16 }
 0x482   : > { %v8223_v27 = vpop.eup %8222 }
 0x483   : > { %v1860_v62 = vsel %vm1695_vm3, %v8223_v27, 0.0 }
 0x484   : > { %1861 = vadd.xlane.f32.xlu0 %v1860_v62 }
 0x48a   : > { %v9287_v43 = vpop.eup %8224 }
 0x48b   : > { %v2493_v17 = vpop.xlane.xlu0 %2492  ;;  %v2072_v32 = vsel %vm1695_vm3, %v9287_v43, 0.0 }
 0x48c   : > { %v2495_v45 = vsub.f32 %v2487_v10, %v2493_v17  ;;  %2073 = vadd.xlane.f32.xlu0 %v2072_v32 }
 0x48e   : > { %v9291_v0 = vpop.eup %8226  ;;  %v2498_v22 = vmul.f32 1.442695, %v2495_v45  ;;  %v8024_v45 = vld [vmem:[%s11046_s1 + $0x18] sm:$0xff]  }
 0x48f   : > { %v2288_v19 = vsel %vm1695_vm3, %v9291_v0, 0.0  ;;  %7698 = vmatpush3.bf16.msra.mxu0 %v8024_v45 }
 0x490   : > { %8228 = vpow2.f32 %v2498_v22  ;;  %2289 = vadd.xlane.f32.xlu0 %v2288_v19  ;;  %7699 = vmatprep.subr.bf16.mxu0 %v8550_v23  ;;  %v8025_v19 = vld [vmem:[%s11046_s1 + $0x10] sm:$0xff]   ;;  %s11052_s1 = scalar_lea.vmem %s11050_s22, %s8826_s10 }
 0x491   : > { %2081 = vrot.lane.b32.xlu1 %v9085_v49, %s8557_s23  ;;  %8230 = vpow2.f32 %v2065_v3 }
 0x492   : > { %8232 = vpow2.f32 %v2281_v50 }
 0x493   : > { %8234 = vpow2.f32 %v2496_v56  ;;  %7700 = vmatpush3.bf16.msra.mxu0 %v8025_v19 }
 0x494   : > { %7701 = vmatprep.subr.bf16.mxu0 %v8550_v23 }
 0x497   : > { %7702 = vmatpush3.bf16.msra.mxu0 %v8026_v40  ;;  %v7155_v40 = vld [vmem:[%s11051_s2] ss:$0 sm:$0xff] }
 0x498   : > { %7703 = vmatprep.subr.bf16.mxu0 %v8550_v23 }
 0x49b   : > { %7704 = vmatpush3.bf16.msra.mxu0 %v8027_v8 }
 0x49c   : > { %7721 = vmatprep.subr.bf16.mxu0 %v8550_v23 }
 0x49d   : > { %v9298_v24 = vpop.eup %8228 }
 0x49e   : > { %v2503_v38 = vsel %vm1695_vm3, %v9298_v24, 0.0  ;;  %v8231_v51 = vpop.eup %8230 }
 0x49f   : > { %2504 = vadd.xlane.f32.xlu0 %v2503_v38  ;;  %v2069_v31 = vsel %vm1695_vm3, %v8231_v51, 0.0  ;;  %v8233_v25 = vpop.eup %8232 }
 0x4a0   : > { %v2285_v42 = vsel %vm1695_vm3, %v8233_v25, 0.0  ;;  %v8235_v53 = vpop.eup %8234 }
 0x4a1   : > { %v2500_v21 = vsel %vm1695_vm3, %v8235_v53, 0.0 }
 0x4b5   : > { %2070 = vadd.xlane.f32.xlu1 %v2069_v31  ;;  %2296 = vrot.lane.b32.xlu0 %v9085_v49, %s8558_s9 }
 0x4b9   : > { %2286 = vadd.xlane.f32.xlu1 %v2285_v42 }
 0x4bd   : > { %2501 = vadd.xlane.f32.xlu1 %v2500_v21 }
 0x4ce   : > { %2511 = vrot.lane.b32.xlu1 %v9085_v49, %s8560_s21 }
 0x509   : > { %v1859_v58 = vpop.xlane.xlu1 %1858 }
 0x50a   : > { %8236 = vrcp.f32 %v1859_v58 }
 0x50d   : > { %v1862_v12 = vpop.xlane.xlu0 %1861  ;;  %v2082_v1 = vpop.permute.xlu1 %2081 }
 0x50e   : > { %8238 = vrcp.f32 %v1862_v12 }
 0x515   : > { %v2074_v18 = vpop.xlane.xlu0 %2073 }
 0x516   : > { %8240 = vrcp.f32 %v2074_v18 }
 0x517   : > { %v8237_v9 = vpop.eup %8236 }
 0x518   : > { %v1864_v59 = vmul.f32 %v8237_v9, %v8221_v14 }
 0x519   : > { %v2290_v61 = vpop.xlane.xlu0 %2289 }
 0x51b   : > { %v8239_v57 = vpop.eup %8238 }
 0x51c   : > { %v1866_v60 = vmul.f32 %v8239_v57, %v8223_v27 }
 0x51e   : > { %v1867_v29 = vpack.c.bf16 %v1866_v60, %v1864_v59 }
 0x520   : > { %7658 = vmatmul.mubr.msk.bf16.vlgmr.msra.gmra.mxu1 %vm1695_vm3, %v1867_v29 }
 0x521   : > { %7668 = vmatpush3.bf16.msra.mxu1 %v2082_v1  ;;  %7669 = vmatprep.mubr.msk.bf16.mxu1 %vm8552_vm2, %v8550_v23 }
 0x522   : > { %7679 = vmatprep.subr.bf16.mxu1 %v8550_v23 }
 0x523   : > { %v8241_v10 = vpop.eup %8240 }
 0x524   : > { %v2078_v30 = vmul.f32 %v8241_v10, %v9287_v43 }
 0x528   : > { %v2505_v26 = vpop.xlane.xlu0 %2504 }
 0x52c   : > { %v2297_v39 = vpop.permute.xlu0 %2296 }
 0x53e   : > { %v2071_v49 = vpop.xlane.xlu1 %2070 }
 0x53f   : > { %8242 = vrcp.f32 %v2071_v49 }
 0x542   : > { %v2287_v11 = vpop.xlane.xlu1 %2286 }
 0x543   : > { %8244 = vrcp.f32 %v2287_v11 }
 0x544   : > { %8246 = vrcp.f32 %v2290_v61 }
 0x546   : > { %v2502_v13 = vpop.xlane.xlu1 %2501 }
 0x547   : > { %8248 = vrcp.f32 %v2502_v13 }
 0x548   : > { %8250 = vrcp.f32 %v2505_v26 }
 0x54a   : > { %v2512_v6 = vpop.permute.xlu1 %2511 }
 0x54c   : > { %v8243_v63 = vpop.eup %8242 }
 0x54d   : > { %v2076_v20 = vmul.f32 %v8243_v63, %v8231_v51  ;;  %v7149_v63 = vld [vmem:[%s11048_s17] ss:$0 sm:$0xff] }
 0x54f   : > { %v2079_v33 = vpack.c.bf16 %v2078_v30, %v2076_v20 }
 0x550   : > { %v8245_v15 = vpop.eup %8244 }
 0x551   : > { %7670 = vmatmul.mubr.msk.bf16.vlgmr.msra.gmra.mxu1 %vm1695_vm3, %v2079_v33  ;;  %v8247_v34 = vpop.eup %8246  ;;  %v2292_v48 = vmul.f32 %v8245_v15, %v8233_v25 }
 0x552   : > { %7680 = vmatpush3.bf16.msra.mxu1 %v2297_v39  ;;  %7681 = vmatprep.mubr.msk.bf16.mxu1 %vm8552_vm2, %v8550_v23  ;;  %v2294_v35 = vmul.f32 %v8247_v34, %v9291_v0 }
 0x553   : > { %7691 = vmatprep.subr.bf16.mxu1 %v8550_v23 }
 0x554   : > { %v2295_v4 = vpack.c.bf16 %v2294_v35, %v2292_v48  ;;  %v8249_v44 = vpop.eup %8248 }
 0x555   : > { %v8251_v14 = vpop.eup %8250  ;;  %v2507_v16 = vmul.f32 %v8249_v44, %v8235_v53 }
 0x556   : > { %v2509_v55 = vmul.f32 %v8251_v14, %v9298_v24 }
 0x558   : > { %v2510_v27 = vpack.c.bf16 %v2509_v55, %v2507_v16 }
 0x559   : > { %7682 = vmatmul.mubr.msk.bf16.vlgmr.msra.gmra.mxu1 %vm1695_vm3, %v2295_v4 }
 0x55a   : > { %7692 = vmatpush3.bf16.msra.mxu1 %v2512_v6  ;;  %7693 = vmatprep.mubr.msk.bf16.mxu1 %vm8552_vm2, %v8550_v23 }
 0x55b   : > { %7709 = vmatprep.subr.bf16.mxu1 %v8550_v23 }
 0x561   : > { %7694 = vmatmul.mubr.msk.bf16.vlgmr.msra.gmra.mxu1 %vm1695_vm3, %v2510_v27 }
 0x562   : > { %7717 = vmatprep.mubr.msk.bf16.mxu1 %vm8552_vm2, %v8550_v23 }
 0x5e0   : > { %v1905_v62 = vpop.f32.mrf.mxu1 }
 0x5e2   : > { %v7659_v43 = vpop.f32.mrf.mxu1 }
 0x5e4   : > { %v1908_v17 = vpop.f32.mrf.mxu1 }
 0x5e6   : > { %v7660_v32 = vpop.f32.mrf.mxu1 }
 0x611   : > { %v2121_v0 = vpop.f32.mrf.mxu1 }
 0x613   : > { %v7671_v22 = vpop.f32.mrf.mxu1 }
 0x615   : > { %v2124_v36 = vpop.f32.mrf.mxu1 }
 0x616   : > { %v7978_v24 = vpack.i.bf16 %v2124_v36, %v2121_v0 }
 0x617   : > { %v7672_v38 = vpop.f32.mrf.mxu1 }
 0x618   : > { %7979 = vrot.lane.b32.xlu1 %v7978_v24, %s8561_s27 }
 0x619   : > { %v2336_v47 = vpop.f32.mrf.mxu1 }
 0x61b   : > { %v7683_v3 = vpop.f32.mrf.mxu1 }
 0x61d   : > { %v2339_v50 = vpop.f32.mrf.mxu1 }
 0x61e   : > { %v7983_v2 = vpack.i.bf16 %v2339_v50, %v2336_v47  ;;  %v7156_v47 = vld [vmem:[%s11052_s1] ss:$0 sm:$0xff] }
 0x61f   : > { %v7684_v56 = vpop.f32.mrf.mxu1 }
 0x620   : > { %7984 = vrot.lane.b32.xlu1 %v7983_v2, %s8559_s5 }
 0x621   : > { %v2551_v51 = vpop.f32.mrf.mxu1 }
 0x623   : > { %v7695_v31 = vpop.f32.mrf.mxu1 }
 0x625   : > { %v2554_v25 = vpop.f32.mrf.mxu1 }
 0x626   : > { %v7988_v42 = vpack.i.bf16 %v2554_v25, %v2551_v51 }
 0x627   : > { %v7696_v53 = vpop.f32.mrf.mxu1 }
 0x628   : > { %7989 = vrot.lane.b32.xlu0 %v7988_v42, %s8555_s16 }
 0x68a   : > { %v7980_v21 = vpop.permute.xlu1 %7979 }
 0x68b   : > { %v7982_v12 = vunpack.i.h.bf16 %v7980_v21  ;;  %v7981_v9 = vunpack.i.l.bf16 %v7980_v21 }
 0x68d   : > { %v2583_v29 = vsel %vm1695_vm3, %v1908_v17, %v7982_v12  ;;  %v2582_v1 = vsel %vm1695_vm3, %v1905_v62, %v7981_v9 }
 0x692   : > { %v7985_v58 = vpop.permute.xlu1 %7984 }
 0x693   : > { %v7987_v57 = vunpack.i.h.bf16 %v7985_v58  ;;  %v7986_v59 = vunpack.i.l.bf16 %v7985_v58 }
 0x695   : > { %v2586_v61 = vsel %vm2584_vm6, %v2583_v29, %v7987_v57  ;;  %v2585_v11 = vsel %vm2584_vm6, %v2582_v1, %v7986_v59  ;;  %v8028_v1 = vld [vmem:[%s8884_s18 + $0x18] sm:$0xff]  }
 0x69a   : > { %v7990_v60 = vpop.permute.xlu0 %7989 }
 0x69b   : > { %v7992_v18 = vunpack.i.h.bf16 %v7990_v60  ;;  %v7991_v49 = vunpack.i.l.bf16 %v7990_v60 }
 0x69d   : > { %v2589_v13 = vsel %vm2587_vm7, %v2586_v61, %v7992_v18  ;;  %v2588_v10 = vsel %vm2587_vm7, %v2585_v11, %v7991_v49  ;;  %v8029_v18 = vld [vmem:[%s8884_s18 + $0x10] sm:$0xff]   ;;  %v8030_v49 = vld [vmem:[%s8884_s18 + $0x8] sm:$0xff]   ;;  %v8031_v61 = vld [vmem:[%s8879_s19 + $0x18] sm:$0xff]  }
 0x69e   : > { %v2590_v26 = vpack.c.bf16 %v2589_v13, %v2588_v10  ;;  %7710 = vmatpush3.bf16.msra.mxu1 %v8031_v61  ;;  %v8032_v11 = vld [vmem:[%s8884_s18] sm:$0xff]   ;;  %v8033_v13 = vld [vmem:[%s8879_s19 + $0x10] sm:$0xff]   ;;  %s11054_s18 = sld [smem:[#allocation22_spill]] }
 0x69f   : > { %7711 = vmatprep.subr.bf16.mxu1 %v8550_v23  ;;  %v8424_v10 = vld [vmem:[%s11033_s26] sm:$0xff] }
 0x6a0   : > { %7706 = vmatmul.mubr.msk.bf16.vlgmr.msra.gmra.mxu0 %vm1438_vm1, %v2590_v26  ;;  %v2850_v26 = vpack.c.bf16 %v8424_v10, %v8424_v10 }
 0x6a1   : > { %7729 = vmatprep.mubr.msk.bf16.mxu0 %vm8552_vm2, %v8550_v23  ;;  %7722 = vmatpush3.bf16.msra.mxu0 %v8028_v1 }
 0x6a2   : > { %7723 = vmatprep.subr.bf16.mxu0 %v8550_v23  ;;  %7712 = vmatpush3.bf16.msra.mxu1 %v8033_v13 }
 0x6a3   : > { %7713 = vmatprep.subr.bf16.mxu1 %v8550_v23 }
 0x6a5   : > { %7724 = vmatpush3.bf16.msra.mxu0 %v8029_v18 }
 0x6a6   : > { %7725 = vmatprep.subr.bf16.mxu0 %v8550_v23 }
 0x6a9   : > { %7726 = vmatpush3.bf16.msra.mxu0 %v8030_v49 }
 0x6aa   : > { %7727 = vmatprep.subr.bf16.mxu0 %v8550_v23 }
 0x6ad   : > { %7728 = vmatpush3.bf16.msra.mxu0 %v8032_v11 }
 0x6ae   : > { %7745 = vmatprep.subr.bf16.mxu0 %v8550_v23 }
 0x6b0   : > { %7730 = vmatmul.mubr.msk.bf16.vlgmr.msra.gmra.mxu0 %vm1438_vm1, %v2850_v26 }
 0x6b1   : > { %7747 = vmatprep.mubr.msk.bf16.mxu0 %vm8552_vm2, %v8550_v23 }
 0x760   : > { %v2667_v20 = vpop.f32.mrf.mxu0 }
 0x761   : > { %v2668_v30 = vadd.f32 %v7149_v63, %v2667_v20  ;;  %v8035_v20 = vld [vmem:[%s8879_s19] sm:$0xff]  }
 0x762   : > { %v7707_v33 = vpop.f32.mrf.mxu0 }
 0x763   : > { %v2674_v15 = vadd.f32 %v2668_v30, %v8968_v52 }
 0x764   : > { %v2670_v39 = vpop.f32.mrf.mxu0 }
 0x765   : > { %v2671_v34 = vadd.f32 %v7149_v63, %v2670_v39  ;;  %v2678_v48 = vsel %vm1438_vm1, %v2674_v15, 0.0  ;;  %v8034_v63 = vld [vmem:[%s8879_s19 + $0x8] sm:$0xff]   ;;  %s11056_s19 = scalar_lea.vmem %s11054_s18, %s8826_s10 }
 0x766   : > { %2679 = vadd.xlane.f32.xlu1 %v2678_v48  ;;  %v7708_v35 = vpop.f32.mrf.mxu0  ;;  %7714 = vmatpush3.bf16.msra.mxu1 %v8034_v63 }
 0x767   : > { %v2675_v4 = vadd.f32 %v2671_v34, %v8971_v54  ;;  %7715 = vmatprep.subr.bf16.mxu1 %v8550_v23 }
 0x769   : > { %v2681_v44 = vsel %vm1438_vm1, %v2675_v4, 0.0 }
 0x76a   : > { %2682 = vadd.xlane.f32.xlu0 %v2681_v44  ;;  %7716 = vmatpush3.bf16.msra.mxu1 %v8035_v20  ;;  %v7157_v44 = vld [vmem:[%s1365_s14] ss:$0 sm:$0xff] }
 0x76b   : > { %7733 = vmatprep.subr.bf16.mxu1 %v8550_v23 }
 0x7ef   : > { %v2680_v6 = vpop.xlane.xlu1 %2679 }
 0x7f0   : > { %v2684_v14 = vmul.f32 0.015625, %v2680_v6 }
 0x7f2   : > { %v2686_v16 = vsub.f32 %v2674_v15, %v2684_v14 }
 0x7f3   : > { %v2683_v55 = vpop.xlane.xlu0 %2682 }
 0x7f4   : > { %v2685_v27 = vmul.f32 0.015625, %v2683_v55  ;;  %v2688_v62 = vmul.f32 %v2686_v16, %v2686_v16  ;;  %v7158_v55 = vld [vmem:[%s11056_s19] ss:$0 sm:$0xff] }
 0x7f6   : > { %v2687_v52 = vsub.f32 %v2675_v4, %v2685_v27  ;;  %v2690_v43 = vsel %vm1438_vm1, %v2688_v62, 0.0 }
 0x7f7   : > { %2691 = vadd.xlane.f32.xlu0 %v2690_v43 }
 0x7f8   : > { %v2689_v17 = vmul.f32 %v2687_v52, %v2687_v52 }
 0x7fa   : > { %v2693_v54 = vsel %vm1438_vm1, %v2689_v17, 0.0  ;;  %v7165_v17 = vld [vmem:[%s1384_s24] ss:$0 sm:$0xff] }
 0x7fb   : > { %2694 = vadd.xlane.f32.xlu0 %v2693_v54  ;;  %v2927_v54 = vpop.f32.mrf.mxu0 }
 0x880   : > { %v2692_v32 = vpop.xlane.xlu0 %2691 }
 0x881   : > { %v2696_v45 = vmul.f32 0.015625, %v2692_v32  ;;  %v2928_v32 = vadd.f32 %v7165_v17, %v2927_v54 }
 0x883   : > { %v2698_v0 = vadd.f32 1e-05, %v2696_v45  ;;  %v7731_v45 = vpop.f32.mrf.mxu0 }
 0x884   : > { %v2695_v22 = vpop.xlane.xlu0 %2694 }
 0x885   : > { %8252 = vrsqrt.f32 %v2698_v0  ;;  %v2697_v19 = vmul.f32 0.015625, %v2695_v22  ;;  %v9409_v0 = vpack.c.bf16 %v2928_v32, %v2928_v32  ;;  %v2930_v22 = vpop.f32.mrf.mxu0 }
 0x887   : > { %v2699_v36 = vadd.f32 1e-05, %v2697_v19  ;;  %v7732_v19 = vpop.f32.mrf.mxu0 }
 0x889   : > { %8254 = vrsqrt.f32 %v2699_v36  ;;  %v2939_v36 = vsel %vm1695_vm3, %v9409_v0, 0 }
 0x892   : > { %v8253_v24 = vpop.eup %8252 }
 0x893   : > { %v2702_v38 = vmul.f32 %v8253_v24, %v2686_v16 }
 0x895   : > { %v2710_v3 = vmul.f32 %v7155_v40, %v2702_v38 }
 0x896   : > { %v8255_v8 = vpop.eup %8254 }
 0x897   : > { %v2718_v50 = vadd.f32 %v7156_v47, %v2710_v3  ;;  %v2703_v2 = vmul.f32 %v8255_v8, %v2687_v52 }
 0x899   : > { %v9364_v56 = vadd.f32 %v2718_v50, %v8922_v5  ;;  %v2711_v51 = vmul.f32 %v7155_v40, %v2703_v2 }
 0x89b   : > { %v2724_v31 = vsel %vm1438_vm1, %v9364_v56, 0.0  ;;  %v2719_v25 = vadd.f32 %v7156_v47, %v2711_v51  ;;  %v7159_v47 = vld [vmem:[%s1376_s25] ss:$0 sm:$0xff]  ;;  %s11058_s25 = sld [smem:[#allocation10_spill]] }
 0x89c   : > { %2725 = vadd.xlane.f32.xlu1 %v2724_v31 }
 0x89d   : > { %v9369_v42 = vadd.f32 %v2719_v25, %v8925_v7 }
 0x89f   : > { %v2727_v53 = vsel %vm1438_vm1, %v9369_v42, 0.0 }
 0x8a0   : > { %2728 = vadd.xlane.f32.xlu0 %v2727_v53 }
 0x8a1   : > { %s11059_s14 = scalar_lea.vmem %s11058_s25, %s11042_s28 }
 0x925   : > { %v2726_v21 = vpop.xlane.xlu1 %2725 }
 0x926   : > { %v2730_v58 = vmul.f32 0.015625, %v2726_v21 }
 0x928   : > { %v2732_v5 = vsub.f32 %v9364_v56, %v2730_v58 }
 0x929   : > { %v2729_v12 = vpop.xlane.xlu0 %2728 }
 0x92a   : > { %v2731_v9 = vmul.f32 0.015625, %v2729_v12  ;;  %v2734_v57 = vmul.f32 %v2732_v5, %v2732_v5 }
 0x92c   : > { %v2733_v59 = vsub.f32 %v9369_v42, %v2731_v9  ;;  %v2736_v60 = vsel %vm1438_vm1, %v2734_v57, 0.0  ;;  %v1434_v57 = vld [vmem:[%s11059_s14] sm:$0x1] }
 0x92d   : > { %2737 = vadd.xlane.f32.xlu1 %v2736_v60  ;;  %vm1435_vm8 = vcmp.gt.f32.partialorder %v1434_v57, 0.0 }
 0x92e   : > { %v2735_v7 = vmul.f32 %v2733_v59, %v2733_v59 }
 0x930   : > { %v2739_v29 = vsel %vm1438_vm1, %v2735_v7, 0.0 }
 0x931   : > { %2740 = vadd.xlane.f32.xlu0 %v2739_v29 }
 0x93e   : > { %3070 = vrot.lane.b32.xlu1 %v9409_v0, %s8557_s23 }
 0x942   : > { %3197 = vrot.lane.b32.xlu1 %v9409_v0, %s8558_s9 }
 0x9b6   : > { %v2738_v30 = vpop.xlane.xlu1 %2737 }
 0x9b7   : > { %v2742_v33 = vmul.f32 0.015625, %v2738_v30 }
 0x9b9   : > { %v2744_v15 = vadd.f32 1e-05, %v2742_v33 }
 0x9ba   : > { %v2741_v39 = vpop.xlane.xlu0 %2740  ;;  %v3071_v24 = vpop.permute.xlu1 %3070 }
 0x9bb   : > { %8256 = vrsqrt.f32 %v2744_v15  ;;  %v2743_v34 = vmul.f32 0.015625, %v2741_v39  ;;  %v3076_v40 = vsel %vm1695_vm3, %v3071_v24, 0 }
 0x9bc   : > { %7746 = vmatpush3.bf16.xpose.msra.mxu0 %v3076_v40 }
 0x9bd   : > { %v2745_v48 = vadd.f32 1e-05, %v2743_v34  ;;  %7757 = vmatprep.subr.bf16.mxu0 %v8550_v23 }
 0x9be   : > { %v3198_v25 = vpop.permute.xlu1 %3197 }
 0x9bf   : > { %8258 = vrsqrt.f32 %v2745_v48  ;;  %v3203_v58 = vsel %vm1695_vm3, %v3198_v25, 0 }
 0x9c8   : > { %v8257_v35 = vpop.eup %8256 }
 0x9c9   : > { %v2748_v4 = vmul.f32 %v8257_v35, %v2732_v5 }
 0x9cb   : > { %v2756_v16 = vmul.f32 %v7157_v44, %v2748_v4 }
 0x9cc   : > { %v8259_v6 = vpop.eup %8258 }
 0x9cd   : > { %v2749_v14 = vmul.f32 %v8259_v6, %v2733_v59  ;;  %v2764_v62 = vadd.f32 %v7158_v55, %v2756_v16  ;;  %v2984_v59 = vsel %vm1435_vm8, 1, %v8551_v28 }
 0x9ce   : > { %v2988_v60 = vrot.slane %v2984_v59, %v8962_v46 }
 0x9cf   : > { %v2757_v27 = vmul.f32 %v7157_v44, %v2749_v14 }
 0x9d0   : > { %vm9449_vm9 = vcmp.eq.s32.totalorder %v2988_v60, 1 }
 0x9d1   : > { %v2765_v52 = vadd.f32 %v7158_v55, %v2757_v27 }
 0x9d3   : > { %v2766_v43 = vpack.c.bf16 %v2765_v52, %v2764_v62 }
 0x9d5   : > { %7718 = vmatmul.mubr.msk.bf16.vlgmr.msra.gmra.mxu1 %vm1438_vm1, %v2766_v43 }
 0x9d6   : > { %7735 = vmatprep.mubr.msk.bf16.mxu1 %vm8552_vm2, %v8550_v23  ;;  %7734 = vmatpush3.bf16.xpose.msra.mxu1 %v2939_v36 }
 0x9d7   : > { %7739 = vmatprep.subr.bf16.mxu1 %v8550_v23 }
 0xa95   : > { %v2843_v38 = vpop.f32.mrf.mxu1 }
 0xa96   : > { %v2844_v50 = vadd.f32 %v7159_v47, %v2843_v38 }
 0xa97   : > { %v7719_v3 = vpop.f32.mrf.mxu1 }
 0xa99   : > { %v2846_v8 = vpop.f32.mrf.mxu1 }
 0xa9a   : > { %v2847_v2 = vadd.f32 %v7159_v47, %v2846_v8 }
 0xa9b   : > { %v7720_v51 = vpop.f32.mrf.mxu1 }
 0xa9c   : > { %v2933_v31 = vpack.c.bf16 %v2847_v2, %v2844_v50 }
 0xa9e   : > { %3195 = vrot.lane.b32.xlu1 %v2933_v31, %s8558_s9  ;;  %3068 = vrot.lane.b32.xlu0 %v2933_v31, %s8557_s23 }
 0xa9f   : > { %7736 = vmatmul.mubr.msk.bf16.vlgmr.msra.gmra.mxu1 %vm1695_vm3, %v2933_v31 }
 0xaa0   : > { %7741 = vmatprep.mubr.msk.bf16.mxu1 %vm8552_vm2, %v8550_v23 }
 0xaa2   : > { %3324 = vrot.lane.b32.xlu1 %v9409_v0, %s8560_s21  ;;  %3322 = vrot.lane.b32.xlu0 %v2933_v31, %s8560_s21 }
 0xb10   : > { %v3196_v53 = vpop.permute.xlu1 %3195  ;;  %v3069_v21 = vpop.permute.xlu0 %3068 }
 0xb11   : > { %7748 = vmatmul.mubr.msk.bf16.vlgmr.msra.gmra.mxu0 %vm1695_vm3, %v3069_v21 }
 0xb12   : > { %7758 = vmatpush3.bf16.xpose.msra.mxu0 %v3203_v58  ;;  %7759 = vmatprep.mubr.msk.bf16.mxu0 %vm8552_vm2, %v8550_v23 }
 0xb13   : > { %7769 = vmatprep.subr.bf16.mxu0 %v8550_v23 }
 0xb14   : > { %v3325_v5 = vpop.permute.xlu1 %3324  ;;  %v3323_v9 = vpop.permute.xlu0 %3322 }
 0xb15   : > { %v3330_v12 = vsel %vm1695_vm3, %v3325_v5, 0 }
 0xb19   : > { %7760 = vmatmul.mubr.msk.bf16.vlgmr.msra.gmra.mxu0 %vm1695_vm3, %v3196_v53 }
 0xb1a   : > { %7770 = vmatpush3.bf16.xpose.msra.mxu0 %v3330_v12  ;;  %7771 = vmatprep.mubr.msk.bf16.mxu0 %vm8552_vm2, %v8550_v23 }
 0xb1b   : > { %7781 = vmatprep.subr.bf16.mxu0 %v8550_v23 }
 0xb21   : > { %7772 = vmatmul.mubr.msk.bf16.vlgmr.msra.gmra.mxu0 %vm1695_vm3, %v3323_v9 }
 0xb22   : > { %7789 = vmatprep.mubr.msk.bf16.mxu0 %vm8552_vm2, %v8550_v23 }
 0xb5f   : > { %v2975_v7 = vpop.f32.mrf.mxu1 }
 0xb60   : > { %v2982_v1 = vmul.f32 0.25, %v2975_v7 }
 0xb61   : > { %v7737_v18 = vpop.f32.mrf.mxu1 }
 0xb62   : > { %v2990_v49 = vsel %vm9449_vm9, %v2982_v1, -1e+30 }
 0xb63   : > { %v2978_v61 = vpop.f32.mrf.mxu1  ;;  %v2993_v11 = vsel %vm2992_vm10, %v2990_v49, -inf }
 0xb64   : > { %v2983_v13 = vmul.f32 0.25, %v2978_v61  ;;  %2994 = vmax.xlane.f32.xlu1 %v2993_v11 }
 0xb65   : > { %v7738_v10 = vpop.f32.mrf.mxu1 }
 0xb66   : > { %v2991_v26 = vsel %vm9449_vm9, %v2983_v13, -1e+30 }
 0xb67   : > { %v2996_v63 = vsel %vm2992_vm10, %v2991_v26, -inf }
 0xb68   : > { %2997 = vmax.xlane.f32.xlu0 %v2996_v63 }
 0xbd1   : > { %v3112_v20 = vpop.f32.mrf.mxu0 }
 0xbd2   : > { %v3119_v30 = vmul.f32 0.25, %v3112_v20 }
 0xbd3   : > { %v7749_v33 = vpop.f32.mrf.mxu0 }
 0xbd4   : > { %v3121_v15 = vsel %vm9449_vm9, %v3119_v30, -1e+30 }
 0xbd5   : > { %v3115_v39 = vpop.f32.mrf.mxu0  ;;  %v3123_v34 = vsel %vm2992_vm10, %v3121_v15, -inf }
 0xbd6   : > { %v3120_v48 = vmul.f32 0.25, %v3115_v39  ;;  %3124 = vmax.xlane.f32.xlu0 %v3123_v34 }
 0xbd7   : > { %v7750_v35 = vpop.f32.mrf.mxu0 }
 0xbd8   : > { %v3122_v4 = vsel %vm9449_vm9, %v3120_v48, -1e+30 }
 0xbd9   : > { %v3239_v44 = vpop.f32.mrf.mxu0  ;;  %v3126_v6 = vsel %vm2992_vm10, %v3122_v4, -inf }
 0xbda   : > { %v3246_v14 = vmul.f32 0.25, %v3239_v44  ;;  %3127 = vmax.xlane.f32.xlu0 %v3126_v6 }
 0xbdb   : > { %v7761_v16 = vpop.f32.mrf.mxu0 }
 0xbdc   : > { %v3248_v55 = vsel %vm9449_vm9, %v3246_v14, -1e+30 }
 0xbdd   : > { %v3242_v27 = vpop.f32.mrf.mxu0  ;;  %v3250_v62 = vsel %vm2992_vm10, %v3248_v55, -inf }
 0xbde   : > { %v3247_v52 = vmul.f32 0.25, %v3242_v27  ;;  %3251 = vmax.xlane.f32.xlu1 %v3250_v62 }
 0xbdf   : > { %v7762_v43 = vpop.f32.mrf.mxu0 }
 0xbe0   : > { %v3249_v17 = vsel %vm9449_vm9, %v3247_v52, -1e+30 }
 0xbe1   : > { %v3366_v54 = vpop.f32.mrf.mxu0  ;;  %v3253_v32 = vsel %vm2992_vm10, %v3249_v17, -inf }
 0xbe2   : > { %v3373_v45 = vmul.f32 0.25, %v3366_v54  ;;  %3254 = vmax.xlane.f32.xlu0 %v3253_v32 }
 0xbe3   : > { %v7773_v22 = vpop.f32.mrf.mxu0 }
 0xbe4   : > { %v3375_v19 = vsel %vm9449_vm9, %v3373_v45, -1e+30 }
 0xbe5   : > { %v3369_v36 = vpop.f32.mrf.mxu0  ;;  %v3377_v24 = vsel %vm2992_vm10, %v3375_v19, -inf }
 0xbe6   : > { %v3374_v40 = vmul.f32 0.25, %v3369_v36  ;;  %3378 = vmax.xlane.f32.xlu1 %v3377_v24 }
 0xbe7   : > { %v7774_v38 = vpop.f32.mrf.mxu0 }
 0xbe8   : > { %v3376_v47 = vsel %vm9449_vm9, %v3374_v40, -1e+30 }
 0xbe9   : > { %v3380_v3 = vsel %vm2992_vm10, %v3376_v47, -inf }
 0xbea   : > { %3381 = vmax.xlane.f32.xlu0 %v3380_v3 }
 0xbed   : > { %v2995_v51 = vpop.xlane.xlu1 %2994 }
 0xbee   : > { %v2999_v31 = vsub.f32 %v2990_v49, %v2995_v51 }
 0xbf0   : > { %v3001_v21 = vmul.f32 1.442695, %v2999_v31 }
 0xbf1   : > { %v2998_v8 = vpop.xlane.xlu0 %2997 }
 0xbf2   : > { %v3000_v50 = vsub.f32 %v2991_v26, %v2998_v8 }
 0xbf4   : > { %v3003_v2 = vmul.f32 1.442695, %v3000_v50 }
 0xbf6   : > { %8260 = vpow2.f32 %v3003_v2 }
 0xbf7   : > { %3017 = vrot.lane.b32.xlu1 %v9409_v0, %s8556_s15  ;;  %8262 = vpow2.f32 %v3001_v21 }
 0xc03   : > { %v9479_v25 = vpop.eup %8260 }
 0xc04   : > { %v3008_v53 = vsel %vm2992_vm10, %v9479_v25, 0.0  ;;  %v8263_v58 = vpop.eup %8262 }
 0xc05   : > { %3009 = vadd.xlane.f32.xlu0 %v3008_v53  ;;  %v3005_v5 = vsel %vm2992_vm10, %v8263_v58, 0.0 }
 0xc1b   : > { %3006 = vadd.xlane.f32.xlu1 %v3005_v5 }
 0xc5f   : > { %v3125_v12 = vpop.xlane.xlu0 %3124 }
 0xc60   : > { %v3129_v9 = vsub.f32 %v3121_v15, %v3125_v12 }
 0xc62   : > { %v3131_v57 = vmul.f32 1.442695, %v3129_v9 }
 0xc63   : > { %v3128_v59 = vpop.xlane.xlu0 %3127 }
 0xc64   : > { %8264 = vpow2.f32 %v3131_v57  ;;  %v3130_v60 = vsub.f32 %v3122_v4, %v3128_v59 }
 0xc66   : > { %v3133_v7 = vmul.f32 1.442695, %v3130_v60 }
 0xc67   : > { %v3252_v29 = vpop.xlane.xlu1 %3251 }
 0xc68   : > { %8266 = vpow2.f32 %v3133_v7  ;;  %v3256_v1 = vsub.f32 %v3248_v55, %v3252_v29 }
 0xc6a   : > { %v3258_v18 = vmul.f32 1.442695, %v3256_v1 }
 0xc6b   : > { %v3255_v49 = vpop.xlane.xlu0 %3254 }
 0xc6c   : > { %8268 = vpow2.f32 %v3258_v18  ;;  %v3257_v61 = vsub.f32 %v3249_v17, %v3255_v49 }
 0xc6e   : > { %v3260_v11 = vmul.f32 1.442695, %v3257_v61 }
 0xc6f   : > { %v3379_v13 = vpop.xlane.xlu1 %3378 }
 0xc70   : > { %8270 = vpow2.f32 %v3260_v11  ;;  %v3383_v10 = vsub.f32 %v3375_v19, %v3379_v13 }
 0xc71   : > { %v8265_v26 = vpop.eup %8264 }
 0xc72   : > { %v3385_v63 = vmul.f32 1.442695, %v3383_v10  ;;  %v3135_v20 = vsel %vm2992_vm10, %v8265_v26, 0.0  ;;  %v8036_v10 = vld [vmem:[%s8889_s30 + $0x18] sm:$0xff]  }
 0xc73   : > { %v3018_v30 = vpop.permute.xlu1 %3017  ;;  %3136 = vadd.xlane.f32.xlu1 %v3135_v20  ;;  %v3382_v33 = vpop.xlane.xlu0 %3381  ;;  %7782 = vmatpush3.bf16.msra.mxu0 %v8036_v10  ;;  %v8037_v20 = vld [vmem:[%s8889_s30 + $0x10] sm:$0xff]   ;;  %v3667_v10 = vld [vmem:[%s8900_s11 + $0x1c8] sm:$0xff] }
 0xc74   : > { %8272 = vpow2.f32 %v3385_v63  ;;  %v3024_v15 = vsel %vm3022_vm11, %v3018_v30, 0  ;;  %v3384_v39 = vsub.f32 %v3376_v47, %v3382_v33  ;;  %7783 = vmatprep.subr.bf16.mxu0 %v8550_v23 }
 0xc75   : > { %v8267_v34 = vpop.eup %8266  ;;  %7740 = vmatpush3.bf16.msra.mxu1 %v3024_v15  ;;  %v8038_v15 = vld [vmem:[%s8889_s30 + $0x8] sm:$0xff]  }
 0xc76   : > { %v3387_v48 = vmul.f32 1.442695, %v3384_v39  ;;  %v3138_v35 = vsel %vm2992_vm10, %v8267_v34, 0.0  ;;  %7751 = vmatprep.subr.bf16.mxu1 %v8550_v23 }
 0xc77   : > { %3139 = vadd.xlane.f32.xlu0 %v3138_v35  ;;  %7784 = vmatpush3.bf16.msra.mxu0 %v8037_v20  ;;  %v8039_v35 = vld [vmem:[%s8889_s30] sm:$0xff]  }
 0xc78   : > { %8274 = vpow2.f32 %v3387_v48  ;;  %7785 = vmatprep.subr.bf16.mxu0 %v8550_v23 }
 0xc79   : > { %v8269_v4 = vpop.eup %8268 }
 0xc7a   : > { %v3262_v44 = vsel %vm2992_vm10, %v8269_v4, 0.0 }
 0xc7b   : > { %3263 = vadd.xlane.f32.xlu1 %v3262_v44  ;;  %7786 = vmatpush3.bf16.msra.mxu0 %v8038_v15  ;;  %v3643_v15 = vld [vmem:[%s8900_s11 + $0x108] sm:$0xff] }
 0xc7c   : > { %7787 = vmatprep.subr.bf16.mxu0 %v8550_v23 }
 0xc7d   : > { %v8271_v6 = vpop.eup %8270 }
 0xc7e   : > { %v3265_v14 = vsel %vm2992_vm10, %v8271_v6, 0.0 }
 0xc7f   : > { %3266 = vadd.xlane.f32.xlu0 %v3265_v14  ;;  %7788 = vmatpush3.bf16.msra.mxu0 %v8039_v35 }
 0xc81   : > { %v8273_v16 = vpop.eup %8272 }
 0xc82   : > { %v3389_v55 = vsel %vm2992_vm10, %v8273_v16, 0.0 }
 0xc83   : > { %3390 = vadd.xlane.f32.xlu1 %v3389_v55 }
 0xc85   : > { %v8275_v27 = vpop.eup %8274 }
 0xc86   : > { %v3392_v62 = vsel %vm2992_vm10, %v8275_v27, 0.0 }
 0xc87   : > { %3393 = vadd.xlane.f32.xlu0 %v3392_v62 }
 0xc8e   : > { %v3010_v52 = vpop.xlane.xlu0 %3009 }
 0xc8f   : > { %8276 = vrcp.f32 %v3010_v52 }
 0xc94   : > { %3273 = vrot.lane.b32.xlu1 %v9409_v0, %s8559_s5 }
 0xc98   : > { %3400 = vrot.lane.b32.xlu1 %v9409_v0, %s8561_s27 }
 0xc9c   : > { %v8277_v17 = vpop.eup %8276 }
 0xc9d   : > { %3146 = vrot.lane.b32.xlu0 %v9409_v0, %s8555_s16  ;;  %v3014_v45 = vmul.f32 %v8277_v17, %v9479_v25 }
 0xca4   : > { %v3007_v43 = vpop.xlane.xlu1 %3006 }
 0xca5   : > { %8278 = vrcp.f32 %v3007_v43 }
 0xcb2   : > { %v8279_v54 = vpop.eup %8278 }
 0xcb3   : > { %v3012_v32 = vmul.f32 %v8279_v54, %v8263_v58 }
 0xcb5   : > { %v3015_v22 = vpack.c.bf16 %v3014_v45, %v3012_v32 }
 0xcb7   : > { %7742 = vmatmul.mubr.msk.bf16.vlgmr.msra.gmra.mxu1 %vm2992_vm10, %v3015_v22 }
 0xcb8   : > { %7753 = vmatprep.mubr.msk.bf16.mxu1 %vm8552_vm2, %v8550_v23 }
 0xcfc   : > { %v3137_v36 = vpop.xlane.xlu1 %3136 }
 0xd00   : > { %v3140_v19 = vpop.xlane.xlu0 %3139 }
 0xd01   : > { %8280 = vrcp.f32 %v3140_v19 }
 0xd02   : > { %8282 = vrcp.f32 %v3137_v36 }
 0xd04   : > { %v3264_v24 = vpop.xlane.xlu1 %3263 }
 0xd08   : > { %v3267_v0 = vpop.xlane.xlu0 %3266 }
 0xd09   : > { %8284 = vrcp.f32 %v3267_v0 }
 0xd0a   : > { %8286 = vrcp.f32 %v3264_v24 }
 0xd0c   : > { %v3391_v38 = vpop.xlane.xlu1 %3390 }
 0xd0e   : > { %v8281_v40 = vpop.eup %8280 }
 0xd0f   : > { %v8283_v3 = vpop.eup %8282  ;;  %v3144_v8 = vmul.f32 %v8281_v40, %v8267_v34 }
 0xd10   : > { %v3394_v47 = vpop.xlane.xlu0 %3393  ;;  %v3142_v51 = vmul.f32 %v8283_v3, %v8265_v26  ;;  %v3274_v31 = vpop.permute.xlu1 %3273 }
 0xd11   : > { %8288 = vrcp.f32 %v3394_v47  ;;  %v3279_v21 = vsel %vm3022_vm11, %v3274_v31, 0 }
 0xd12   : > { %8290 = vrcp.f32 %v3391_v38  ;;  %v3145_v25 = vpack.c.bf16 %v3144_v8, %v3142_v51  ;;  %v7179_v8 = vld [vmem:[%s1392_s0] ss:$0 sm:$0xff] }
 0xd14   : > { %v3147_v50 = vpop.permute.xlu0 %3146  ;;  %v3401_v9 = vpop.permute.xlu1 %3400 }
 0xd15   : > { %v3152_v2 = vsel %vm3022_vm11, %v3147_v50, 0  ;;  %v3406_v60 = vsel %vm3022_vm11, %v3401_v9, 0 }
 0xd16   : > { %7752 = vmatpush3.bf16.msra.mxu1 %v3152_v2  ;;  %v8285_v53 = vpop.eup %8284 }
 0xd17   : > { %7763 = vmatprep.subr.bf16.mxu1 %v8550_v23  ;;  %v8287_v58 = vpop.eup %8286  ;;  %v3271_v5 = vmul.f32 %v8285_v53, %v8271_v6 }
 0xd18   : > { %v3269_v12 = vmul.f32 %v8287_v58, %v8269_v4 }
 0xd19   : > { %7754 = vmatmul.mubr.msk.bf16.vlgmr.msra.gmra.mxu1 %vm2992_vm10, %v3145_v25 }
 0xd1a   : > { %7764 = vmatpush3.bf16.msra.mxu1 %v3279_v21  ;;  %7765 = vmatprep.mubr.msk.bf16.mxu1 %vm8552_vm2, %v8550_v23  ;;  %v3272_v57 = vpack.c.bf16 %v3271_v5, %v3269_v12 }
 0xd1b   : > { %7775 = vmatprep.subr.bf16.mxu1 %v8550_v23 }
 0xd1e   : > { %v8289_v59 = vpop.eup %8288 }
 0xd1f   : > { %v8291_v7 = vpop.eup %8290  ;;  %v3398_v29 = vmul.f32 %v8289_v59, %v8275_v27 }
 0xd20   : > { %v3396_v1 = vmul.f32 %v8291_v7, %v8273_v16 }
 0xd21   : > { %7766 = vmatmul.mubr.msk.bf16.vlgmr.msra.gmra.mxu1 %vm2992_vm10, %v3272_v57 }
 0xd22   : > { %7776 = vmatpush3.bf16.msra.mxu1 %v3406_v60  ;;  %7777 = vmatprep.mubr.msk.bf16.mxu1 %vm8552_vm2, %v8550_v23  ;;  %v3399_v18 = vpack.c.bf16 %v3398_v29, %v3396_v1 }
 0xd29   : > { %7778 = vmatmul.mubr.msk.bf16.vlgmr.msra.gmra.mxu1 %vm2992_vm10, %v3399_v18 }
 0xd2a   : > { %4113 = vmatprep.mubr.bf16.mxu1 %v8551_v28 }
 0xd77   : > { %v3060_v49 = vpop.f32.mrf.mxu1 }
 0xd79   : > { %v7743_v61 = vpop.f32.mrf.mxu1 }
 0xd7a   : > { %v3666_v61 = vld [vmem:[%s8900_s11 + $0x1c0] sm:$0xff] }
 0xd7b   : > { %v3063_v11 = vpop.f32.mrf.mxu1 }
 0xd7d   : > { %v7744_v13 = vpop.f32.mrf.mxu1 }
 0xdd9   : > { %v3188_v26 = vpop.f32.mrf.mxu1 }
 0xddb   : > { %v7755_v63 = vpop.f32.mrf.mxu1 }
 0xddd   : > { %v3191_v30 = vpop.f32.mrf.mxu1 }
 0xdde   : > { %v7993_v33 = vpack.i.bf16 %v3191_v30, %v3188_v26  ;;  %v3642_v30 = vld [vmem:[%s8900_s11 + $0x100] sm:$0xff] }
 0xddf   : > { %v7756_v39 = vpop.f32.mrf.mxu1 }
 0xde0   : > { %7994 = vrot.lane.b32.xlu1 %v7993_v33, %s8561_s27  ;;  %v3650_v33 = vld [vmem:[%s8900_s11 + $0x140] sm:$0xff] }
 0xde1   : > { %v3315_v34 = vpop.f32.mrf.mxu1  ;;  %v7220_v39 = vcombine.high %v3642_v30, %v3650_v33 }
 0xde3   : > { %v7767_v48 = vpop.f32.mrf.mxu1 }
 0xde4   : > { %v7219_v48 = vcombine.low %v3642_v30, %v3650_v33  ;;  %v3637_v30 = vld [vmem:[%s8900_s11 + $0xd8] sm:$0xff] }
 0xde5   : > { %v3318_v4 = vpop.f32.mrf.mxu1 }
 0xde6   : > { %v7998_v44 = vpack.i.bf16 %v3318_v4, %v3315_v34  ;;  %v3651_v34 = vld [vmem:[%s8900_s11 + $0x148] sm:$0xff] }
 0xde7   : > { %v7768_v6 = vpop.f32.mrf.mxu1  ;;  %v7221_v35 = vcombine.low %v3643_v15, %v3651_v34  ;;  %v7222_v4 = vcombine.high %v3643_v15, %v3651_v34 }
 0xde8   : > { %7999 = vrot.lane.b32.xlu0 %v7998_v44, %s8559_s5  ;;  %v3626_v44 = vld [vmem:[%s8900_s11 + $0x80] sm:$0xff]  ;;  %s8583_s5 = smov [#allocation2]  }
 0xde9   : > { %v3442_v14 = vpop.f32.mrf.mxu1  ;;  %v3634_v6 = vld [vmem:[%s8900_s11 + $0xc0] sm:$0xff]  ;;  %s8430_s21 = sshll.u32 %s8583_s5, 4  ;;  %s8431_s21 = int_to_ptr.vmem [resolvable:$false] %s8430_s21 }
 0xdea   : > { %s8432_s27 = scalar_lea.vmem %s8431_s21, 512 }
 0xdeb   : > { %v7779_v16 = vpop.f32.mrf.mxu1 }
 0xdec   : > { %v7204_v16 = vcombine.high %v3626_v44, %v3634_v6 }
 0xded   : > { %v3445_v55 = vpop.f32.mrf.mxu1 }
 0xdee   : > { %v8003_v27 = vpack.i.bf16 %v3445_v55, %v3442_v14  ;;  %v3627_v14 = vld [vmem:[%s8900_s11 + $0x88] sm:$0xff] }
 0xdef   : > { %v7780_v62 = vpop.f32.mrf.mxu1  ;;  %v3635_v55 = vld [vmem:[%s8900_s11 + $0xc8] sm:$0xff] }
 0xdf0   : > { %8004 = vrot.lane.b32.xlu1 %v8003_v27, %s8555_s16  ;;  %v7203_v27 = vcombine.low %v3626_v44, %v3634_v6  ;;  %v7205_v62 = vcombine.low %v3627_v14, %v3635_v55  ;;  %v3621_v44 = vld [vmem:[%s8900_s11 + $0x58] sm:$0xff] }
 0xe52   : > { %v7995_v52 = vpop.permute.xlu1 %7994 }
 0xe53   : > { %v7997_v17 = vunpack.i.h.bf16 %v7995_v52  ;;  %v7996_v23 = vunpack.i.l.bf16 %v7995_v52  ;;  %v7206_v52 = vcombine.high %v3627_v14, %v3635_v55 }
 0xe55   : > { %v3474_v22 = vsel %vm1695_vm3, %v3063_v11, %v7997_v17  ;;  %v3473_v19 = vsel %vm1695_vm3, %v3060_v49, %v7996_v23  ;;  %v3658_v49 = vld [vmem:[%s8900_s11 + $0x180] sm:$0xff]  ;;  %v3659_v11 = vld [vmem:[%s8900_s11 + $0x188] sm:$0xff] }
 0xe56   : > { %v7236_v13 = vcombine.high %v3658_v49, %v3666_v61  ;;  %v7235_v26 = vcombine.low %v3658_v49, %v3666_v61  ;;  %v7237_v63 = vcombine.low %v3659_v11, %v3667_v10  ;;  %v7238_v20 = vcombine.high %v3659_v11, %v3667_v10  ;;  %v3618_v17 = vld [vmem:[%s8900_s11 + $0x40] sm:$0xff]  ;;  %v3611_v23 = vld [vmem:[%s8900_s11 + $0x8] sm:$0xff]  ;;  %v3645_v49 = vld [vmem:[%s8900_s11 + $0x118] sm:$0xff] }
 0xe57   : > { %v3653_v61 = vld [vmem:[%s8900_s11 + $0x158] sm:$0xff] }
 0xe58   : > { %4089 = vmatprep.subr.bf16.mxu1 %v7236_v13  ;;  %4132 = vmatprep.subr.bf16.mxu0 %v7238_v20  ;;  %v3636_v20 = vld [vmem:[%s8900_s11 + $0xd0] sm:$0xff]  ;;  %v7225_v15 = vcombine.low %v3645_v49, %v3653_v61 }
 0xe59   : > { %4090 = vmatpush1.bf16.msra.mxu1 %v7235_v26  ;;  %v7226_v26 = vcombine.high %v3645_v49, %v3653_v61  ;;  %v3673_v49 = vld [vmem:[%s8900_s11 + $0x1f8] sm:$0xff] }
 0xe5a   : > { %v8000_v43 = vpop.permute.xlu0 %7999  ;;  %4091 = vmatprep.subr.bf16.mxu1 %v7220_v39 }
 0xe5b   : > { %v8002_v54 = vunpack.i.h.bf16 %v8000_v43  ;;  %v8001_v32 = vunpack.i.l.bf16 %v8000_v43  ;;  %v3610_v43 = vld [vmem:[%s8900_s11] sm:$0xff] }
 0xe5d   : > { %v3476_v24 = vsel %vm2584_vm6, %v3474_v22, %v8002_v54  ;;  %v3475_v40 = vsel %vm2584_vm6, %v3473_v19, %v8001_v32  ;;  %4092 = vmatpush1.bf16.msra.mxu1 %v7219_v48  ;;  %v7188_v54 = vcombine.high %v3610_v43, %v3618_v17  ;;  %v3619_v32 = vld [vmem:[%s8900_s11 + $0x48] sm:$0xff]  ;;  %v3612_v48 = vld [vmem:[%s8900_s11 + $0x10] sm:$0xff] }
 0xe5e   : > { %4093 = vmatprep.subr.bf16.mxu1 %v7204_v16  ;;  %v7189_v22 = vcombine.low %v3611_v23, %v3619_v32  ;;  %v7190_v19 = vcombine.high %v3611_v23, %v3619_v32 }
 0xe61   : > { %4094 = vmatpush1.bf16.msra.mxu1 %v7203_v27  ;;  %v3662_v27 = vld [vmem:[%s8900_s11 + $0x1a0] sm:$0xff] }
 0xe62   : > { %v8005_v45 = vpop.permute.xlu1 %8004  ;;  %4095 = vmatprep.subr.bf16.mxu1 %v7188_v54 }
 0xe63   : > { %v8007_v36 = vunpack.i.h.bf16 %v8005_v45  ;;  %v8006_v0 = vunpack.i.l.bf16 %v8005_v45  ;;  %v7187_v45 = vcombine.low %v3610_v43, %v3618_v17  ;;  %v3671_v43 = vld [vmem:[%s8900_s11 + $0x1e8] sm:$0xff] }
 0xe65   : > { %v3478_v38 = vsel %vm2587_vm7, %v3476_v24, %v8007_v36  ;;  %v3477_v47 = vsel %vm2587_vm7, %v3475_v40, %v8006_v0  ;;  %4096 = vmatpush1.bf16.msra.mxu1 %v7187_v45  ;;  %v3660_v36 = vld [vmem:[%s8900_s11 + $0x190] sm:$0xff]  ;;  %v3661_v24 = vld [vmem:[%s8900_s11 + $0x198] sm:$0xff]  ;;  %v3646_v45 = vld [vmem:[%s8900_s11 + $0x120] sm:$0xff] }
 0xe66   : > { %v3479_v3 = vpack.c.bf16 %v3478_v38, %v3477_v47  ;;  %v3668_v0 = vld [vmem:[%s8900_s11 + $0x1d0] sm:$0xff]  ;;  %v3669_v47 = vld [vmem:[%s8900_s11 + $0x1d8] sm:$0xff] }
 0xe67   : > { %v7239_v40 = vcombine.low %v3660_v36, %v3668_v0  ;;  %v7240_v38 = vcombine.high %v3660_v36, %v3668_v0  ;;  %v3655_v36 = vld [vmem:[%s8900_s11 + $0x168] sm:$0xff] }
 0xe68   : > { %7790 = vmatmul.mubr.msk.bf16.vlgmr.msra.gmra.mxu0 %vm1438_vm1, %v3479_v3  ;;  %v7241_v3 = vcombine.low %v3661_v24, %v3669_v47 }
 0xe69   : > { %4156 = vmatprep.mubr.bf16.mxu0 %v8551_v28  ;;  %4133 = vmatpush1.bf16.msra.mxu0 %v7237_v63  ;;  %v3628_v63 = vld [vmem:[%s8900_s11 + $0x90] sm:$0xff] }
 0xe6a   : > { %4134 = vmatprep.subr.bf16.mxu0 %v7222_v4  ;;  %4175 = vmatprep.subr.bf16.mxu1 %v7240_v38  ;;  %v7208_v39 = vcombine.high %v3628_v63, %v3636_v20  ;;  %v3613_v4 = vld [vmem:[%s8900_s11 + $0x18] sm:$0xff]  ;;  %v7207_v6 = vcombine.low %v3628_v63, %v3636_v20  ;;  %v3656_v63 = vld [vmem:[%s8900_s11 + $0x170] sm:$0xff] }
 0xe6b   : > { %v7194_v55 = vcombine.high %v3613_v4, %v3621_v44  ;;  %v7193_v23 = vcombine.low %v3613_v4, %v3621_v44  ;;  %v3649_v20 = vld [vmem:[%s8900_s11 + $0x138] sm:$0xff] }
 0xe6c   : > { %v3641_v4 = vld [vmem:[%s8900_s11 + $0xf8] sm:$0xff] }
 0xe6d   : > { %4135 = vmatpush1.bf16.msra.mxu0 %v7221_v35  ;;  %v3620_v35 = vld [vmem:[%s8900_s11 + $0x50] sm:$0xff] }
 0xe6e   : > { %4136 = vmatprep.subr.bf16.mxu0 %v7206_v52  ;;  %v7192_v16 = vcombine.high %v3612_v48, %v3620_v35  ;;  %v3663_v52 = vld [vmem:[%s8900_s11 + $0x1a8] sm:$0xff]  ;;  %v7191_v17 = vcombine.low %v3612_v48, %v3620_v35  ;;  %v3640_v48 = vld [vmem:[%s8900_s11 + $0xf0] sm:$0xff]  ;;  %v3633_v35 = vld [vmem:[%s8900_s11 + $0xb8] sm:$0xff] }
 0xe6f   : > { %v7246_v32 = vcombine.high %v3663_v52, %v3671_v43 }
 0xe71   : > { %4137 = vmatpush1.bf16.msra.mxu0 %v7205_v62  ;;  %v3670_v62 = vld [vmem:[%s8900_s11 + $0x1e0] sm:$0xff] }
 0xe72   : > { %4138 = vmatprep.subr.bf16.mxu0 %v7190_v19  ;;  %v7244_v54 = vcombine.high %v3662_v27, %v3670_v62  ;;  %v3647_v19 = vld [vmem:[%s8900_s11 + $0x128] sm:$0xff]  ;;  %v7243_v0 = vcombine.low %v3662_v27, %v3670_v62  ;;  %v3624_v27 = vld [vmem:[%s8900_s11 + $0x70] sm:$0xff]  ;;  %v3617_v62 = vld [vmem:[%s8900_s11 + $0x38] sm:$0xff] }
 0xe73   : > { %v7230_v38 = vcombine.high %v3647_v19, %v3655_v36 }
 0xe75   : > { %4139 = vmatpush1.bf16.msra.mxu0 %v7189_v22  ;;  %v3654_v22 = vld [vmem:[%s8900_s11 + $0x160] sm:$0xff] }
 0xf28   : > { %v3556_v50 = vpop.f32.mrf.mxu0 }
 0xf29   : > { %v3557_v2 = vadd.f32 %v7179_v8, %v3556_v50 }
 0xf2a   : > { %v7791_v51 = vpop.f32.mrf.mxu0 }
 0xf2b   : > { %v9537_v31 = vadd.f32 %v3557_v2, %v9364_v56 }
 0xf2c   : > { %v3559_v25 = vpop.f32.mrf.mxu0 }
 0xf2d   : > { %11063 = vst [vmem:[#allocation59_spill] sm:$0xff] %v9537_v31  ;;  %v3560_v53 = vadd.f32 %v7179_v8, %v3559_v25  ;;  %v3567_v21 = vsel %vm1438_vm1, %v9537_v31, 0.0  ;;  %v7242_v8 = vcombine.high %v3661_v24, %v3669_v47  ;;  %v7245_v24 = vcombine.low %v3663_v52, %v3671_v43  ;;  %v3630_v47 = vld [vmem:[%s8900_s11 + $0xa0] sm:$0xff]  ;;  %v3625_v52 = vld [vmem:[%s8900_s11 + $0x78] sm:$0xff] }
 0xf2e   : > { %3568 = vadd.xlane.f32.xlu0 %v3567_v21  ;;  %v7792_v58 = vpop.f32.mrf.mxu0 }
 0xf2f   : > { %v9542_v5 = vadd.f32 %v3560_v53, %v9369_v42  ;;  %4218 = vmatprep.subr.bf16.mxu0 %v7242_v8  ;;  %v3631_v8 = vld [vmem:[%s8900_s11 + $0xa8] sm:$0xff] }
 0xf31   : > { %11064 = vst [vmem:[#allocation60_spill] sm:$0xff] %v9542_v5  ;;  %v3570_v12 = vsel %vm1438_vm1, %v9542_v5, 0.0 }
 0xf32   : > { %3571 = vadd.xlane.f32.xlu1 %v3570_v12 }
 0xfb7   : > { %v3569_v9 = vpop.xlane.xlu0 %3568 }
 0xfb8   : > { %v3573_v56 = vmul.f32 0.015625, %v3569_v9  ;;  %v7185_v9 = vld [vmem:[%s1395_s8] ss:$0 sm:$0xff]  ;;  %s11156_s8 = sld [smem:[#allocation34_spill]] }
 0xfba   : > { %v9547_v57 = vsub.f32 %v9537_v31, %v3573_v56 }
 0xfbb   : > { %v3572_v59 = vpop.xlane.xlu1 %3571 }
 0xfbc   : > { %v3574_v60 = vmul.f32 0.015625, %v3572_v59  ;;  %v3577_v7 = vmul.f32 %v9547_v57, %v9547_v57 }
 0xfbe   : > { %v9552_v42 = vsub.f32 %v9542_v5, %v3574_v60  ;;  %v3579_v29 = vsel %vm1438_vm1, %v3577_v7, 0.0  ;;  %v7186_v7 = vld [vmem:[%s1398_s6] ss:$0 sm:$0xff]  ;;  %s11157_s6 = sld [smem:[#allocation36_spill]] }
 0xfbf   : > { %3580 = vadd.xlane.f32.xlu0 %v3579_v29 }
 0xfc0   : > { %v3578_v1 = vmul.f32 %v9552_v42, %v9552_v42 }
 0xfc2   : > { %v3582_v18 = vsel %vm1438_vm1, %v3578_v1, 0.0  ;;  %v3644_v1 = vld [vmem:[%s8900_s11 + $0x110] sm:$0xff] }
 0xfc3   : > { %3583 = vadd.xlane.f32.xlu0 %v3582_v18  ;;  %v3652_v18 = vld [vmem:[%s8900_s11 + $0x150] sm:$0xff] }
 0xfc4   : > { %v7224_v10 = vcombine.high %v3644_v1, %v3652_v18  ;;  %v7223_v33 = vcombine.low %v3644_v1, %v3652_v18  ;;  %v3672_v1 = vld [vmem:[%s8900_s11 + $0x1f0] sm:$0xff]  ;;  %v3665_v18 = vld [vmem:[%s8900_s11 + $0x1b8] sm:$0xff]  ;;  %s11161_s15 = sand.u32 1, %s11157_s6  }
 0xfc5   : > { %s10811_s23 = scalar_lea.sflag [#allocation3], %s11161_s15 }
0x1048   : > { %v3581_v50 = vpop.xlane.xlu0 %3580 }
0x1049   : > { %v3585_v2 = vmul.f32 0.015625, %v3581_v50  ;;  %v3639_v50 = vld [vmem:[%s8900_s11 + $0xe8] sm:$0xff] }
0x104b   : > { %v3587_v51 = vadd.f32 1e-05, %v3585_v2  ;;  %v7227_v2 = vcombine.low %v3646_v45, %v3654_v22 }
0x104c   : > { %v3584_v25 = vpop.xlane.xlu0 %3583 }
0x104d   : > { %8292 = vrsqrt.f32 %v3587_v51  ;;  %v3586_v53 = vmul.f32 0.015625, %v3584_v25  ;;  %v7229_v51 = vcombine.low %v3647_v19, %v3655_v36  ;;  %v8042_v19 = vld [vmem:[%s8909_s29 + $0x38] sm:$0xff]  }
0x104e   : > { %v8043_v36 = vld [vmem:[%s8909_s29 + $0xb8] sm:$0xff]  }
0x104f   : > { %v3588_v21 = vadd.f32 1e-05, %v3586_v53  ;;  %v7214_v53 = vcombine.high %v3631_v8, %v3639_v50 }
0x1051   : > { %8294 = vrsqrt.f32 %v3588_v21  ;;  %v3614_v21 = vld [vmem:[%s8900_s11 + $0x20] sm:$0xff] }
0x105a   : > { %v8293_v58 = vpop.eup %8292 }
0x105b   : > { %v3591_v12 = vmul.f32 %v8293_v58, %v9547_v57  ;;  %v3622_v58 = vld [vmem:[%s8900_s11 + $0x60] sm:$0xff] }
0x105c   : > { %v7195_v61 = vcombine.low %v3614_v21, %v3622_v58 }
0x105d   : > { %v3599_v59 = vmul.f32 %v7185_v9, %v3591_v12  ;;  %v3615_v12 = vld [vmem:[%s8900_s11 + $0x28] sm:$0xff] }
0x105e   : > { %v8295_v56 = vpop.eup %8294 }
0x105f   : > { %v3592_v60 = vmul.f32 %v8295_v56, %v9552_v42  ;;  %v3607_v11 = vadd.f32 %v7186_v7, %v3599_v59  ;;  %v3629_v42 = vld [vmem:[%s8900_s11 + $0x98] sm:$0xff]  ;;  %v7213_v59 = vcombine.low %v3631_v8, %v3639_v50  ;;  %v8051_v8 = vld [vmem:[%s8909_s29 + $0xa8] sm:$0xff]   ;;  %v8052_v50 = vld [vmem:[%s8909_s29 + $0x60] sm:$0xff]  }
0x1060   : > { %v7210_v34 = vcombine.high %v3629_v42, %v3637_v30  ;;  %v7209_v14 = vcombine.low %v3629_v42, %v3637_v30  ;;  %v3657_v42 = vld [vmem:[%s8900_s11 + $0x178] sm:$0xff] }
0x1061   : > { %v3600_v29 = vmul.f32 %v7185_v9, %v3592_v60  ;;  %v3623_v9 = vld [vmem:[%s8900_s11 + $0x68] sm:$0xff]  ;;  %v7196_v60 = vcombine.high %v3614_v21, %v3622_v58  ;;  %v8057_v21 = vld [vmem:[%s8909_s29 + $0xd8] sm:$0xff]  }
0x1062   : > { %v8058_v58 = vld [vmem:[%s8909_s29 + $0x18] sm:$0xff]  }
0x1063   : > { %v3608_v13 = vadd.f32 %v7186_v7, %v3600_v29  ;;  %v7198_v7 = vcombine.high %v3615_v12, %v3623_v9  ;;  %v3664_v29 = vld [vmem:[%s8900_s11 + $0x1b0] sm:$0xff] }
0x1064   : > { %v7247_v30 = vcombine.low %v3664_v29, %v3672_v1 }
0x1065   : > { %v9590_v57 = vpack.c.bf16 %v3608_v13, %v3607_v11  ;;  %v7197_v11 = vcombine.low %v3615_v12, %v3623_v9  ;;  %v7248_v13 = vcombine.high %v3664_v29, %v3672_v1  ;;  %v9674_v12 = vld [vmem:[%s8903_s3] sm:$0xff]  ;;  %v3688_v9 = vsub.s32 2, %v8956_v41 }
0x1066   : > { %v10887_v1 = vsub.s32 3, %v8956_v41 }
0x1067   : > { %7251 = vmatmul.mubr.msk.bf16.vlgmr.msra.gmra.mxu1 %vm1438_vm1, %v9590_v57  ;;  %7252 = vmatmul.mubr.msk.bf16.vlgmr.msra.gmra.mxu0 %vm1438_vm1, %v9590_v57 }
0x1068   : > { %4176 = vmatpush1.bf16.msra.mxu1 %v7239_v40  ;;  %4219 = vmatpush1.bf16.msra.mxu0 %v7241_v3  ;;  %v7228_v40 = vcombine.high %v3646_v45, %v3654_v22  ;;  %v3638_v3 = vld [vmem:[%s8900_s11 + $0xe0] sm:$0xff]  ;;  %v7201_v45 = vcombine.low %v3617_v62, %v3625_v52  ;;  %v8041_v22 = vld [vmem:[%s8909_s29 + $0xf8] sm:$0xff]  }
0x1069   : > { %4177 = vmatprep.subr.bf16.mxu1 %v7224_v10  ;;  %4220 = vmatprep.subr.bf16.mxu0 %v7226_v26  ;;  %v7212_v25 = vcombine.high %v3630_v47, %v3638_v3  ;;  %v7211_v56 = vcombine.low %v3630_v47, %v3638_v3  ;;  %v7250_v10 = vcombine.high %v3665_v18, %v3673_v49  ;;  %v3648_v26 = vld [vmem:[%s8900_s11 + $0x130] sm:$0xff]  ;;  %v8049_v47 = vld [vmem:[%s8909_s29 + $0xe8] sm:$0xff]  }
0x106a   : > { %4199 = vmatprep.mubr.bf16.mxu1 %v8551_v28  ;;  %4242 = vmatprep.mubr.bf16.mxu0 %v8551_v28  ;;  %v7231_v44 = vcombine.low %v3648_v26, %v3656_v63  ;;  %v8050_v3 = vld [vmem:[%s8909_s29 + $0x28] sm:$0xff]  }
0x106c   : > { %4178 = vmatpush1.bf16.msra.mxu1 %v7223_v33  ;;  %4221 = vmatpush1.bf16.msra.mxu0 %v7225_v15  ;;  %v7249_v33 = vcombine.low %v3665_v18, %v3673_v49  ;;  %v7232_v15 = vcombine.high %v3648_v26, %v3656_v63 }
0x106d   : > { %4179 = vmatprep.subr.bf16.mxu1 %v7208_v39  ;;  %4222 = vmatprep.subr.bf16.mxu0 %v7210_v34  ;;  %v7234_v39 = vcombine.high %v3649_v20, %v3657_v42  ;;  %v3632_v34 = vld [vmem:[%s8900_s11 + $0xb0] sm:$0xff] }
0x106e   : > { %v7215_v43 = vcombine.low %v3632_v34, %v3640_v48 }
0x1070   : > { %4180 = vmatpush1.bf16.msra.mxu1 %v7207_v6  ;;  %4223 = vmatpush1.bf16.msra.mxu0 %v7209_v14  ;;  %v7233_v6 = vcombine.low %v3649_v20, %v3657_v42  ;;  %v7216_v14 = vcombine.high %v3632_v34, %v3640_v48  ;;  %v8060_v20 = vld [vmem:[%s8909_s29 + $0x50] sm:$0xff]  }
0x1071   : > { %4181 = vmatprep.subr.bf16.mxu1 %v7192_v16  ;;  %4224 = vmatprep.subr.bf16.mxu0 %v7194_v55  ;;  %v7218_v16 = vcombine.high %v3633_v35, %v3641_v4  ;;  %v3616_v55 = vld [vmem:[%s8900_s11 + $0x30] sm:$0xff] }
0x1072   : > { %v8061_v42 = vld [vmem:[%s8909_s29 + $0xd0] sm:$0xff]  }
0x1074   : > { %4182 = vmatpush1.bf16.msra.mxu1 %v7191_v17  ;;  %4225 = vmatpush1.bf16.msra.mxu0 %v7193_v23  ;;  %v7217_v17 = vcombine.low %v3633_v35, %v3641_v4  ;;  %v7200_v23 = vcombine.high %v3616_v55, %v3624_v27 }
0x1075   : > { %4261 = vmatprep.subr.bf16.mxu1 %v7244_v54  ;;  %4304 = vmatprep.subr.bf16.mxu0 %v7246_v32  ;;  %v7202_v54 = vcombine.high %v3617_v62, %v3625_v52  ;;  %v7199_v32 = vcombine.low %v3616_v55, %v3624_v27 }
0x1077   : > { %7253 = vmatmul.mubr.msk.bf16.vlgmr.msra.gmra.mxu1 %vm1438_vm1, %v9590_v57  ;;  %7254 = vmatmul.mubr.msk.bf16.vlgmr.msra.gmra.mxu0 %vm1438_vm1, %v9590_v57 }
0x1078   : > { %4262 = vmatpush1.bf16.msra.mxu1 %v7243_v0  ;;  %4305 = vmatpush1.bf16.msra.mxu0 %v7245_v24  ;;  %v8044_v0 = vld [vmem:[%s8909_s29 + $0x70] sm:$0xff]  }
0x1079   : > { %4263 = vmatprep.subr.bf16.mxu1 %v7228_v40  ;;  %4306 = vmatprep.subr.bf16.mxu0 %v7230_v38  ;;  %v8045_v24 = vld [vmem:[%s8909_s29 + $0xf0] sm:$0xff]   ;;  %v8048_v38 = vld [vmem:[%s8909_s29 + $0x68] sm:$0xff]  }
0x107a   : > { %4285 = vmatprep.mubr.bf16.mxu1 %v8551_v28  ;;  %4328 = vmatprep.mubr.bf16.mxu0 %v8551_v28  ;;  %v8047_v40 = vld [vmem:[%s8909_s29 + $0xb0] sm:$0xff]  }
0x107c   : > { %4264 = vmatpush1.bf16.msra.mxu1 %v7227_v2  ;;  %4307 = vmatpush1.bf16.msra.mxu0 %v7229_v51  ;;  %v8053_v2 = vld [vmem:[%s8909_s29 + $0xe0] sm:$0xff]  }
0x107d   : > { %4265 = vmatprep.subr.bf16.mxu1 %v7212_v25  ;;  %4308 = vmatprep.subr.bf16.mxu0 %v7214_v53  ;;  %v8054_v51 = vld [vmem:[%s8909_s29 + $0x20] sm:$0xff]   ;;  %v8056_v53 = vld [vmem:[%s8909_s29 + $0x58] sm:$0xff]  }
0x107e   : > { %v8055_v25 = vld [vmem:[%s8909_s29 + $0xa0] sm:$0xff]  }
0x1080   : > { %4266 = vmatpush1.bf16.msra.mxu1 %v7211_v56  ;;  %4309 = vmatpush1.bf16.msra.mxu0 %v7213_v59  ;;  %v8059_v56 = vld [vmem:[%s8909_s29 + $0x98] sm:$0xff]   ;;  %v3681_v59 = vrot.slane %v9674_v12, %v8962_v46 }
0x1081   : > { %4267 = vmatprep.subr.bf16.mxu1 %v7196_v60  ;;  %4310 = vmatprep.subr.bf16.mxu0 %v7198_v7  ;;  %v3689_v7 = vrot.slane %v9674_v12, %v3688_v9 }
0x1084   : > { %4268 = vmatpush1.bf16.msra.mxu1 %v7195_v61  ;;  %4311 = vmatpush1.bf16.msra.mxu0 %v7197_v11  ;;  %v3685_v11 = vrot.slane %v9674_v12, %v9072_v37 }
0x1085   : > { %4347 = vmatprep.subr.bf16.mxu1 %v7248_v13  ;;  %4390 = vmatprep.subr.bf16.mxu0 %v7250_v10  ;;  %v3693_v10 = vrot.slane %v9674_v12, %v10887_v1  ;;  %v8071_v1 = vld [vmem:[%s8909_s29 + $0x80] sm:$0xff]  }
0x1087   : > { %7255 = vmatmul.mubr.msk.bf16.vlgmr.msra.gmra.mxu1 %vm1438_vm1, %v9590_v57  ;;  %7256 = vmatmul.mubr.msk.bf16.vlgmr.msra.gmra.mxu0 %vm1438_vm1, %v9590_v57 }
0x1088   : > { %4348 = vmatpush1.bf16.msra.mxu1 %v7247_v30  ;;  %4391 = vmatpush1.bf16.msra.mxu0 %v7249_v33 }
0x1089   : > { %4349 = vmatprep.subr.bf16.mxu1 %v7232_v15  ;;  %4392 = vmatprep.subr.bf16.mxu0 %v7234_v39 }
0x108a   : > { %4371 = vmatprep.mubr.bf16.mxu1 %v8551_v28  ;;  %4414 = vmatprep.mubr.bf16.mxu0 %v8551_v28  ;;  %v8040_v28 = vld [vmem:[%s8909_s29 + $0x78] sm:$0xff]  }
0x108c   : > { %4350 = vmatpush1.bf16.msra.mxu1 %v7231_v44  ;;  %4393 = vmatpush1.bf16.msra.mxu0 %v7233_v6 }
0x108d   : > { %4351 = vmatprep.subr.bf16.mxu1 %v7216_v14  ;;  %4394 = vmatprep.subr.bf16.mxu0 %v7218_v16 }
0x1090   : > { %4352 = vmatpush1.bf16.msra.mxu1 %v7215_v43  ;;  %4395 = vmatpush1.bf16.msra.mxu0 %v7217_v17 }
0x1091   : > { %4353 = vmatprep.subr.bf16.mxu1 %v7200_v23  ;;  %4396 = vmatprep.subr.bf16.mxu0 %v7202_v54 }
0x1094   : > { %4354 = vmatpush1.bf16.msra.mxu1 %v7199_v32  ;;  %4397 = vmatpush1.bf16.msra.mxu0 %v7201_v45 }
0x1095   : > { %7461 = vmatprep.subr.bf16.mxu1 %v8040_v28  ;;  %7483 = vmatprep.subr.bf16.mxu0 %v8041_v22 }
0x1097   : > { %7257 = vmatmul.mubr.msk.bf16.vlgmr.msra.gmra.mxu1 %vm1438_vm1, %v9590_v57  ;;  %7258 = vmatmul.mubr.msk.bf16.vlgmr.msra.gmra.mxu0 %vm1438_vm1, %v9590_v57  ;;  %v8046_v57 = vld [vmem:[%s8909_s29 + $0x30] sm:$0xff]  }
0x1098   : > { %7462 = vmatpush3.bf16.msra.mxu1 %v8042_v19  ;;  %7484 = vmatpush3.bf16.msra.mxu0 %v8043_v36 }
0x1099   : > { %7463 = vmatprep.subr.bf16.mxu1 %v8044_v0  ;;  %7485 = vmatprep.subr.bf16.mxu0 %v8045_v24 }
0x109c   : > { %7464 = vmatpush3.bf16.msra.mxu1 %v8046_v57  ;;  %7486 = vmatpush3.bf16.msra.mxu0 %v8047_v40 }
0x109d   : > { %7465 = vmatprep.subr.bf16.mxu1 %v8048_v38  ;;  %7487 = vmatprep.subr.bf16.mxu0 %v8049_v47 }
0x10a0   : > { %7466 = vmatpush3.bf16.msra.mxu1 %v8050_v3  ;;  %7488 = vmatpush3.bf16.msra.mxu0 %v8051_v8 }
0x10a1   : > { %7467 = vmatprep.subr.bf16.mxu1 %v8052_v50  ;;  %7489 = vmatprep.subr.bf16.mxu0 %v8053_v2 }
0x10a4   : > { %7468 = vmatpush3.bf16.msra.mxu1 %v8054_v51  ;;  %7490 = vmatpush3.bf16.msra.mxu0 %v8055_v25  ;;  %v8062_v25 = vld [vmem:[%s8909_s29 + $0x10] sm:$0xff]  }
0x10a5   : > { %7469 = vmatprep.subr.bf16.mxu1 %v8056_v53  ;;  %7491 = vmatprep.subr.bf16.mxu0 %v8057_v21  ;;  %v8063_v53 = vld [vmem:[%s8909_s29 + $0x90] sm:$0xff]  }
0x10a8   : > { %7470 = vmatpush3.bf16.msra.mxu1 %v8058_v58  ;;  %7492 = vmatpush3.bf16.msra.mxu0 %v8059_v56  ;;  %v10884_v56 = vsub.s32 4, %v8956_v41 }
0x10a9   : > { %7471 = vmatprep.subr.bf16.mxu1 %v8060_v20  ;;  %7493 = vmatprep.subr.bf16.mxu0 %v8061_v42  ;;  %v10886_v42 = vsub.s32 5, %v8956_v41 }
0x10ac   : > { %7472 = vmatpush3.bf16.msra.mxu1 %v8062_v25  ;;  %7494 = vmatpush3.bf16.msra.mxu0 %v8063_v53 }
0x1127   : > { %v4115_v60 = vpop.f32.mrf.mxu1  ;;  %v4158_v29 = vpop.f32.mrf.mxu0 }
0x1128   : > { %v9684_v18 = vadd.f32 %v4115_v60, %v3681_v59  ;;  %v9686_v61 = vadd.f32 %v4158_v29, %v3689_v7 }
0x1129   : > { %v4117_v49 = vpop.f32.mrf.mxu1  ;;  %v4160_v13 = vpop.f32.mrf.mxu0 }
0x112a   : > { %v9694_v26 = vmul.f32 0.70710677, %v9684_v18  ;;  %v9699_v30 = vmul.f32 0.70710677, %v9686_v61  ;;  %v9701_v33 = vadd.f32 %v4117_v49, %v3685_v11  ;;  %v9703_v39 = vadd.f32 %v4160_v13, %v3693_v10 }
0x112b   : > { %v4119_v63 = vpop.f32.mrf.mxu1  ;;  %v4162_v15 = vpop.f32.mrf.mxu0  ;;  %v9774_v49 = vrot.slane %v9674_v12, %v10884_v56  ;;  %v8069_v56 = vld [vmem:[%s8909_s29 + $0xc0] sm:$0xff]  }
0x112c   : > { %v9705_v34 = vadd.f32 %v4119_v63, %v3681_v59  ;;  %v9708_v48 = vand.u32 2147483647, %v9694_v26  ;;  %v9710_v35 = vadd.f32 %v4162_v15, %v3689_v7  ;;  %v9713_v4 = vand.u32 2147483647, %v9699_v30 }
0x112d   : > { %v9716_v44 = vmul.f32 0.70710677, %v9701_v33  ;;  %v4121_v6 = vpop.f32.mrf.mxu1  ;;  %v9719_v14 = vmul.f32 0.70710677, %v9703_v39  ;;  %v4164_v23 = vpop.f32.mrf.mxu0  ;;  %v10883_v59 = vsub.s32 6, %v8956_v41  ;;  %vm5129_vm12 = vcmp.lt.f32.partialorder %v9694_v26, 0.0 }
0x112e   : > { %v9722_v16 = vmul.f32 0.70710677, %v9705_v34  ;;  %v4521_v55 = vmul.f32 0.3275911, %v9708_v48  ;;  %v9726_v27 = vmul.f32 0.70710677, %v9710_v35  ;;  %v9728_v62 = vadd.f32 %v4121_v6, %v3685_v11 }
0x112f   : > { %v4523_v52 = vmul.f32 0.3275911, %v9713_v4  ;;  %v9732_v43 = vand.u32 2147483647, %v9716_v44  ;;  %v9735_v17 = vand.u32 2147483647, %v9719_v14  ;;  %v9747_v36 = vadd.f32 %v4164_v23, %v3693_v10 }
0x1130   : > { %v9738_v54 = vand.u32 2147483647, %v9722_v16  ;;  %v4553_v32 = vadd.f32 1.0, %v4521_v55  ;;  %v9741_v45 = vand.u32 2147483647, %v9726_v27  ;;  %v9779_v13 = vrot.slane %v9674_v12, %v10883_v59  ;;  %v8068_v59 = vld [vmem:[%s8909_s29 + $0x40] sm:$0xff]  }
0x1131   : > { %v9744_v28 = vmul.f32 0.70710677, %v9728_v62  ;;  %v4555_v22 = vadd.f32 1.0, %v4523_v52  ;;  %v4522_v19 = vmul.f32 0.3275911, %v9732_v43  ;;  %v4937_v6 = vsub.f32 0.0, %v9708_v48 }
0x1132   : > { %v4524_v0 = vmul.f32 0.3275911, %v9735_v17  ;;  %v4537_v24 = vmul.f32 0.3275911, %v9738_v54  ;;  %8296 = vrcp.f32 %v4553_v32  ;;  %v4539_v57 = vmul.f32 0.3275911, %v9741_v45 }
0x1133   : > { %v9753_v40 = vand.u32 2147483647, %v9744_v28  ;;  %8298 = vrcp.f32 %v4555_v22  ;;  %v4554_v38 = vadd.f32 1.0, %v4522_v19  ;;  %v9756_v47 = vmul.f32 0.70710677, %v9747_v36  ;;  %v9799_v19 = vld [vmem:[%s8903_s3 + $0x8] sm:$0xff] }
0x1134   : > { %v4556_v3 = vadd.f32 1.0, %v4524_v0  ;;  %v4569_v8 = vadd.f32 1.0, %v4537_v24  ;;  %v4571_v50 = vadd.f32 1.0, %v4539_v57  ;;  %v10885_v32 = vsub.s32 7, %v8956_v41  ;;  %11067 = vst [vmem:[#allocation61_spill] sm:$0xff] %v9799_v19  ;;  %v8064_v0 = vld [vmem:[%s8909_s29 + $0x48] sm:$0xff]  }
0x1135   : > { %v4538_v2 = vmul.f32 0.3275911, %v9753_v40  ;;  %8300 = vrcp.f32 %v4554_v38  ;;  %v9760_v51 = vand.u32 2147483647, %v9756_v47  ;;  %v8065_v24 = vld [vmem:[%s8909_s29 + $0xc8] sm:$0xff]   ;;  %v4969_v25 = vmul.f32 %v4937_v6, %v9708_v48  ;;  %7473 = vmatprep.subr.bf16.mxu1 %v8064_v0 }
0x1136   : > { %8302 = vrcp.f32 %v4556_v3  ;;  %7495 = vmatprep.subr.bf16.mxu0 %v8065_v24  ;;  %v9827_v48 = vrot.slane %v9674_v12, %v10885_v32  ;;  %v9835_v0 = vrot.slane %v9799_v19, %v8962_v46  ;;  %v9840_v24 = vrot.slane %v9799_v19, %v3688_v9 }
0x1137   : > { %8304 = vrcp.f32 %v4569_v8  ;;  %v4570_v21 = vadd.f32 1.0, %v4538_v2  ;;  %v4540_v58 = vmul.f32 0.3275911, %v9760_v51  ;;  %v4201_v11 = vpop.f32.mrf.mxu1  ;;  %v4244_v10 = vpop.f32.mrf.mxu0  ;;  %v4939_v8 = vsub.f32 0.0, %v9713_v4  ;;  %v8066_v2 = vld [vmem:[%s8909_s29 + $0x8] sm:$0xff]  }
0x1138   : > { %8306 = vrcp.f32 %v4571_v50  ;;  %v9788_v55 = vadd.f32 %v4201_v11, %v9774_v49  ;;  %v9793_v23 = vadd.f32 %v4244_v10, %v9779_v13  ;;  %v9809_v50 = vrot.slane %v9674_v12, %v10886_v42  ;;  %7474 = vmatpush3.bf16.msra.mxu1 %v8066_v2  ;;  %11070 = vst [vmem:[#allocation64_spill] sm:$0xff] %v9840_v24  ;;  %v8070_v42 = vld [vmem:[%s8909_s29] sm:$0xff]  }
0x1139   : > { %8308 = vrcp.f32 %v4570_v21  ;;  %v4572_v7 = vadd.f32 1.0, %v4540_v58  ;;  %v4938_v21 = vsub.f32 0.0, %v9732_v43  ;;  %v4940_v46 = vsub.f32 0.0, %v9735_v17  ;;  %7475 = vmatprep.subr.bf16.mxu1 %v8068_v59 }
0x113a   : > { %v9816_v58 = vmul.f32 0.70710677, %v9788_v55  ;;  %v5001_v5 = vmul.f32 1.442695, %v4969_v25  ;;  %v4971_v9 = vmul.f32 %v4939_v8, %v9713_v4  ;;  %v9863_v25 = vmul.f32 0.5, %v9701_v33  ;;  %v8073_v33 = vld [vmem:[%s8909_s29 + $0x1f8] sm:$0xff]  }
0x113b   : > { %8310 = vrcp.f32 %v4572_v7  ;;  %v8067_v7 = vld [vmem:[%s8909_s29 + $0x88] sm:$0xff]   ;;  %v9868_v8 = vrot.slane %v9799_v19, %v9072_v37  ;;  %v4972_v37 = vmul.f32 %v4940_v46, %v9735_v17  ;;  %vm5131_vm13 = vcmp.lt.f32.partialorder %v9699_v30, 0.0 }
0x113c   : > { %11068 = vst [vmem:[#allocation62_spill] sm:$0xff] %v9816_v58  ;;  %7496 = vmatpush3.bf16.msra.mxu0 %v8067_v7  ;;  %v9856_v31 = vand.u32 2147483647, %v9816_v58  ;;  %7476 = vmatpush3.bf16.msra.mxu1 %v8070_v42  ;;  %11072 = vst [vmem:[#allocation66_spill] sm:$0xff] %v9863_v25  ;;  %8312 = vpow2.f32 %v5001_v5  ;;  %vm5130_vm14 = vcmp.lt.f32.partialorder %v9716_v44, 0.0  ;;  %vm5132_vm15 = vcmp.lt.f32.partialorder %v9719_v14, 0.0 }
0x113d   : > { %7497 = vmatprep.subr.bf16.mxu0 %v8069_v56  ;;  %v8072_v56 = vld [vmem:[%s8909_s29 + $0x178] sm:$0xff]   ;;  %vm5145_vm0 = vcmp.lt.f32.partialorder %v9722_v16, 0.0  ;;  %vm5147_vm2 = vcmp.lt.f32.partialorder %v9726_v27, 0.0  ;;  %vm5146_vm3 = vcmp.lt.f32.partialorder %v9744_v28, 0.0  ;;  %vm5148_vm4 = vcmp.lt.f32.partialorder %v9756_v47, 0.0 }
0x113e   : > { %7505 = vmatprep.subr.bf16.mxu1 %v8072_v56  ;;  %v5007_v56 = vmul.f32 1.442695, %v4972_v37 }
0x113f   : > { %v9767_v60 = vpop.eup %8296 }
0x1140   : > { %v9769_v29 = vpop.eup %8298  ;;  %v4649_v63 = vmul.f32 1.0614054, %v9767_v60  ;;  %7498 = vmatpush3.bf16.msra.mxu0 %v8071_v1  ;;  %v4525_v1 = vmul.f32 0.3275911, %v9856_v31 }
0x1141   : > { %v4651_v20 = vmul.f32 1.0614054, %v9769_v29  ;;  %7527 = vmatprep.subr.bf16.mxu0 %v8073_v33  ;;  %v4955_v33 = vsub.f32 0.0, %v9741_v45 }
0x1142   : > { %v9784_v15 = vpop.eup %8300  ;;  %v4681_v38 = vadd.f32 -1.4531521, %v4649_v63  ;;  %v9822_v63 = vmul.f32 0.70710677, %v9793_v23 }
0x1143   : > { %v9790_v52 = vpop.eup %8302  ;;  %v4683_v3 = vadd.f32 -1.4531521, %v4651_v20  ;;  %v4650_v53 = vmul.f32 1.0614054, %v9784_v15  ;;  %v9830_v20 = vmul.f32 0.5, %v9684_v18  ;;  %v9848_v18 = vmul.f32 0.5, %v9686_v61 }
0x1144   : > { %v9796_v22 = vpop.eup %8304  ;;  %v4652_v11 = vmul.f32 1.0614054, %v9790_v52  ;;  %11069 = vst [vmem:[#allocation63_spill] sm:$0xff] %v9822_v63  ;;  %v4713_v2 = vmul.f32 %v9767_v60, %v4681_v38  ;;  %v4970_v61 = vmul.f32 %v4938_v21, %v9732_v43  ;;  %v11074_v21 = vsub.s32 3, %v8956_v41 }
0x1145   : > { %v9803_v57 = vpop.eup %8306  ;;  %v4665_v10 = vmul.f32 1.0614054, %v9796_v22  ;;  %11071 = vst [vmem:[#allocation65_spill] sm:$0xff] %v9848_v18  ;;  %v4715_v32 = vmul.f32 %v9769_v29, %v4683_v3  ;;  %v4682_v7 = vadd.f32 -1.4531521, %v4650_v53  ;;  %v9872_v53 = vmul.f32 0.5, %v9703_v39 }
0x1146   : > { %v4667_v6 = vmul.f32 1.0614054, %v9803_v57  ;;  %v9844_v12 = vpop.eup %8308  ;;  %v4684_v38 = vadd.f32 -1.4531521, %v4652_v11  ;;  %v9860_v3 = vand.u32 2147483647, %v9822_v63  ;;  %v9877_v42 = vrot.slane %v9799_v19, %v11074_v21 }
0x1147   : > { %v4697_v24 = vadd.f32 -1.4531521, %v4665_v10  ;;  %v4666_v4 = vmul.f32 1.0614054, %v9844_v12  ;;  %v4745_v59 = vadd.f32 1.4214138, %v4713_v2  ;;  %v4987_v25 = vmul.f32 %v4955_v33, %v9741_v45 }
0x1148   : > { %v4699_v18 = vadd.f32 -1.4531521, %v4667_v6  ;;  %v4747_v43 = vadd.f32 1.4214138, %v4715_v32  ;;  %11073 = vst [vmem:[#allocation67_spill] sm:$0xff] %v9872_v53  ;;  %11075 = vst [vmem:[#allocation68_spill] sm:$0xff] %v9877_v42  ;;  %v9880_v11 = vpop.eup %8310  ;;  %v4714_v32 = vmul.f32 %v9784_v15, %v4682_v7  ;;  %v4716_v39 = vmul.f32 %v9790_v52, %v4684_v38  ;;  %v4203_v38 = vpop.f32.mrf.mxu1 }
0x1149   : > { %v5005_v10 = vmul.f32 1.442695, %v4971_v9  ;;  %v5003_v6 = vmul.f32 1.442695, %v4970_v61  ;;  %v4527_v2 = vmul.f32 0.3275911, %v9860_v3  ;;  %v4729_v19 = vmul.f32 %v9796_v22, %v4697_v24 }
0x114a   : > { %v9888_v21 = vmul.f32 0.5, %v9705_v34  ;;  %v4731_v5 = vmul.f32 %v9803_v57, %v4699_v18  ;;  %v4698_v9 = vadd.f32 -1.4531521, %v4666_v4  ;;  %v4777_v17 = vmul.f32 %v9767_v60, %v4745_v59  ;;  %v4246_v18 = vpop.f32.mrf.mxu0 }
0x114b   : > { %v4779_v46 = vmul.f32 %v9769_v29, %v4747_v43  ;;  %v4953_v7 = vsub.f32 0.0, %v9738_v54  ;;  %v4668_v61 = vmul.f32 1.0614054, %v9880_v11  ;;  %8314 = vpow2.f32 %v5005_v10 }
0x114c   : > { %v4557_v34 = vadd.f32 1.0, %v4525_v1  ;;  %v4746_v41 = vadd.f32 1.4214138, %v4714_v32  ;;  %8316 = vpow2.f32 %v5003_v6  ;;  %v4748_v24 = vadd.f32 1.4214138, %v4716_v39 }
0x114d   : > { %v4559_v63 = vadd.f32 1.0, %v4527_v2  ;;  %v4761_v4 = vadd.f32 1.4214138, %v4729_v19  ;;  %v4763_v58 = vadd.f32 1.4214138, %v4731_v5  ;;  %v4730_v59 = vmul.f32 %v9844_v12, %v4698_v9  ;;  %v4205_v2 = vpop.f32.mrf.mxu1 }
0x114e   : > { %v9899_v43 = vadd.f32 %v4203_v38, %v9809_v50  ;;  %v4809_v42 = vadd.f32 -0.28449672, %v4777_v17  ;;  %v4811_v53 = vadd.f32 -0.28449672, %v4779_v46  ;;  %v4985_v10 = vmul.f32 %v4953_v7, %v9738_v54 }
0x114f   : > { %v4700_v37 = vadd.f32 -1.4531521, %v4668_v61  ;;  %v4954_v1 = vsub.f32 0.0, %v9753_v40  ;;  %8318 = vrcp.f32 %v4557_v34  ;;  %v9905_v32 = vadd.f32 %v4246_v18, %v9827_v48 }
0x1150   : > { %v4778_v19 = vmul.f32 %v9784_v15, %v4746_v41  ;;  %v4780_v6 = vmul.f32 %v9790_v52, %v4748_v24  ;;  %v4956_v39 = vsub.f32 0.0, %v9760_v51  ;;  %8320 = vrcp.f32 %v4559_v63 }
0x1151   : > { %v4793_v5 = vmul.f32 %v9796_v22, %v4761_v4  ;;  %v4795_v54 = vmul.f32 %v9803_v57, %v4763_v58  ;;  %v4762_v9 = vadd.f32 1.4214138, %v4730_v59  ;;  %v9913_v45 = vmul.f32 0.70710677, %v9899_v43  ;;  %v8313_v58 = vpop.eup %8312 }
0x1152   : > { %v4841_v17 = vmul.f32 %v9767_v60, %v4809_v42  ;;  %v4843_v46 = vmul.f32 %v9769_v29, %v4811_v53  ;;  %v5033_v7 = vmul.f32 1.442695, %v4985_v10  ;;  %v4732_v41 = vmul.f32 %v9880_v11, %v4700_v37 }
0x1153   : > { %v5037_v61 = vmul.f32 1.442695, %v4987_v25  ;;  %v4986_v38 = vmul.f32 %v4954_v1, %v9753_v40  ;;  %v9920_v63 = vmul.f32 0.70710677, %v9905_v32  ;;  %v9923_v33 = vadd.f32 %v4205_v2, %v9774_v49 }
0x1154   : > { %v4810_v34 = vadd.f32 -0.28449672, %v4778_v19  ;;  %v4812_v24 = vadd.f32 -0.28449672, %v4780_v6  ;;  %8322 = vpow2.f32 %v5007_v56  ;;  %v4988_v42 = vmul.f32 %v4956_v39, %v9760_v51 }
0x1155   : > { %11076 = vst [vmem:[#allocation69_spill] sm:$0xff] %v9920_v63  ;;  %v4825_v18 = vadd.f32 -0.28449672, %v4793_v5  ;;  %v4827_v53 = vadd.f32 -0.28449672, %v4795_v54  ;;  %v4794_v4 = vmul.f32 %v9844_v12, %v4762_v9  ;;  %8324 = vpow2.f32 %v5033_v7 }
0x1156   : > { %v9928_v25 = vand.u32 2147483647, %v9913_v45  ;;  %v4873_v40 = vadd.f32 0.2548296, %v4841_v17  ;;  %v4875_v59 = vadd.f32 0.2548296, %v4843_v46  ;;  %8326 = vpow2.f32 %v5037_v61  ;;  %v4207_v46 = vpop.f32.mrf.mxu1 }
0x1157   : > { %v4764_v10 = vadd.f32 1.4214138, %v4732_v41  ;;  %v5035_v49 = vmul.f32 1.442695, %v4986_v38  ;;  %v9931_v37 = vand.u32 2147483647, %v9920_v63  ;;  %v4842_v1 = vmul.f32 %v9784_v15, %v4810_v34 }
0x1158   : > { %v9934_v56 = vmul.f32 0.70710677, %v9923_v33  ;;  %v8315_v51 = vpop.eup %8314  ;;  %v4844_v19 = vmul.f32 %v9790_v52, %v4812_v24  ;;  %v9939_v6 = vmul.f32 0.5, %v9710_v35  ;;  %v5039_v39 = vmul.f32 1.442695, %v4988_v42  ;;  %v4248_v42 = vpop.f32.mrf.mxu0 }
0x1159   : > { %v8317_v2 = vpop.eup %8316  ;;  %v4857_v5 = vmul.f32 %v9796_v22, %v4825_v18  ;;  %v4859_v54 = vmul.f32 %v9803_v57, %v4827_v53  ;;  %v4826_v9 = vadd.f32 -0.28449672, %v4794_v4  ;;  %v4526_v17 = vmul.f32 0.3275911, %v9928_v25  ;;  %v4287_v26 = vpop.f32.mrf.mxu1 }
0x115a   : > { %11077 = vst [vmem:[#allocation70_spill] sm:$0xff] %v9934_v56  ;;  %v4905_v7 = vmul.f32 %v9767_v60, %v4873_v40  ;;  %v4907_v41 = vmul.f32 %v9769_v29, %v4875_v59  ;;  %v9947_v61 = vmul.f32 0.5, %v9728_v62  ;;  %v4796_v35 = vmul.f32 %v9880_v11, %v4764_v10 }
0x115b   : > { %8328 = vpow2.f32 %v5035_v49  ;;  %v9951_v38 = vmul.f32 0.5, %v9747_v36  ;;  %v4528_v34 = vmul.f32 0.3275911, %v9931_v37  ;;  %v9955_v24 = vand.u32 2147483647, %v9934_v56 }
0x115c   : > { %v9957_v18 = vpop.eup %8318  ;;  %v4874_v60 = vadd.f32 0.2548296, %v4842_v1  ;;  %v4876_v53 = vadd.f32 0.2548296, %v4844_v19  ;;  %8330 = vpow2.f32 %v5039_v39  ;;  %v9960_v62 = vadd.f32 %v4207_v46, %v9809_v50 }
0x115d   : > { %v9962_v29 = vpop.eup %8320  ;;  %v4889_v4 = vadd.f32 0.2548296, %v4857_v5  ;;  %v4891_v40 = vadd.f32 0.2548296, %v4859_v54  ;;  %v4858_v36 = vmul.f32 %v9844_v12, %v4826_v9  ;;  %v4558_v59 = vadd.f32 1.0, %v4526_v17  ;;  %v4250_v9 = vpop.f32.mrf.mxu0 }
0x115e   : > { %v9965_v10 = vmul.f32 %v8313_v58, %v4905_v7  ;;  %v9967_v49 = vmul.f32 %v8315_v51, %v4907_v41  ;;  %v4828_v56 = vadd.f32 -0.28449672, %v4796_v35  ;;  %v9970_v63 = vadd.f32 %v4248_v42, %v9779_v13 }
0x115f   : > { %v4653_v1 = vmul.f32 1.0614054, %v9957_v18  ;;  %v4941_v50 = vsub.f32 0.0, %v9856_v31  ;;  %v4560_v19 = vadd.f32 1.0, %v4528_v34  ;;  %v4541_v39 = vmul.f32 0.3275911, %v9955_v24 }
0x1160   : > { %v4906_v5 = vmul.f32 %v9784_v15, %v4874_v60  ;;  %v4908_v54 = vmul.f32 %v9790_v52, %v4876_v53  ;;  %v4655_v58 = vmul.f32 1.0614054, %v9962_v29  ;;  %v9979_v51 = vmul.f32 0.70710677, %v9960_v62 }
0x1161   : > { %v8323_v17 = vpop.eup %8322  ;;  %v4921_v13 = vmul.f32 %v9796_v22, %v4889_v4  ;;  %v4923_v46 = vmul.f32 %v9803_v57, %v4891_v40  ;;  %v4890_v7 = vadd.f32 0.2548296, %v4858_v36  ;;  %8332 = vrcp.f32 %v4558_v59 }
0x1162   : > { %v5097_v41 = vsub.f32 1.0, %v9965_v10  ;;  %v5099_v15 = vsub.f32 1.0, %v9967_v49  ;;  %v4860_v52 = vmul.f32 %v9880_v11, %v4828_v56  ;;  %v9989_v35 = vmul.f32 0.70710677, %v9970_v63  ;;  %v8325_v34 = vpop.eup %8324 }
0x1163   : > { %v4685_v42 = vadd.f32 -1.4531521, %v4653_v1  ;;  %8334 = vrcp.f32 %v4560_v19  ;;  %v4573_v22 = vadd.f32 1.0, %v4541_v39  ;;  %v9992_v57 = vadd.f32 %v4250_v9, %v9827_v48  ;;  %v8327_v60 = vpop.eup %8326 }
0x1164   : > { %v5066_v53 = vmul.f32 %v8317_v2, %v4906_v5  ;;  %v5068_v4 = vmul.f32 %v8323_v17, %v4908_v54  ;;  %v4687_v40 = vadd.f32 -1.4531521, %v4655_v58  ;;  %v9995_v36 = vand.u32 2147483647, %v9979_v51 }
0x1165   : > { %v5081_v59 = vmul.f32 %v8325_v34, %v4921_v13  ;;  %v5083_v10 = vmul.f32 %v8327_v60, %v4923_v46  ;;  %v4922_v56 = vmul.f32 %v9844_v12, %v4890_v7  ;;  %v9999_v49 = vmul.f32 0.5, %v9788_v55 }
0x1166   : > { %v5161_v1 = vsub.f32 0.0, %v5097_v41  ;;  %v4892_v19 = vadd.f32 0.2548296, %v4860_v52  ;;  %v4973_v39 = vmul.f32 %v4941_v50, %v9856_v31  ;;  %v10003_v48 = vand.u32 2147483647, %v9989_v35 }
0x1167   : > { %v5163_v2 = vsub.f32 0.0, %v5099_v15  ;;  %v4717_v5 = vmul.f32 %v9957_v18, %v4685_v42  ;;  %8336 = vrcp.f32 %v4573_v22  ;;  %v10009_v12 = vmul.f32 0.70710677, %v9992_v57 }
0x1168   : > { %v8329_v55 = vpop.eup %8328  ;;  %v5098_v54 = vsub.f32 1.0, %v5066_v53  ;;  %v5100_v58 = vsub.f32 1.0, %v5068_v4  ;;  %v4719_v31 = vmul.f32 %v9962_v29, %v4687_v40  ;;  %v4542_v50 = vmul.f32 0.3275911, %v9995_v36 }
0x1169   : > { %11078 = vst [vmem:[#allocation71_spill] sm:$0xff] %v10009_v12  ;;  %v8331_v9 = vpop.eup %8330  ;;  %v5113_v17 = vsub.f32 1.0, %v5081_v59  ;;  %v5115_v13 = vsub.f32 1.0, %v5083_v10  ;;  %v5082_v46 = vmul.f32 %v8329_v55, %v4922_v56  ;;  %v10016_v7 = vmul.f32 0.5, %v9793_v23 }
0x116a   : > { %v4924_v52 = vmul.f32 %v9880_v11, %v4892_v19  ;;  %v5009_v34 = vmul.f32 1.442695, %v4973_v39  ;;  %v4943_v42 = vsub.f32 0.0, %v9860_v3  ;;  %v4543_v22 = vmul.f32 0.3275911, %v10003_v48 }
0x116b   : > { %v5193_v60 = vsel %vm5129_vm12, %v5161_v1, %v5097_v41  ;;  %v5195_v53 = vsel %vm5131_vm13, %v5163_v2, %v5099_v15  ;;  %v4749_v4 = vadd.f32 1.4214138, %v4717_v5  ;;  %v10026_v40 = vand.u32 2147483647, %v10009_v12 }
0x116c   : > { %v5162_v59 = vsub.f32 0.0, %v5098_v54  ;;  %v5164_v23 = vsub.f32 0.0, %v5100_v58  ;;  %v4751_v11 = vadd.f32 1.4214138, %v4719_v31  ;;  %v4574_v10 = vadd.f32 1.0, %v4542_v50 }
0x116d   : > { %v5177_v56 = vsub.f32 0.0, %v5113_v17  ;;  %v5179_v19 = vsub.f32 0.0, %v5115_v13  ;;  %v5114_v39 = vsub.f32 1.0, %v5082_v46  ;;  %v10030_v55 = vmul.f32 0.5, %v9899_v43 }
0x116e   : > { %v10032_v41 = vpop.eup %8332  ;;  %v5084_v30 = vmul.f32 %v8331_v9, %v4924_v52  ;;  %8338 = vpow2.f32 %v5009_v34  ;;  %v4975_v15 = vmul.f32 %v4943_v42, %v9860_v3  ;;  %v4575_v1 = vadd.f32 1.0, %v4543_v22  ;;  %v4289_v22 = vpop.f32.mrf.mxu1 }
0x116f   : > { %v5225_v2 = vadd.f32 1.0, %v5193_v60  ;;  %v5227_v5 = vadd.f32 1.0, %v5195_v53  ;;  %v4781_v12 = vmul.f32 %v9957_v18, %v4749_v4  ;;  %v4544_v31 = vmul.f32 0.3275911, %v10026_v40 }
0x1170   : > { %v10037_v50 = vpop.eup %8334  ;;  %v5194_v43 = vsel %vm5130_vm14, %v5162_v59, %v5098_v54  ;;  %v5196_v46 = vsel %vm5132_vm15, %v5164_v23, %v5100_v58  ;;  %v4783_v9 = vmul.f32 %v9962_v29, %v4751_v11  ;;  %8340 = vrcp.f32 %v4574_v10 }
0x1171   : > { %v5209_v3 = vsel %vm5145_vm0, %v5177_v56, %v5113_v17  ;;  %v5211_v52 = vsel %vm5147_vm2, %v5179_v19, %v5115_v13  ;;  %v5178_v34 = vsub.f32 0.0, %v5114_v39  ;;  %v4654_v42 = vmul.f32 1.0614054, %v10032_v41 }
0x1172   : > { %v5116_v44 = vsub.f32 1.0, %v5084_v30  ;;  %v5013_v54 = vmul.f32 1.442695, %v4975_v15  ;;  %8342 = vrcp.f32 %v4575_v1  ;;  %v10051_v14 = vadd.f32 %v4287_v26, %v9835_v0  ;;  %v4330_v26 = vpop.f32.mrf.mxu0 }
0x1173   : > { %v10054_v58 = vmul.f32 %v5225_v2, %v9830_v20  ;;  %v4813_v16 = vadd.f32 -0.28449672, %v4781_v12  ;;  %v4656_v17 = vmul.f32 1.0614054, %v10037_v50  ;;  %v4576_v27 = vadd.f32 1.0, %v4544_v31  ;;  %v11082_v2 = vld [vmem:[#allocation65_spill] sm:$0xff] }
0x1174   : > { %11079 = vst [vmem:[#allocation72_spill] sm:$0xff] %v10051_v14  ;;  %v10057_v13 = vpop.eup %8336  ;;  %v5226_v60 = vadd.f32 1.0, %v5194_v43  ;;  %v5241_v53 = vadd.f32 1.0, %v5209_v3  ;;  %v4815_v4 = vadd.f32 -0.28449672, %v4783_v9  ;;  %v10060_v59 = vadd.f32 %v4289_v22, %v9868_v8  ;;  %v11087_v22 = vld [vmem:[#allocation64_spill] sm:$0xff] }
0x1175   : > { %11080 = vst [vmem:[#allocation73_spill] sm:$0xff] %v10054_v58  ;;  %v5228_v23 = vadd.f32 1.0, %v5196_v46  ;;  %v5243_v11 = vadd.f32 1.0, %v5211_v52  ;;  %v5210_v10 = vsel %vm5146_vm3, %v5178_v34, %v5114_v39  ;;  %v4686_v56 = vadd.f32 -1.4531521, %v4654_v42  ;;  %v11085_v46 = vld [vmem:[#allocation66_spill] sm:$0xff] }
0x1176   : > { %v5180_v20 = vsub.f32 0.0, %v5116_v44  ;;  %8344 = vpow2.f32 %v5013_v54  ;;  %v4942_v12 = vsub.f32 0.0, %v9928_v25  ;;  %v10066_v19 = vmul.f32 0.70710677, %v10051_v14 }
0x1177   : > { %v4845_v30 = vmul.f32 %v9957_v18, %v4813_v16  ;;  %v4688_v15 = vadd.f32 -1.4531521, %v4656_v17  ;;  %v4669_v1 = vmul.f32 1.0614054, %v10057_v13  ;;  %8346 = vrcp.f32 %v4576_v27  ;;  %v4332_v16 = vpop.f32.mrf.mxu0  ;;  %v10096_v17 = vpop.f32.mrf.mxu1 }
0x1178   : > { %11081 = vst [vmem:[#allocation74_spill] sm:$0xff] %v10066_v19  ;;  %v10071_v31 = vmul.f32 %v5227_v5, %v11082_v2  ;;  %v10074_v28 = vmul.f32 %v5241_v53, %v9888_v21  ;;  %v4847_v39 = vmul.f32 %v9962_v29, %v4815_v4  ;;  %v10078_v43 = vmul.f32 0.70710677, %v10060_v59 }
0x1179   : > { %v10081_v9 = vmul.f32 %v5226_v60, %v11085_v46  ;;  %v10084_v3 = vmul.f32 %v5243_v11, %v9939_v6  ;;  %v5242_v52 = vadd.f32 1.0, %v5210_v10  ;;  %v4718_v34 = vmul.f32 %v10032_v41, %v4686_v56  ;;  %v11089_v6 = vld [vmem:[#allocation67_spill] sm:$0xff]  ;;  %v4293_v46 = vpop.f32.mrf.mxu1 }
0x117a   : > { %11083 = vst [vmem:[#allocation65_spill] sm:$0xff] %v10071_v31  ;;  %11084 = vst [vmem:[#allocation75_spill] sm:$0xff] %v10078_v43  ;;  %v5212_v5 = vsel %vm5148_vm4, %v5180_v20, %v5116_v44  ;;  %v4974_v21 = vmul.f32 %v4942_v12, %v9928_v25  ;;  %v10091_v42 = vand.u32 2147483647, %v10066_v19  ;;  %v10094_v54 = vadd.f32 %v4330_v26, %v11087_v22 }
0x117b   : > { %11086 = vst [vmem:[#allocation66_spill] sm:$0xff] %v10084_v3  ;;  %v8339_v27 = vpop.eup %8338  ;;  %v10099_v60 = vmul.f32 %v5228_v23, %v11089_v6  ;;  %v4877_v53 = vadd.f32 0.2548296, %v4845_v30  ;;  %v4720_v4 = vmul.f32 %v10037_v50, %v4688_v15  ;;  %v4701_v47 = vadd.f32 -1.4531521, %v4669_v1 }
0x117c   : > { %11088 = vst [vmem:[#allocation64_spill] sm:$0xff] %v10094_v54  ;;  %v4879_v44 = vadd.f32 0.2548296, %v4847_v39  ;;  %v4944_v11 = vsub.f32 0.0, %v9931_v37  ;;  %v10106_v10 = vand.u32 2147483647, %v10078_v43  ;;  %v10116_v30 = vmul.f32 %v5242_v52, %v9947_v61  ;;  %v10122_v39 = vpop.f32.mrf.mxu0 }
0x117d   : > { %v10108_v56 = vpop.eup %8340  ;;  %v5244_v23 = vadd.f32 1.0, %v5212_v5  ;;  %v4750_v12 = vadd.f32 1.4214138, %v4718_v34  ;;  %v10113_v26 = vmul.f32 0.5, %v9905_v32  ;;  %v5011_v15 = vmul.f32 1.442695, %v4974_v21 }
0x117e   : > { %v4529_v1 = vmul.f32 0.3275911, %v10091_v42  ;;  %v10120_v2 = vmul.f32 0.70710677, %v10094_v54  ;;  %v4909_v5 = vmul.f32 %v9957_v18, %v4877_v53  ;;  %v4752_v34 = vadd.f32 1.4214138, %v4720_v4 }
0x117f   : > { %v10124_v6 = vpop.eup %8342  ;;  %v10128_v32 = vmul.f32 0.5, %v9923_v33  ;;  %v4733_v61 = vmul.f32 %v10057_v13, %v4701_v47  ;;  %v4911_v52 = vmul.f32 %v9962_v29, %v4879_v44  ;;  %v4976_v21 = vmul.f32 %v4944_v11, %v9931_v37  ;;  %v11092_v37 = vld [vmem:[#allocation68_spill] sm:$0xff]  ;;  %v4336_v44 = vpop.f32.mrf.mxu0 }
0x1180   : > { %11090 = vst [vmem:[#allocation67_spill] sm:$0xff] %v10120_v2  ;;  %v4670_v20 = vmul.f32 1.0614054, %v10108_v56  ;;  %v4530_v25 = vmul.f32 0.3275911, %v10106_v10  ;;  %v10136_v54 = vmul.f32 %v5244_v23, %v9951_v38  ;;  %v4782_v19 = vmul.f32 %v10032_v41, %v4750_v12 }
0x1181   : > { %v4957_v18 = vsub.f32 0.0, %v9955_v24  ;;  %v10141_v33 = vadd.f32 %v4293_v46, %v9868_v8  ;;  %v4671_v53 = vmul.f32 1.0614054, %v10124_v6  ;;  %v4561_v4 = vadd.f32 1.0, %v4529_v1 }
0x1182   : > { %v10145_v29 = vand.u32 2147483647, %v10120_v2  ;;  %v10148_v47 = vadd.f32 %v4332_v16, %v11092_v37  ;;  %v5069_v38 = vmul.f32 %v8339_v27, %v4909_v5  ;;  %8348 = vpow2.f32 %v5011_v15 }
0x1183   : > { %11091 = vst [vmem:[#allocation76_spill] sm:$0xff] %v10141_v33  ;;  %v8345_v11 = vpop.eup %8344  ;;  %v4784_v23 = vmul.f32 %v10037_v50, %v4752_v34  ;;  %v4765_v12 = vadd.f32 1.4214138, %v4733_v61  ;;  %v5015_v46 = vmul.f32 1.442695, %v4976_v21  ;;  %v4562_v31 = vadd.f32 1.0, %v4530_v25 }
0x1184   : > { %v10151_v14 = vpop.eup %8346  ;;  %v5071_v8 = vmul.f32 %v8345_v11, %v4911_v52  ;;  %v4702_v43 = vadd.f32 -1.4531521, %v4670_v20  ;;  %v4814_v1 = vadd.f32 -0.28449672, %v4782_v19  ;;  %v4989_v2 = vmul.f32 %v4957_v18, %v9955_v24  ;;  %v11097_v61 = vld [vmem:[#allocation62_spill] sm:$0xff]  ;;  %v11098_v52 = vld [vmem:[#allocation63_spill] sm:$0xff] }
0x1185   : > { %v10155_v3 = vmul.f32 0.70710677, %v10141_v33  ;;  %v10158_v16 = vadd.f32 %v4336_v44, %v11092_v37  ;;  %v4703_v27 = vadd.f32 -1.4531521, %v4671_v53  ;;  %8350 = vrcp.f32 %v4561_v4 }
0x1186   : > { %v4531_v15 = vmul.f32 0.3275911, %v10145_v29  ;;  %v10162_v5 = vmul.f32 0.70710677, %v10148_v47  ;;  %v4816_v34 = vadd.f32 -0.28449672, %v4784_v23  ;;  %v4797_v20 = vmul.f32 %v10057_v13, %v4765_v12 }
0x1187   : > { %11093 = vst [vmem:[#allocation68_spill] sm:$0xff] %v10155_v3  ;;  %11094 = vst [vmem:[#allocation77_spill] sm:$0xff] %v10158_v16  ;;  %v4672_v19 = vmul.f32 1.0614054, %v10151_v14  ;;  %v10167_v24 = vmul.f32 0.70710677, %v10158_v16  ;;  %v4734_v21 = vmul.f32 %v10108_v56, %v4702_v43  ;;  %8352 = vrcp.f32 %v4562_v31 }
0x1188   : > { %11095 = vst [vmem:[#allocation78_spill] sm:$0xff] %v10162_v5  ;;  %v5101_v25 = vsub.f32 1.0, %v5069_v38  ;;  %vm5133_vm5 = vcmp.lt.f32.partialorder %v11097_v61, 0.0  ;;  %vm5135_vm6 = vcmp.lt.f32.partialorder %v11098_v52, 0.0  ;;  %v4958_v18 = vsub.f32 0.0, %v9995_v36 }
0x1189   : > { %11096 = vst [vmem:[#allocation79_spill] sm:$0xff] %v10167_v24  ;;  %v5103_v53 = vsub.f32 1.0, %v5071_v8  ;;  %8354 = vpow2.f32 %v5015_v46  ;;  %v5041_v4 = vmul.f32 1.442695, %v4989_v2  ;;  %v10174_v37 = vand.u32 2147483647, %v10155_v3 }
0x118a   : > { %v4846_v44 = vmul.f32 %v10032_v41, %v4814_v1  ;;  %v4735_v11 = vmul.f32 %v10124_v6, %v4703_v27  ;;  %v4563_v38 = vadd.f32 1.0, %v4531_v15  ;;  %v10179_v23 = vand.u32 2147483647, %v10162_v5 }
0x118b   : > { %v4848_v12 = vmul.f32 %v10037_v50, %v4816_v34  ;;  %v4829_v43 = vadd.f32 -0.28449672, %v4797_v20  ;;  %v4704_v16 = vadd.f32 -1.4531521, %v4672_v19  ;;  %v10183_v31 = vand.u32 2147483647, %v10167_v24 }
0x118c   : > { %v10186_v2 = vmul.f32 0.5, %v9970_v63  ;;  %v4959_v8 = vsub.f32 0.0, %v10003_v48  ;;  %v4766_v46 = vadd.f32 1.4214138, %v4734_v21  ;;  %v4990_v1 = vmul.f32 %v4958_v18, %v9995_v36 }
0x118d   : > { %v5165_v27 = vsub.f32 0.0, %v5101_v25  ;;  %v5167_v15 = vsub.f32 0.0, %v5103_v53  ;;  %8356 = vpow2.f32 %v5041_v4  ;;  %v4546_v5 = vmul.f32 0.3275911, %v10174_v37 }
0x118e   : > { %11099 = vst [vmem:[#allocation62_spill] sm:$0xff] %v10186_v2  ;;  %v4878_v3 = vadd.f32 0.2548296, %v4846_v44  ;;  %v4767_v34 = vadd.f32 1.4214138, %v4735_v11  ;;  %8358 = vrcp.f32 %v4563_v38  ;;  %v4861_v24 = vmul.f32 %v10057_v13, %v4829_v43 }
0x118f   : > { %v4532_v20 = vmul.f32 0.3275911, %v10179_v23  ;;  %v4880_v19 = vadd.f32 0.2548296, %v4848_v12  ;;  %v4736_v63 = vmul.f32 %v10151_v14, %v4704_v16  ;;  %v4548_v33 = vmul.f32 0.3275911, %v10183_v31  ;;  %v8349_v21 = vpop.eup %8348 }
0x1190   : > { %v4991_v36 = vmul.f32 %v4959_v8, %v10003_v48  ;;  %v10197_v18 = vmul.f32 0.5, %v9960_v62  ;;  %v4798_v4 = vmul.f32 %v10108_v56, %v4766_v46  ;;  %v5043_v44 = vmul.f32 1.442695, %v4990_v1 }
0x1191   : > { %v5197_v11 = vsel %vm5133_vm5, %v5165_v27, %v5101_v25  ;;  %v5199_v38 = vsel %vm5135_vm6, %v5167_v15, %v5103_v53  ;;  %v4960_v12 = vsub.f32 0.0, %v10026_v40  ;;  %v4578_v16 = vadd.f32 1.0, %v4546_v5 }
0x1192   : > { %v4910_v43 = vmul.f32 %v10032_v41, %v4878_v3  ;;  %v4799_v2 = vmul.f32 %v10124_v6, %v4767_v34  ;;  %v4945_v48 = vsub.f32 0.0, %v10091_v42  ;;  %v4564_v62 = vadd.f32 1.0, %v4532_v20  ;;  %v10208_v8 = vpop.eup %8350 }
0x1193   : > { %v4912_v46 = vmul.f32 %v10037_v50, %v4880_v19  ;;  %v4893_v1 = vadd.f32 0.2548296, %v4861_v24  ;;  %v4768_v61 = vadd.f32 1.4214138, %v4736_v63  ;;  %v4580_v25 = vadd.f32 1.0, %v4548_v33 }
0x1194   : > { %v5229_v27 = vadd.f32 1.0, %v5197_v11  ;;  %v5045_v52 = vmul.f32 1.442695, %v4991_v36  ;;  %v4830_v53 = vadd.f32 -0.28449672, %v4798_v4  ;;  %8360 = vpow2.f32 %v5043_v44  ;;  %v10211_v15 = vpop.eup %8352  ;;  %v11101_v11 = vld [vmem:[#allocation69_spill] sm:$0xff] }
0x1195   : > { %v5231_v5 = vadd.f32 1.0, %v5199_v38  ;;  %v4992_v41 = vmul.f32 %v4960_v12, %v10026_v40  ;;  %v4947_v3 = vsub.f32 0.0, %v10145_v29  ;;  %8362 = vrcp.f32 %v4578_v16 }
0x1196   : > { %v8355_v34 = vpop.eup %8354  ;;  %v5070_v20 = vmul.f32 %v8349_v21, %v4910_v43  ;;  %v4831_v58 = vadd.f32 -0.28449672, %v4799_v2  ;;  %v4977_v50 = vmul.f32 %v4945_v48, %v10091_v42  ;;  %8364 = vrcp.f32 %v4564_v62 }
0x1197   : > { %v5072_v24 = vmul.f32 %v8355_v34, %v4912_v46  ;;  %v4925_v33 = vmul.f32 %v10057_v13, %v4893_v1  ;;  %v4800_v19 = vmul.f32 %v10151_v14, %v4768_v61  ;;  %8366 = vrcp.f32 %v4580_v25  ;;  %v10237_v46 = vpop.f32.mrf.mxu1 }
0x1198   : > { %8368 = vpow2.f32 %v5045_v52  ;;  %v4862_v63 = vmul.f32 %v10108_v56, %v4830_v53  ;;  %v4657_v40 = vmul.f32 1.0614054, %v10208_v8  ;;  %v4658_v36 = vmul.f32 1.0614054, %v10211_v15  ;;  %v11104_v53 = vld [vmem:[#allocation70_spill] sm:$0xff] }
0x1199   : > { %v10222_v4 = vmul.f32 %v5229_v27, %v9999_v49  ;;  %vm5134_vm7 = vcmp.lt.f32.partialorder %v9913_v45, 0.0  ;;  %v5047_v42 = vmul.f32 1.442695, %v4992_v41  ;;  %v4979_v2 = vmul.f32 %v4947_v3, %v10145_v29  ;;  %v10248_v41 = vpop.f32.mrf.mxu0  ;;  %v11105_v3 = vld [vmem:[#allocation58_spill] sm:$0xff] }
0x119a   : > { %v4946_v13 = vsub.f32 0.0, %v10106_v10  ;;  %v8357_v21 = vpop.eup %8356  ;;  %v5102_v44 = vsub.f32 1.0, %v5070_v20  ;;  %vm5136_vm8 = vcmp.lt.f32.partialorder %v11101_v11, 0.0  ;;  %v4863_v38 = vmul.f32 %v10124_v6, %v4831_v58  ;;  %v11107_v20 = vld [vmem:[#allocation61_spill] sm:$0xff] }
0x119b   : > { %11100 = vst [vmem:[#allocation63_spill] sm:$0xff] %v10222_v4  ;;  %v10230_v12 = vmul.f32 0.5, %v9992_v57  ;;  %v5017_v16 = vmul.f32 1.442695, %v4977_v50  ;;  %v10232_v43 = vpop.eup %8358  ;;  %v10235_v49 = vmul.f32 %v5231_v5, %v10016_v7  ;;  %v5104_v48 = vsub.f32 1.0, %v5072_v24 }
0x119c   : > { %v5085_v62 = vmul.f32 %v8357_v21, %v4925_v33  ;;  %v4832_v29 = vadd.f32 -0.28449672, %v4800_v19  ;;  %v4894_v1 = vadd.f32 0.2548296, %v4862_v63  ;;  %v4689_v61 = vadd.f32 -1.4531521, %v4657_v40  ;;  %v4375_v33 = vpop.f32.mrf.mxu1 }
0x119d   : > { %11102 = vst [vmem:[#allocation69_spill] sm:$0xff] %v10235_v49  ;;  %v4690_v25 = vadd.f32 -1.4531521, %v4658_v36  ;;  %v10241_v58 = vadd.f32 %v10096_v17, %v9835_v0  ;;  %8370 = vpow2.f32 %v5047_v42  ;;  %v5021_v57 = vmul.f32 1.442695, %v4979_v2 }
0x119e   : > { %v10244_v27 = vmul.f32 0.5, %v10060_v59  ;;  %v4978_v7 = vmul.f32 %v4946_v13, %v10106_v10  ;;  %v5166_v52 = vsub.f32 0.0, %v5102_v44  ;;  %vm5149_vm9 = vcmp.lt.f32.partialorder %v11104_v53, 0.0 }
0x119f   : > { %11103 = vst [vmem:[#allocation80_spill] sm:$0xff] %v10241_v58  ;;  %v4895_v5 = vadd.f32 0.2548296, %v4863_v38  ;;  %8372 = vpow2.f32 %v5017_v16  ;;  %v11106_v34 = vsub.s32 5, %v11105_v3  ;;  %v5168_v0 = vsub.f32 0.0, %v5104_v48 }
0x11a0   : > { %v5117_v17 = vsub.f32 1.0, %v5085_v62  ;;  %v4864_v24 = vmul.f32 %v10151_v14, %v4832_v29  ;;  %v4659_v59 = vmul.f32 1.0614054, %v10232_v43  ;;  %v4926_v10 = vmul.f32 %v10108_v56, %v4894_v1 }
0x11a1   : > { %v10253_v50 = vrot.slane %v11107_v20, %v11106_v34  ;;  %v4721_v19 = vmul.f32 %v10208_v8, %v4689_v61  ;;  %v4722_v63 = vmul.f32 %v10211_v15, %v4690_v25  ;;  %v10261_v40 = vmul.f32 0.70710677, %v10241_v58  ;;  %v8361_v36 = vpop.eup %8360 }
0x11a2   : > { %8374 = vpow2.f32 %v5021_v57  ;;  %v5019_v42 = vmul.f32 1.442695, %v4978_v7  ;;  %v10265_v2 = vadd.f32 %v10122_v39, %v11087_v22  ;;  %v11110_v13 = vsub.s32 7, %v11105_v3  ;;  %v10272_v56 = vpop.eup %8362  ;;  %v4418_v22 = vpop.f32.mrf.mxu0 }
0x11a3   : > { %11108 = vst [vmem:[#allocation70_spill] sm:$0xff] %v10261_v40  ;;  %v5198_v38 = vsel %vm5134_vm7, %v5166_v52, %v5102_v44  ;;  %v4927_v16 = vmul.f32 %v10124_v6, %v4895_v5  ;;  %v10278_v62 = vmul.f32 0.5, %v10148_v47  ;;  %v10281_v29 = vadd.f32 %v4375_v33, %v10253_v50  ;;  %v10283_v39 = vpop.eup %8364 }
0x11a4   : > { %11109 = vst [vmem:[#allocation58_spill] sm:$0xff] %v10265_v2  ;;  %v10270_v21 = vrot.slane %v11107_v20, %v11110_v13  ;;  %v5200_v1 = vsel %vm5136_vm8, %v5168_v0, %v5104_v48  ;;  %v5181_v61 = vsub.f32 0.0, %v5117_v17  ;;  %v4896_v25 = vadd.f32 0.2548296, %v4864_v24  ;;  %v10287_v7 = vpop.eup %8366 }
0x11a5   : > { %11111 = vst [vmem:[#allocation61_spill] sm:$0xff] %v10281_v29  ;;  %v4691_v57 = vadd.f32 -1.4531521, %v4659_v59  ;;  %v5086_v45 = vmul.f32 %v8361_v36, %v4926_v10  ;;  %v4753_v44 = vadd.f32 1.4214138, %v4721_v19  ;;  %v8369_v52 = vpop.eup %8368  ;;  %v5230_v5 = vadd.f32 1.0, %v5198_v38 }
0x11a6   : > { %v4754_v6 = vadd.f32 1.4214138, %v4722_v63  ;;  %v10290_v47 = vand.u32 2147483647, %v10261_v40  ;;  %v10293_v34 = vmul.f32 0.70710677, %v10265_v2  ;;  %v10297_v11 = vadd.f32 %v4418_v22, %v10270_v21 }
0x11a7   : > { %v4674_v20 = vmul.f32 1.0614054, %v10272_v56  ;;  %v5232_v48 = vadd.f32 1.0, %v5200_v1  ;;  %v10299_v0 = vmul.f32 %v8369_v52, %v4927_v16  ;;  %v4660_v24 = vmul.f32 1.0614054, %v10283_v39 }
0x11a8   : > { %11112 = vst [vmem:[#allocation81_spill] sm:$0xff] %v10293_v34  ;;  %11113 = vst [vmem:[#allocation82_spill] sm:$0xff] %v10297_v11  ;;  %v10303_v59 = vmul.f32 0.70710677, %v10281_v29  ;;  %v5213_v33 = vsel %vm5149_vm9, %v5181_v61, %v5117_v17  ;;  %vm5150_vm10 = vcmp.lt.f32.partialorder %v9979_v51, 0.0  ;;  %v4928_v10 = vmul.f32 %v10151_v14, %v4896_v25  ;;  %v4377_v51 = vpop.f32.mrf.mxu1 }
0x11a9   : > { %v4723_v19 = vmul.f32 %v10232_v43, %v4691_v57  ;;  %v4676_v63 = vmul.f32 1.0614054, %v10287_v7  ;;  %v5118_v36 = vsub.f32 1.0, %v5086_v45  ;;  %v4785_v13 = vmul.f32 %v10208_v8, %v4753_v44 }
0x11aa   : > { %11114 = vst [vmem:[#allocation83_spill] sm:$0xff] %v10303_v59  ;;  %v4786_v38 = vmul.f32 %v10211_v15, %v4754_v6  ;;  %v4545_v16 = vmul.f32 0.3275911, %v10290_v47  ;;  %8376 = vpow2.f32 %v5019_v42  ;;  %v10315_v22 = vand.u32 2147483647, %v10293_v34  ;;  %v8371_v14 = vpop.eup %8370 }
0x11ab   : > { %v4706_v53 = vadd.f32 -1.4531521, %v4674_v20  ;;  %v10318_v17 = vmul.f32 0.70710677, %v10297_v11  ;;  %v5245_v1 = vadd.f32 1.0, %v5213_v33  ;;  %v5119_v61 = vsub.f32 1.0, %v10299_v0 }
0x11ac   : > { %v4692_v25 = vadd.f32 -1.4531521, %v4660_v24  ;;  %v10322_v57 = vand.u32 2147483647, %v10303_v59  ;;  %v10324_v45 = vpop.eup %8372  ;;  %v10327_v44 = vmul.f32 %v5230_v5, %v10030_v55  ;;  %vm5151_vm11 = vcmp.lt.f32.partialorder %v9989_v35, 0.0 }
0x11ad   : > { %11115 = vst [vmem:[#allocation84_spill] sm:$0xff] %v10318_v17  ;;  %v5088_v42 = vmul.f32 %v8371_v14, %v4928_v10  ;;  %v4755_v6 = vadd.f32 1.4214138, %v4723_v19  ;;  %v4708_v52 = vadd.f32 -1.4531521, %v4676_v63  ;;  %v5182_v20 = vsub.f32 0.0, %v5118_v36 }
0x11ae   : > { %v4817_v11 = vadd.f32 -0.28449672, %v4785_v13  ;;  %v4818_v29 = vadd.f32 -0.28449672, %v4786_v38  ;;  %v4577_v33 = vadd.f32 1.0, %v4545_v16  ;;  %v10331_v0 = vmul.f32 %v5232_v48, %v10113_v26  ;;  %v11116_v19 = vld [vmem:[#allocation71_spill] sm:$0xff] }
0x11af   : > { %v4547_v24 = vmul.f32 0.3275911, %v10315_v22  ;;  %v4738_v59 = vmul.f32 %v10272_v56, %v4706_v53  ;;  %v10336_v34 = vand.u32 2147483647, %v10318_v17  ;;  %v10338_v55 = vpop.eup %8374  ;;  %v10341_v5 = vmul.f32 %v5245_v1, %v10128_v32 }
0x11b0   : > { %v5183_v10 = vsub.f32 0.0, %v5119_v61  ;;  %vm5152_vm12 = vcmp.lt.f32.partialorder %v11116_v19, 0.0  ;;  %v4724_v63 = vmul.f32 %v10283_v39, %v4692_v25  ;;  %v4534_v26 = vmul.f32 0.3275911, %v10322_v57 }
0x11b1   : > { %v5120_v48 = vsub.f32 1.0, %v5088_v42  ;;  %v4787_v13 = vmul.f32 %v10232_v43, %v4755_v6  ;;  %v4962_v38 = vsub.f32 0.0, %v10174_v37  ;;  %v4740_v16 = vmul.f32 %v10287_v7, %v4708_v52 }
0x11b2   : > { %v5214_v53 = vsel %vm5150_vm10, %v5182_v20, %v5118_v36  ;;  %v4849_v32 = vmul.f32 %v10208_v8, %v4817_v11  ;;  %v4850_v14 = vmul.f32 %v10211_v15, %v4818_v29  ;;  %8378 = vrcp.f32 %v4577_v33 }
0x11b3   : > { %v4579_v1 = vadd.f32 1.0, %v4547_v24  ;;  %v4770_v17 = vadd.f32 1.4214138, %v4738_v59  ;;  %v4964_v25 = vsub.f32 0.0, %v10183_v31  ;;  %v4536_v42 = vmul.f32 0.3275911, %v10336_v34 }
0x11b4   : > { %v4756_v2 = vadd.f32 1.4214138, %v4724_v63  ;;  %v4948_v52 = vsub.f32 0.0, %v10179_v23  ;;  %v4566_v40 = vadd.f32 1.0, %v4534_v26  ;;  %v5184_v36 = vsub.f32 0.0, %v5120_v48  ;;  %v10363_v26 = vpop.f32.mrf.mxu0 }
0x11b5   : > { %v4819_v11 = vadd.f32 -0.28449672, %v4787_v13  ;;  %v4994_v29 = vmul.f32 %v4962_v38, %v10174_v37  ;;  %v4772_v20 = vadd.f32 1.4214138, %v4740_v16  ;;  %v5215_v59 = vsel %vm5151_vm11, %v5183_v10, %v5119_v61  ;;  %v8425_v38 = vld [vmem:[%s8903_s3 + $0x8] sm:$0xff]  ;;  %v4379_v10 = vpop.f32.mrf.mxu1 }
0x11b6   : > { %v5246_v33 = vadd.f32 1.0, %v5214_v53  ;;  %v4881_v24 = vadd.f32 0.2548296, %v4849_v32  ;;  %v4882_v58 = vadd.f32 0.2548296, %v4850_v14  ;;  %8380 = vrcp.f32 %v4579_v1 }
0x11b7   : > { %v4802_v6 = vmul.f32 %v10272_v56, %v4770_v17  ;;  %v4996_v63 = vmul.f32 %v4964_v25, %v10183_v31  ;;  %v4568_v49 = vadd.f32 1.0, %v4536_v42  ;;  %v8377_v4 = vpop.eup %8376  ;;  %v4788_v13 = vmul.f32 %v10283_v39, %v4756_v2 }
0x11b8   : > { %v4980_v37 = vmul.f32 %v4948_v52, %v10179_v23  ;;  %v11117_v35 = vsub.s32 4, %v11105_v3  ;;  %8382 = vrcp.f32 %v4566_v40  ;;  %v5216_v16 = vsel %vm5152_vm12, %v5184_v36, %v5120_v48  ;;  %v4422_v48 = vpop.f32.mrf.mxu0 }
0x11b9   : > { %v4851_v17 = vmul.f32 %v10232_v43, %v4819_v11  ;;  %v5051_v31 = vmul.f32 1.442695, %v4994_v29  ;;  %v4804_v53 = vmul.f32 %v10287_v7, %v4772_v20  ;;  %v10374_v32 = vadd.f32 1.0, %v5215_v59  ;;  %v8074_v59 = vld [vmem:[%s8909_s29 + $0x138] sm:$0xff]  }
0x11ba   : > { %v3729_v61 = vrot.slane %v8425_v38, %v11117_v35  ;;  %v10377_v2 = vmul.f32 %v5246_v33, %v10197_v18  ;;  %v10380_v23 = vmul.f32 %v10208_v8, %v4881_v24  ;;  %v4914_v14 = vmul.f32 %v10211_v15, %v4882_v58  ;;  %v8076_v24 = vld [vmem:[%s8909_s29 + $0x170] sm:$0xff]  }
0x11bb   : > { %v4834_v40 = vadd.f32 -0.28449672, %v4802_v6  ;;  %v5055_v1 = vmul.f32 1.442695, %v4996_v63  ;;  %8384 = vrcp.f32 %v4568_v49  ;;  %v10384_v19 = vadd.f32 %v4379_v10, %v10253_v50  ;;  %v8077_v10 = vld [vmem:[%s8909_s29 + $0x1f0] sm:$0xff]  }
0x11bc   : > { %v5248_v25 = vadd.f32 1.0, %v5216_v16  ;;  %v4820_v42 = vadd.f32 -0.28449672, %v4788_v13  ;;  %v5023_v52 = vmul.f32 1.442695, %v4980_v37  ;;  %v10387_v36 = vadd.f32 %v10237_v46, %v3729_v61  ;;  %v8078_v16 = vld [vmem:[%s8909_s29 + $0x130] sm:$0xff]  }
0x11bd   : > { %v10389_v18 = vadd.f32 0.2548296, %v4851_v17  ;;  %v4961_v8 = vsub.f32 0.0, %v10290_v47  ;;  %8386 = vpow2.f32 %v5051_v31  ;;  %v4836_v15 = vadd.f32 -0.28449672, %v4804_v53 }
0x11be   : > { %11118 = vst [vmem:[#allocation71_spill] sm:$0xff] %v10387_v36  ;;  %v10392_v58 = vmul.f32 %v8377_v4, %v4914_v14  ;;  %v4963_v49 = vsub.f32 0.0, %v10315_v22  ;;  %v11119_v50 = vsub.s32 6, %v11105_v3  ;;  %v10398_v11 = vadd.f32 %v4422_v48, %v10270_v21  ;;  %v8080_v14 = vld [vmem:[%s8909_s29 + $0x168] sm:$0xff]  }
0x11bf   : > { %v10400_v29 = vpop.eup %8378  ;;  %v4866_v46 = vmul.f32 %v10272_v56, %v4834_v40  ;;  %8388 = vpow2.f32 %v5055_v1  ;;  %v10404_v20 = vmul.f32 0.70710677, %v10384_v19  ;;  %v5290_v4 = vpack.c.bf16 %v10116_v30, %v10081_v9  ;;  %v8075_v30 = vld [vmem:[%s8909_s29 + $0x1b8] sm:$0xff]  }
0x11c0   : > { %v3737_v6 = vrot.slane %v8425_v38, %v11119_v50  ;;  %v10410_v33 = vmul.f32 %v5248_v25, %v10230_v12  ;;  %v4852_v3 = vmul.f32 %v10283_v39, %v4820_v42  ;;  %8390 = vpow2.f32 %v5023_v52  ;;  %v11125_v52 = vld [vmem:[#allocation66_spill] sm:$0xff] }
0x11c1   : > { %v10414_v21 = vmul.f32 0.70710677, %v10387_v36  ;;  %v4993_v63 = vmul.f32 %v4961_v8, %v10290_v47  ;;  %v4868_v13 = vmul.f32 %v10287_v7, %v4836_v15  ;;  %v10419_v37 = vadd.f32 %v4377_v51, %v3729_v61  ;;  %6368 = vmatprep.mubr.bf16.mxu1 %v5290_v4  ;;  %v11122_v51 = vld [vmem:[#allocation73_spill] sm:$0xff]  ;;  %v11128_v50 = vld [vmem:[#allocation62_spill] sm:$0xff] }
0x11c2   : > { %v10422_v9 = vand.u32 2147483647, %v10404_v20  ;;  %v4673_v12 = vmul.f32 1.0614054, %v10400_v29  ;;  %v10427_v38 = vadd.f32 %v10248_v41, %v3737_v6  ;;  %v10430_v35 = vmul.f32 0.70710677, %v10398_v11 }
0x11c3   : > { %11120 = vst [vmem:[#allocation85_spill] sm:$0xff] %v10419_v37  ;;  %v5292_v47 = vpack.c.bf16 %v10136_v54, %v10099_v60  ;;  %v11123_v61 = vpack.c.bf16 %v10074_v28, %v11122_v51  ;;  %v5106_v17 = vsub.f32 1.0, %v10392_v58  ;;  %v4995_v31 = vmul.f32 %v4963_v49, %v10315_v22  ;;  %v10443_v40 = vpop.eup %8380  ;;  %v11126_v8 = vld [vmem:[#allocation65_spill] sm:$0xff] }
0x11c4   : > { %11121 = vst [vmem:[#allocation86_spill] sm:$0xff] %v10427_v38  ;;  %v4898_v53 = vadd.f32 0.2548296, %v4866_v46  ;;  %v4550_v41 = vmul.f32 0.3275911, %v10422_v9  ;;  %v10449_v28 = vadd.f32 %v10363_v26, %v3737_v6  ;;  %v11127_v15 = vpack.c.bf16 %v11125_v52, %v11126_v8  ;;  %v8079_v26 = vld [vmem:[%s8909_s29 + $0x1b0] sm:$0xff]  }
0x11c5   : > { %6369 = vmatmul.mubr.bf16.vlgmr.msra.gmra.mxu1 %v11123_v61  ;;  %v4884_v1 = vadd.f32 0.2548296, %v4852_v3  ;;  %v10446_v54 = vand.u32 2147483647, %v10414_v21  ;;  %v10452_v60 = vand.u32 2147483647, %v10430_v35  ;;  %6409 = vmatprep.mubr.bf16.mxu0 %v5292_v47  ;;  %v10454_v22 = vpop.eup %8382  ;;  %v5294_v49 = vpack.c.bf16 %v10377_v2, %v10327_v44 }
0x11c6   : > { %7506 = vmatpush3.bf16.msra.mxu1 %v8074_v59  ;;  %11124 = vst [vmem:[#allocation73_spill] sm:$0xff] %v10449_v28  ;;  %v4900_v48 = vadd.f32 0.2548296, %v4868_v13  ;;  %v10457_v25 = vmul.f32 0.70710677, %v10419_v37  ;;  %v4582_v42 = vadd.f32 1.0, %v4550_v41  ;;  %6410 = vmatmul.mubr.bf16.vlgmr.msra.gmra.mxu0 %v11127_v15  ;;  %v10467_v6 = vmul.f32 %v10374_v32, %v11128_v50 }
0x11c7   : > { %7507 = vmatprep.subr.bf16.mxu1 %v8076_v24  ;;  %v4705_v46 = vadd.f32 -1.4531521, %v4673_v12  ;;  %v10470_v4 = vmul.f32 0.70710677, %v10427_v38  ;;  %v4552_v59 = vmul.f32 0.3275911, %v10452_v60  ;;  %7528 = vmatpush3.bf16.msra.mxu0 %v8075_v30  ;;  %v4930_v13 = vmul.f32 %v10272_v56, %v4898_v53 }
0x11c8   : > { %v11129_v3 = vld [vmem:[#allocation75_spill] sm:$0xff]  ;;  %v4675_v24 = vmul.f32 1.0614054, %v10443_v40  ;;  %8392 = vrcp.f32 %v4582_v42  ;;  %7529 = vmatprep.subr.bf16.mxu0 %v8077_v10  ;;  %v5296_v2 = vpack.c.bf16 %v10410_v33, %v10331_v0  ;;  %v10480_v12 = vpop.eup %8384  ;;  %v10484_v30 = vmul.f32 %v10324_v45, %v10380_v23  ;;  %v8084_v61 = vld [vmem:[%s8909_s29 + $0x160] sm:$0xff]   ;;  %6450 = vmatprep.mubr.bf16.mxu1 %v5294_v49  ;;  %v8088_v8 = vld [vmem:[%s8909_s29 + $0x158] sm:$0xff]  }
0x11c9   : > { %vm5138_vm13 = vcmp.lt.f32.partialorder %v11129_v3, 0.0  ;;  %v8081_v44 = vld [vmem:[%s8909_s29 + $0x1e8] sm:$0xff]   ;;  %v4662_v47 = vmul.f32 1.0614054, %v10454_v22  ;;  %v10488_v51 = vmul.f32 0.70710677, %v10449_v28  ;;  %v4932_v0 = vmul.f32 %v10287_v7, %v4900_v48 }
0x11ca   : > { %7508 = vmatpush3.bf16.msra.mxu1 %v8078_v16  ;;  %v8082_v32 = vld [vmem:[%s8909_s29 + $0x128] sm:$0xff]   ;;  %v4584_v56 = vadd.f32 1.0, %v4552_v59  ;;  %v5049_v10 = vmul.f32 1.442695, %v4993_v63  ;;  %v5053_v16 = vmul.f32 1.442695, %v4995_v31  ;;  %6491 = vmatprep.mubr.bf16.mxu0 %v5296_v2  ;;  %v8387_v45 = vpop.eup %8386  ;;  %v4916_v53 = vmul.f32 %v10283_v39, %v4884_v1 }
0x11cb   : > { %7509 = vmatprep.subr.bf16.mxu1 %v8080_v14  ;;  %v10493_v33 = vand.u32 2147483647, %v10457_v25  ;;  %v5170_v23 = vsub.f32 0.0, %v5106_v17  ;;  %v4737_v41 = vmul.f32 %v10400_v29, %v4705_v46  ;;  %v10500_v14 = vand.u32 2147483647, %v10470_v4  ;;  %7530 = vmatpush3.bf16.msra.mxu0 %v8079_v26  ;;  %v8083_v63 = vld [vmem:[%s8909_s29 + $0x1a8] sm:$0xff]  }
0x11cc   : > { %v8085_v7 = vld [vmem:[%s8909_s29 + $0x1e0] sm:$0xff]   ;;  %v10504_v31 = vmul.f32 %v8387_v45, %v4930_v13  ;;  %v4533_v48 = vmul.f32 0.3275911, %v10446_v54  ;;  %v4664_v42 = vmul.f32 1.0614054, %v10480_v12  ;;  %8394 = vrcp.f32 %v4584_v56  ;;  %7531 = vmatprep.subr.bf16.mxu0 %v8081_v44  ;;  %v8389_v39 = vpop.eup %8388  ;;  %v11130_v46 = vld [vmem:[#allocation76_spill] sm:$0xff] }
0x11cd   : > { %v8086_v52 = vld [vmem:[%s8909_s29 + $0x120] sm:$0xff]   ;;  %v10512_v1 = vmul.f32 %v10232_v43, %v10389_v18  ;;  %v4707_v15 = vadd.f32 -1.4531521, %v4675_v24  ;;  %v4694_v26 = vadd.f32 -1.4531521, %v4662_v47  ;;  %v8391_v50 = vpop.eup %8390  ;;  %8396 = vpow2.f32 %v5049_v10  ;;  %v11131_v24 = vld [vmem:[#allocation68_spill] sm:$0xff] }
0x11ce   : > { %7510 = vmatpush3.bf16.msra.mxu1 %v8082_v32  ;;  %v10515_v49 = vand.u32 2147483647, %v10488_v51  ;;  %v10518_v59 = vmul.f32 0.5, %v11130_v46  ;;  %v10520_v13 = vmul.f32 %v8389_v39, %v4932_v0  ;;  %v4549_v44 = vmul.f32 0.3275911, %v10493_v33  ;;  %v8087_v2 = vld [vmem:[%s8909_s29 + $0x1a0] sm:$0xff]  }
0x11cf   : > { %7511 = vmatprep.subr.bf16.mxu1 %v8084_v61  ;;  %v10523_v43 = vmul.f32 %v8391_v50, %v4916_v53  ;;  %v4769_v18 = vadd.f32 1.4214138, %v4737_v41  ;;  %8398 = vpow2.f32 %v5053_v16  ;;  %vm5154_vm14 = vcmp.lt.f32.partialorder %v11131_v24, 0.0  ;;  %7532 = vmatpush3.bf16.msra.mxu0 %v8083_v63  ;;  %v8089_v47 = vld [vmem:[%s8909_s29 + $0x1d8] sm:$0xff]   ;;  %v8092_v39 = vld [vmem:[%s8909_s29 + $0x150] sm:$0xff]   ;;  %v8097_v37 = vld [vmem:[%s8909_s29 + $0x1c8] sm:$0xff]  }
0x11d0   : > { %v4535_v32 = vmul.f32 0.3275911, %v10500_v14  ;;  %v5122_v56 = vsub.f32 1.0, %v10504_v31  ;;  %v11132_v61 = vld [vmem:[#allocation77_spill] sm:$0xff]  ;;  %v4565_v0 = vadd.f32 1.0, %v4533_v48  ;;  %7533 = vmatprep.subr.bf16.mxu0 %v8085_v7  ;;  %v10538_v16 = vsel %vm5138_vm13, %v5170_v23, %v5106_v17  ;;  %v11133_v48 = vld [vmem:[#allocation78_spill] sm:$0xff] }
0x11d1   : > { %v10531_v10 = vmul.f32 0.5, %v11132_v61  ;;  %v4696_v45 = vadd.f32 -1.4531521, %v4664_v42  ;;  %v8090_v53 = vld [vmem:[%s8909_s29 + $0x118] sm:$0xff]   ;;  %v4739_v41 = vmul.f32 %v10443_v40, %v4707_v15  ;;  %v4726_v63 = vmul.f32 %v10454_v22, %v4694_v26  ;;  %v11134_v42 = vld [vmem:[#allocation79_spill] sm:$0xff]  ;;  %v8100_v24 = vld [vmem:[%s8909_s29 + $0x140] sm:$0xff]  }
0x11d2   : > { %7512 = vmatpush3.bf16.msra.mxu1 %v8086_v52  ;;  %v4551_v31 = vmul.f32 0.3275911, %v10515_v49  ;;  %vm5140_vm15 = vcmp.lt.f32.partialorder %v11133_v48, 0.0  ;;  %v5124_v7 = vsub.f32 1.0, %v10520_v13  ;;  %vm5156_vm0 = vcmp.lt.f32.partialorder %v11134_v42, 0.0  ;;  %v8091_v15 = vld [vmem:[%s8909_s29 + $0x198] sm:$0xff]  }
0x11d3   : > { %7513 = vmatprep.subr.bf16.mxu1 %v8088_v8  ;;  %v4581_v58 = vadd.f32 1.0, %v4549_v44  ;;  %v4966_v17 = vsub.f32 0.0, %v10422_v9  ;;  %v5108_v3 = vsub.f32 1.0, %v10523_v43  ;;  %v4801_v23 = vmul.f32 %v10400_v29, %v4769_v18  ;;  %7534 = vmatpush3.bf16.msra.mxu0 %v8087_v2  ;;  %v8093_v13 = vld [vmem:[%s8909_s29 + $0x1d0] sm:$0xff]   ;;  %v8096_v61 = vld [vmem:[%s8909_s29 + $0x148] sm:$0xff]   ;;  %v8104_v42 = vld [vmem:[%s8909_s29 + $0x278] sm:$0xff]  }
0x11d4   : > { %v4567_v52 = vadd.f32 1.0, %v4535_v32  ;;  %v4950_v8 = vsub.f32 0.0, %v10322_v57  ;;  %v5186_v26 = vsub.f32 0.0, %v5122_v56  ;;  %8400 = vrcp.f32 %v4565_v0  ;;  %7535 = vmatprep.subr.bf16.mxu0 %v8089_v47  ;;  %v8094_v44 = vld [vmem:[%s8909_s29 + $0x110] sm:$0xff]  }
0x11d5   : > { %v4728_v50 = vmul.f32 %v10480_v12, %v4696_v45  ;;  %v4968_v46 = vsub.f32 0.0, %v10452_v60  ;;  %v10557_v43 = vpop.eup %8392  ;;  %v4771_v18 = vadd.f32 1.4214138, %v4739_v41  ;;  %v4758_v32 = vadd.f32 1.4214138, %v4726_v63  ;;  %v8095_v41 = vld [vmem:[%s8909_s29 + $0x190] sm:$0xff]  }
0x11d6   : > { %7514 = vmatpush3.bf16.msra.mxu1 %v8090_v53  ;;  %v4952_v38 = vsub.f32 0.0, %v10336_v34  ;;  %v4583_v2 = vadd.f32 1.0, %v4551_v31  ;;  %v5188_v28 = vsub.f32 0.0, %v5124_v7  ;;  %8402 = vrcp.f32 %v4581_v58 }
0x11d7   : > { %7515 = vmatprep.subr.bf16.mxu1 %v8092_v39  ;;  %v4678_v0 = vmul.f32 1.0614054, %v10557_v43  ;;  %v4998_v47 = vmul.f32 %v4966_v17, %v10422_v9  ;;  %v5172_v45 = vsub.f32 0.0, %v5108_v3  ;;  %v4833_v53 = vadd.f32 -0.28449672, %v4801_v23  ;;  %7536 = vmatpush3.bf16.msra.mxu0 %v8091_v15  ;;  %v8098_v9 = vld [vmem:[%s8909_s29 + $0x108] sm:$0xff]  }
0x11d8   : > { %8404 = vrcp.f32 %v4567_v52  ;;  %v4982_v36 = vmul.f32 %v4950_v8, %v10322_v57  ;;  %v5218_v63 = vsel %vm5154_vm14, %v5186_v26, %v5122_v56  ;;  %v4760_v31 = vadd.f32 1.4214138, %v4728_v50  ;;  %7537 = vmatprep.subr.bf16.mxu0 %v8093_v13  ;;  %v8099_v26 = vld [vmem:[%s8909_s29 + $0x188] sm:$0xff]  }
0x11d9   : > { %v4710_v39 = vadd.f32 -1.4531521, %v4678_v0  ;;  %v5000_v58 = vmul.f32 %v4968_v46, %v10452_v60  ;;  %v10569_v17 = vpop.eup %8394  ;;  %v4803_v23 = vmul.f32 %v10443_v40, %v4771_v18  ;;  %v4790_v57 = vmul.f32 %v10454_v22, %v4758_v32 }
0x11da   : > { %7516 = vmatpush3.bf16.msra.mxu1 %v8094_v44  ;;  %v4984_v52 = vmul.f32 %v4952_v38, %v10336_v34  ;;  %8406 = vrcp.f32 %v4583_v2  ;;  %v5220_v60 = vsel %vm5156_vm0, %v5188_v28, %v5124_v7  ;;  %v5059_v8 = vmul.f32 1.442695, %v4998_v47  ;;  %v10580_v50 = vpop.eup %8396  ;;  %v8101_v44 = vld [vmem:[%s8909_s29 + $0x1c0] sm:$0xff]  }
0x11db   : > { %7517 = vmatprep.subr.bf16.mxu1 %v8096_v61  ;;  %v4742_v56 = vmul.f32 %v10557_v43, %v4710_v39  ;;  %v4680_v15 = vmul.f32 1.0614054, %v10569_v17  ;;  %v5204_v46 = vsel %vm5140_vm15, %v5172_v45, %v5108_v3  ;;  %v4865_v34 = vmul.f32 %v10400_v29, %v4833_v53  ;;  %7538 = vmatpush3.bf16.msra.mxu0 %v8095_v41  ;;  %v8102_v61 = vld [vmem:[%s8909_s29 + $0x100] sm:$0xff]   ;;  %v8106_v39 = vld [vmem:[%s8909_s29 + $0x238] sm:$0xff]  }
0x11dc   : > { %v5250_v38 = vadd.f32 1.0, %v5218_v63  ;;  %v5027_v13 = vmul.f32 1.442695, %v4982_v36  ;;  %v10588_v28 = vpop.eup %8398  ;;  %v4792_v7 = vmul.f32 %v10480_v12, %v4760_v31  ;;  %v5063_v2 = vmul.f32 1.442695, %v5000_v58  ;;  %7539 = vmatprep.subr.bf16.mxu0 %v8097_v37  ;;  %v8103_v31 = vld [vmem:[%s8909_s29 + $0x180] sm:$0xff]  }
0x11dd   : > { %v4774_v18 = vadd.f32 1.4214138, %v4742_v56  ;;  %v4712_v32 = vadd.f32 -1.4531521, %v4680_v15  ;;  %v5234_v48 = vadd.f32 1.0, %v10538_v16  ;;  %v5252_v36 = vadd.f32 1.0, %v5220_v60 }
0x11de   : > { %7518 = vmatpush3.bf16.msra.mxu1 %v8098_v9  ;;  %v4835_v3 = vadd.f32 -0.28449672, %v4803_v23  ;;  %v5031_v0 = vmul.f32 1.442695, %v4984_v52  ;;  %v4822_v47 = vadd.f32 -0.28449672, %v4790_v57  ;;  %8408 = vpow2.f32 %v5059_v8 }
0x11df   : > { %7519 = vmatprep.subr.bf16.mxu1 %v8100_v24  ;;  %v4806_v45 = vmul.f32 %v10557_v43, %v4774_v18  ;;  %v4744_v53 = vmul.f32 %v10569_v17, %v4712_v32  ;;  %v5236_v41 = vadd.f32 1.0, %v5204_v46  ;;  %v4897_v63 = vadd.f32 0.2548296, %v4865_v34  ;;  %7540 = vmatpush3.bf16.msra.mxu0 %v8099_v26  ;;  %v8105_v16 = vld [vmem:[%s8909_s29 + $0x2f8] sm:$0xff]   ;;  %v8108_v56 = vld [vmem:[%s8909_s29 + $0x270] sm:$0xff]  }
0x11e0   : > { %v5282_v37 = vmul.f32 %v5250_v38, %v10518_v59  ;;  %8410 = vpow2.f32 %v5027_v13  ;;  %v4824_v58 = vadd.f32 -0.28449672, %v4792_v7  ;;  %7541 = vmatprep.subr.bf16.mxu0 %v8101_v44  ;;  %v10602_v52 = vmul.f32 %v10338_v55, %v10512_v1  ;;  %v8107_v13 = vld [vmem:[%s8909_s29 + $0x2b8] sm:$0xff]  }
0x11e1   : > { %v4838_v9 = vadd.f32 -0.28449672, %v4806_v45  ;;  %v4776_v23 = vadd.f32 1.4214138, %v4744_v53  ;;  %8412 = vpow2.f32 %v5063_v2  ;;  %v10598_v57 = vpop.eup %8400  ;;  %v5266_v59 = vmul.f32 %v5234_v48, %v10244_v27  ;;  %v8112_v2 = vld [vmem:[%s8909_s29 + $0x268] sm:$0xff]  }
0x11e2   : > { %7520 = vmatpush3.bf16.msra.mxu1 %v8102_v61  ;;  %v4867_v24 = vmul.f32 %v10443_v40, %v4835_v3  ;;  %v5284_v60 = vmul.f32 %v5252_v36, %v10531_v10  ;;  %v4854_v8 = vmul.f32 %v10454_v22, %v4822_v47  ;;  %8414 = vpow2.f32 %v5031_v0  ;;  %v11135_v10 = vld [vmem:[#allocation63_spill] sm:$0xff]  ;;  %v11137_v61 = vld [vmem:[#allocation69_spill] sm:$0xff]  ;;  %v11138_v0 = vld [vmem:[#allocation72_spill] sm:$0xff] }
0x11e3   : > { %7549 = vmatprep.subr.bf16.mxu1 %v8104_v42  ;;  %v4870_v15 = vmul.f32 %v10557_v43, %v4838_v9  ;;  %v4808_v26 = vmul.f32 %v10569_v17, %v4776_v23  ;;  %v10611_v46 = vpop.eup %8402  ;;  %v5105_v27 = vsub.f32 1.0, %v10484_v30  ;;  %v5268_v55 = vmul.f32 %v5236_v41, %v10278_v62  ;;  %7542 = vmatpush3.bf16.msra.mxu0 %v8103_v31  ;;  %v8109_v62 = vld [vmem:[%s8909_s29 + $0x2f0] sm:$0xff]   ;;  %v8114_v31 = vld [vmem:[%s8909_s29 + $0x228] sm:$0xff]   ;;  %v11139_v23 = vld [vmem:[#allocation74_spill] sm:$0xff] }
0x11e4   : > { %v4929_v1 = vmul.f32 %v10400_v29, %v4897_v63  ;;  %v11136_v34 = vpack.c.bf16 %v10341_v5, %v11135_v10  ;;  %v5298_v38 = vpack.c.bf16 %v5282_v37, %v5266_v59  ;;  %v5295_v42 = vpack.c.bf16 %v10467_v6, %v11137_v61  ;;  %7571 = vmatprep.subr.bf16.mxu0 %v8105_v16  ;;  %v8110_v29 = vld [vmem:[%s8909_s29 + $0x230] sm:$0xff]   ;;  %v8113_v37 = vld [vmem:[%s8909_s29 + $0x2e8] sm:$0xff]  }
0x11e5   : > { %v10620_v44 = vpop.eup %8404  ;;  %v4856_v7 = vmul.f32 %v10480_v12, %v4824_v58  ;;  %v4902_v30 = vadd.f32 0.2548296, %v4870_v15  ;;  %v4840_v18 = vadd.f32 -0.28449672, %v4808_v26  ;;  %v4899_v32 = vadd.f32 0.2548296, %v4867_v24 }
0x11e6   : > { %6451 = vmatmul.mubr.bf16.vlgmr.msra.gmra.mxu1 %v11136_v34  ;;  %v5300_v5 = vpack.c.bf16 %v5284_v60, %v5268_v55  ;;  %v4886_v3 = vadd.f32 0.2548296, %v4854_v8  ;;  %v4677_v6 = vmul.f32 1.0614054, %v10611_v46  ;;  %6492 = vmatmul.mubr.bf16.vlgmr.msra.gmra.mxu0 %v5295_v42  ;;  %v10633_v47 = vmul.f32 0.5, %v11138_v0  ;;  %v8111_v63 = vld [vmem:[%s8909_s29 + $0x2b0] sm:$0xff]  }
0x11e7   : > { %7550 = vmatpush3.bf16.msra.mxu1 %v8106_v39  ;;  %6532 = vmatprep.mubr.bf16.mxu1 %v5298_v38  ;;  %v10628_v48 = vpop.eup %8406  ;;  %v4872_v36 = vmul.f32 %v10569_v17, %v4840_v18  ;;  %v5169_v45 = vsub.f32 0.0, %v5105_v27  ;;  %v5107_v53 = vsub.f32 1.0, %v10602_v52  ;;  %v10637_v41 = vmul.f32 %v10580_v50, %v4929_v1  ;;  %v11140_v52 = vld [vmem:[#allocation64_spill] sm:$0xff]  ;;  %v8116_v60 = vld [vmem:[%s8909_s29 + $0x260] sm:$0xff]   ;;  %v11141_v55 = vld [vmem:[#allocation67_spill] sm:$0xff] }
0x11e8   : > { %7551 = vmatprep.subr.bf16.mxu1 %v8108_v56  ;;  %7572 = vmatpush3.bf16.msra.mxu0 %v8107_v13  ;;  %v4661_v16 = vmul.f32 1.0614054, %v10598_v57  ;;  %v4888_v39 = vadd.f32 0.2548296, %v4856_v7  ;;  %v4934_v58 = vmul.f32 %v10557_v43, %v4902_v30  ;;  %vm5137_vm2 = vcmp.lt.f32.partialorder %v11139_v23, 0.0  ;;  %v11142_v10 = vld [vmem:[#allocation80_spill] sm:$0xff] }
0x11e9   : > { %6573 = vmatprep.mubr.bf16.mxu0 %v5300_v5  ;;  %v4904_v9 = vadd.f32 0.2548296, %v4872_v36  ;;  %7573 = vmatprep.subr.bf16.mxu0 %v8109_v62  ;;  %v10646_v50 = vmul.f32 0.5, %v11140_v52  ;;  %v4931_v59 = vmul.f32 %v10443_v40, %v4899_v32  ;;  %v4679_v24 = vmul.f32 1.0614054, %v10628_v48  ;;  %v8115_v38 = vld [vmem:[%s8909_s29 + $0x2a8] sm:$0xff]  }
0x11ea   : > { %v4663_v56 = vmul.f32 1.0614054, %v10620_v44  ;;  %v4918_v8 = vmul.f32 %v10454_v22, %v4886_v3  ;;  %v4709_v43 = vadd.f32 -1.4531521, %v4677_v6  ;;  %vm5139_vm3 = vcmp.lt.f32.partialorder %v11141_v55, 0.0  ;;  %v8117_v7 = vld [vmem:[%s8909_s29 + $0x2e0] sm:$0xff]  }
0x11eb   : > { %7552 = vmatpush3.bf16.msra.mxu1 %v8110_v29  ;;  %v4936_v15 = vmul.f32 %v10569_v17, %v4904_v9  ;;  %v8409_v26 = vpop.eup %8408  ;;  %v5171_v1 = vsub.f32 0.0, %v5107_v53  ;;  %v10656_v34 = vmul.f32 0.5, %v11142_v10  ;;  %v5121_v40 = vsub.f32 1.0, %v10637_v41  ;;  %v8118_v30 = vld [vmem:[%s8909_s29 + $0x220] sm:$0xff]   ;;  %v8122_v23 = vld [vmem:[%s8909_s29 + $0x218] sm:$0xff]  }
0x11ec   : > { %7553 = vmatprep.subr.bf16.mxu1 %v8112_v2  ;;  %7574 = vmatpush3.bf16.msra.mxu0 %v8111_v63  ;;  %v5201_v22 = vsel %vm5137_vm2, %v5169_v45, %v5105_v27  ;;  %v4693_v61 = vadd.f32 -1.4531521, %v4661_v16  ;;  %v4920_v17 = vmul.f32 %v10480_v12, %v4888_v39  ;;  %v10663_v42 = vmul.f32 %v8409_v26, %v4934_v58  ;;  %v11143_v62 = vld [vmem:[#allocation70_spill] sm:$0xff]  ;;  %v8120_v27 = vld [vmem:[%s8909_s29 + $0x258] sm:$0xff]  }
0x11ed   : > { %v8411_v13 = vpop.eup %8410  ;;  %7575 = vmatprep.subr.bf16.mxu0 %v8113_v37  ;;  %vm5153_vm4 = vcmp.lt.f32.partialorder %v11143_v62, 0.0  ;;  %v10669_v29 = vmul.f32 %v10588_v28, %v4931_v59  ;;  %v4949_v32 = vsub.f32 0.0, %v10446_v54  ;;  %v4711_v5 = vadd.f32 -1.4531521, %v4679_v24  ;;  %v11144_v41 = vld [vmem:[#allocation58_spill] sm:$0xff]  ;;  %v8128_v62 = vld [vmem:[%s8909_s29 + $0x248] sm:$0xff]  }
0x11ee   : > { %v8413_v18 = vpop.eup %8412  ;;  %v4695_v2 = vadd.f32 -1.4531521, %v4663_v56  ;;  %v10673_v12 = vmul.f32 %v8411_v13, %v4918_v8  ;;  %v4741_v3 = vmul.f32 %v10611_v46, %v4709_v43  ;;  %v5233_v0 = vadd.f32 1.0, %v5201_v22  ;;  %v8119_v37 = vld [vmem:[%s8909_s29 + $0x2a0] sm:$0xff]   ;;  %v8124_v56 = vld [vmem:[%s8909_s29 + $0x250] sm:$0xff]  }
0x11ef   : > { %7554 = vmatpush3.bf16.msra.mxu1 %v8114_v31  ;;  %v10676_v6 = vmul.f32 %v8413_v18, %v4936_v15  ;;  %v8415_v36 = vpop.eup %8414  ;;  %v5203_v28 = vsel %vm5139_vm3, %v5171_v1, %v5107_v53  ;;  %v5185_v45 = vsub.f32 0.0, %v5121_v40  ;;  %v10681_v63 = vmul.f32 0.5, %v11144_v41  ;;  %v11145_v31 = vld [vmem:[#allocation81_spill] sm:$0xff] }
0x11f0   : > { %7555 = vmatprep.subr.bf16.mxu1 %v8116_v60  ;;  %7576 = vmatpush3.bf16.msra.mxu0 %v8115_v38  ;;  %vm5155_vm5 = vcmp.lt.f32.partialorder %v11145_v31, 0.0  ;;  %v4725_v16 = vmul.f32 %v10598_v57, %v4693_v61  ;;  %v10686_v39 = vmul.f32 %v8415_v36, %v4920_v17  ;;  %v4965_v58 = vsub.f32 0.0, %v10493_v33  ;;  %v8121_v53 = vld [vmem:[%s8909_s29 + $0x2d8] sm:$0xff]  }
0x11f1   : > { %v5126_v9 = vsub.f32 1.0, %v10663_v42  ;;  %7577 = vmatprep.subr.bf16.mxu0 %v8117_v7  ;;  %v5123_v52 = vsub.f32 1.0, %v10669_v29  ;;  %v4981_v59 = vmul.f32 %v4949_v32, %v10446_v54  ;;  %v4951_v24 = vsub.f32 0.0, %v10500_v14  ;;  %v8123_v38 = vld [vmem:[%s8909_s29 + $0x298] sm:$0xff]   ;;  %v8126_v42 = vld [vmem:[%s8909_s29 + $0x210] sm:$0xff]  }
0x11f2   : > { %v4743_v60 = vmul.f32 %v10628_v48, %v4711_v5  ;;  %v4727_v8 = vmul.f32 %v10620_v44, %v4695_v2  ;;  %v5110_v43 = vsub.f32 1.0, %v10673_v12  ;;  %v4773_v15 = vadd.f32 1.4214138, %v4741_v3  ;;  %v11146_v2 = vld [vmem:[#allocation83_spill] sm:$0xff] }
0x11f3   : > { %7556 = vmatpush3.bf16.msra.mxu1 %v8118_v30  ;;  %v5128_v26 = vsub.f32 1.0, %v10676_v6  ;;  %v10701_v55 = vmul.f32 %v5233_v0, %v10633_v47  ;;  %v10703_v1 = vadd.f32 1.0, %v5203_v28  ;;  %v5217_v54 = vsel %vm5153_vm4, %v5185_v45, %v5121_v40  ;;  %v8125_v47 = vld [vmem:[%s8909_s29 + $0x2d0] sm:$0xff]   ;;  %v8129_v28 = vld [vmem:[%s8909_s29 + $0x2c8] sm:$0xff]  }
0x11f4   : > { %7557 = vmatprep.subr.bf16.mxu1 %v8120_v27  ;;  %v4967_v10 = vsub.f32 0.0, %v10515_v49  ;;  %7578 = vmatpush3.bf16.msra.mxu0 %v8119_v37  ;;  %v4757_v13 = vadd.f32 1.4214138, %v4725_v16  ;;  %v5112_v22 = vsub.f32 1.0, %v10686_v39  ;;  %v4997_v61 = vmul.f32 %v4965_v58, %v10493_v33  ;;  %v8130_v45 = vld [vmem:[%s8909_s29 + $0x208] sm:$0xff]  }
0x11f5   : > { %v5190_v17 = vsub.f32 0.0, %v5126_v9  ;;  %7579 = vmatprep.subr.bf16.mxu0 %v8121_v53  ;;  %v5187_v7 = vsub.f32 0.0, %v5123_v52  ;;  %v5025_v30 = vmul.f32 1.442695, %v4981_v59  ;;  %v4983_v40 = vmul.f32 %v4951_v24, %v10500_v14  ;;  %v8127_v14 = vld [vmem:[%s8909_s29 + $0x290] sm:$0xff]  }
0x11f6   : > { %v4775_v18 = vadd.f32 1.4214138, %v4743_v60  ;;  %v4759_v29 = vadd.f32 1.4214138, %v4727_v8  ;;  %v5174_v32 = vsub.f32 0.0, %v5110_v43  ;;  %v4805_v5 = vmul.f32 %v10611_v46, %v4773_v15  ;;  %v11147_v53 = vld [vmem:[#allocation84_spill] sm:$0xff] }
0x11f7   : > { %7558 = vmatpush3.bf16.msra.mxu1 %v8122_v23  ;;  %v5192_v33 = vsub.f32 0.0, %v5128_v26  ;;  %v5249_v27 = vadd.f32 1.0, %v5217_v54  ;;  %vm5142_vm6 = vcmp.lt.f32.partialorder %v11146_v2, 0.0  ;;  %v4999_v12 = vmul.f32 %v4967_v10, %v10515_v49  ;;  %v8134_v8 = vld [vmem:[%s8909_s29 + $0x200] sm:$0xff]   ;;  %v8136_v54 = vld [vmem:[%s8909_s29 + $0x378] sm:$0xff]  }
0x11f8   : > { %7559 = vmatprep.subr.bf16.mxu1 %v8124_v56  ;;  %vm5158_vm7 = vcmp.lt.f32.partialorder %v10404_v20, 0.0  ;;  %7580 = vmatpush3.bf16.msra.mxu0 %v8123_v38  ;;  %v4789_v3 = vmul.f32 %v10598_v57, %v4757_v13  ;;  %v5176_v6 = vsub.f32 0.0, %v5112_v22  ;;  %v5057_v36 = vmul.f32 1.442695, %v4997_v61  ;;  %v8132_v20 = vld [vmem:[%s8909_s29 + $0x240] sm:$0xff]   ;;  %v11148_v38 = vld [vmem:[#allocation61_spill] sm:$0xff] }
0x11f9   : > { %v5222_v0 = vsel %vm5158_vm7, %v5190_v17, %v5126_v9  ;;  %7581 = vmatprep.subr.bf16.mxu0 %v8125_v47  ;;  %v5219_v41 = vsel %vm5155_vm5, %v5187_v7, %v5123_v52  ;;  %v5029_v37 = vmul.f32 1.442695, %v4983_v40  ;;  %v4807_v49 = vmul.f32 %v10628_v48, %v4775_v18  ;;  %v8133_v56 = vld [vmem:[%s8909_s29 + $0x2c0] sm:$0xff]   ;;  %v8137_v18 = vld [vmem:[%s8909_s29 + $0x3f8] sm:$0xff]  }
0x11fa   : > { %vm5160_vm8 = vcmp.lt.f32.partialorder %v10430_v35, 0.0  ;;  %v4791_v16 = vmul.f32 %v10620_v44, %v4759_v29  ;;  %v5206_v39 = vsel %vm5142_vm6, %v5174_v32, %v5110_v43  ;;  %v4837_v58 = vadd.f32 -0.28449672, %v4805_v5  ;;  %v8131_v35 = vld [vmem:[%s8909_s29 + $0x288] sm:$0xff]  }
0x11fb   : > { %7560 = vmatpush3.bf16.msra.mxu1 %v8126_v42  ;;  %v5224_v9 = vsel %vm5160_vm8, %v5192_v33, %v5128_v26  ;;  %v5281_v31 = vmul.f32 %v5249_v27, %v10656_v34  ;;  %vm5144_vm9 = vcmp.lt.f32.partialorder %v11147_v53, 0.0  ;;  %v5061_v23 = vmul.f32 1.442695, %v4999_v12  ;;  %v8135_v42 = vld [vmem:[%s8909_s29 + $0x280] sm:$0xff]  }
0x11fc   : > { %7561 = vmatprep.subr.bf16.mxu1 %v8128_v62  ;;  %v5254_v52 = vadd.f32 1.0, %v5222_v0  ;;  %7582 = vmatpush3.bf16.msra.mxu0 %v8127_v14  ;;  %v5251_v59 = vadd.f32 1.0, %v5219_v41  ;;  %v4821_v24 = vadd.f32 -0.28449672, %v4789_v3  ;;  %v5208_v60 = vsel %vm5144_vm9, %v5176_v6, %v5112_v22  ;;  %v8138_v62 = vld [vmem:[%s8909_s29 + $0x338] sm:$0xff]   ;;  %v8142_v0 = vld [vmem:[%s8909_s29 + $0x330] sm:$0xff]  }
0x11fd   : > { %8416 = vpow2.f32 %v5057_v36  ;;  %7583 = vmatprep.subr.bf16.mxu0 %v8129_v28  ;;  %v5238_v43 = vadd.f32 1.0, %v5206_v39  ;;  %v4839_v15 = vadd.f32 -0.28449672, %v4807_v49  ;;  %v4454_v34 = vmul.f32 0.5, %v10384_v19  ;;  %v8141_v36 = vld [vmem:[%s8909_s29 + $0x3f0] sm:$0xff]  }
0x11fe   : > { %v5256_v26 = vadd.f32 1.0, %v5224_v9  ;;  %8418 = vpow2.f32 %v5025_v30  ;;  %v4823_v10 = vadd.f32 -0.28449672, %v4791_v16  ;;  %v4438_v13 = vmul.f32 0.5, %v11148_v38  ;;  %v11149_v30 = vld [vmem:[#allocation82_spill] sm:$0xff]  ;;  %v8146_v16 = vld [vmem:[%s8909_s29 + $0x328] sm:$0xff]  }
0x11ff   : > { %7562 = vmatpush3.bf16.msra.mxu1 %v8130_v45  ;;  %v4869_v22 = vmul.f32 %v10611_v46, %v4837_v58  ;;  %v5240_v61 = vadd.f32 1.0, %v5208_v60  ;;  %8420 = vpow2.f32 %v5061_v23  ;;  %v5286_v17 = vmul.f32 %v5254_v52, %v4454_v34  ;;  %v8147_v23 = vld [vmem:[%s8909_s29 + $0x3a8] sm:$0xff]   ;;  %v8152_v60 = vld [vmem:[%s8909_s29 + $0x358] sm:$0xff]  }
0x1200   : > { %7563 = vmatprep.subr.bf16.mxu1 %v8132_v20  ;;  %v4456_v47 = vmul.f32 0.5, %v10398_v11  ;;  %7584 = vmatpush3.bf16.msra.mxu0 %v8131_v35  ;;  %v5283_v19 = vmul.f32 %v5251_v59, %v10681_v63  ;;  %v4853_v7 = vmul.f32 %v10598_v57, %v4821_v24  ;;  %8422 = vpow2.f32 %v5029_v37  ;;  %v8140_v63 = vld [vmem:[%s8909_s29 + $0x370] sm:$0xff]   ;;  %v8145_v20 = vld [vmem:[%s8909_s29 + $0x3e8] sm:$0xff]   ;;  %v8149_v35 = vld [vmem:[%s8909_s29 + $0x3e0] sm:$0xff]  }
0x1201   : > { %v4440_v40 = vmul.f32 0.5, %v11149_v30  ;;  %7585 = vmatprep.subr.bf16.mxu0 %v8133_v56  ;;  %v5297_v29 = vpack.c.bf16 %v5281_v31, %v10701_v55  ;;  %v5270_v32 = vmul.f32 %v5238_v43, %v4438_v13  ;;  %v4871_v11 = vmul.f32 %v10628_v48, %v4839_v15  ;;  %v8139_v55 = vld [vmem:[%s8909_s29 + $0x3b8] sm:$0xff]   ;;  %v8143_v37 = vld [vmem:[%s8909_s29 + $0x3b0] sm:$0xff]   ;;  %v8150_v59 = vld [vmem:[%s8909_s29 + $0x320] sm:$0xff]  }
0x1202   : > { %v5288_v5 = vmul.f32 %v5256_v26, %v4456_v47  ;;  %v5267_v33 = vmul.f32 %v10703_v1, %v10646_v50  ;;  %v4901_v27 = vadd.f32 0.2548296, %v4869_v22  ;;  %v4855_v2 = vmul.f32 %v10620_v44, %v4823_v10  ;;  %v8144_v1 = vld [vmem:[%s8909_s29 + $0x368] sm:$0xff]   ;;  %v8153_v15 = vld [vmem:[%s8909_s29 + $0x3d8] sm:$0xff]   ;;  %v8159_v30 = vld [vmem:[%s8909_s29 + $0x390] sm:$0xff]  }
0x1203   : > { %7564 = vmatpush3.bf16.msra.mxu1 %v8134_v8  ;;  %v5272_v12 = vmul.f32 %v5240_v61, %v4440_v40  ;;  %v5302_v14 = vpack.c.bf16 %v5286_v17, %v5270_v32  ;;  %v4885_v6 = vadd.f32 0.2548296, %v4853_v7  ;;  %v4903_v28 = vadd.f32 0.2548296, %v4871_v11  ;;  %v8154_v34 = vld [vmem:[%s8909_s29 + $0x318] sm:$0xff]   ;;  %v8157_v61 = vld [vmem:[%s8909_s29 + $0x3d0] sm:$0xff]  }
0x1204   : > { %7593 = vmatprep.subr.bf16.mxu1 %v8136_v54  ;;  %7586 = vmatpush3.bf16.msra.mxu0 %v8135_v42  ;;  %v5299_v3 = vpack.c.bf16 %v5283_v19, %v5267_v33  ;;  %v4933_v45 = vmul.f32 %v10611_v46, %v4901_v27  ;;  %v4887_v41 = vadd.f32 0.2548296, %v4855_v2  ;;  %v8148_v46 = vld [vmem:[%s8909_s29 + $0x360] sm:$0xff]   ;;  %v8156_v54 = vld [vmem:[%s8909_s29 + $0x350] sm:$0xff]   ;;  %v8155_v13 = vld [vmem:[%s8909_s29 + $0x398] sm:$0xff]   ;;  %vm5157_vm10 = vcmp.lt.f32.partialorder %v10457_v25, 0.0 }
0x1205   : > { %7615 = vmatprep.subr.bf16.mxu0 %v8137_v18  ;;  %v5304_v50 = vpack.c.bf16 %v5288_v5, %v5272_v12  ;;  %v4917_v49 = vmul.f32 %v10598_v57, %v4885_v6  ;;  %v4935_v58 = vmul.f32 %v10628_v48, %v4903_v28  ;;  %v8158_v17 = vld [vmem:[%s8909_s29 + $0x310] sm:$0xff]   ;;  %v8160_v42 = vld [vmem:[%s8909_s29 + $0x348] sm:$0xff]   ;;  %vm5141_vm11 = vcmp.lt.f32.partialorder %v10414_v21, 0.0  ;;  %v8164_v32 = vld [vmem:[%s8909_s29 + $0x340] sm:$0xff]  }
0x1206   : > { %6533 = vmatmul.mubr.bf16.vlgmr.msra.gmra.mxu1 %v5297_v29  ;;  %v4919_v53 = vmul.f32 %v10620_v44, %v4887_v41  ;;  %v8151_v44 = vld [vmem:[%s8909_s29 + $0x3a0] sm:$0xff]   ;;  %vm5159_vm12 = vcmp.lt.f32.partialorder %v10488_v51, 0.0  ;;  %v8161_v18 = vld [vmem:[%s8909_s29 + $0x3c8] sm:$0xff]   ;;  %vm5143_vm13 = vcmp.lt.f32.partialorder %v10470_v4, 0.0  ;;  %v11150_v5 = vld [vmem:[#allocation85_spill] sm:$0xff] }
0x1207   : > { %7594 = vmatpush3.bf16.msra.mxu1 %v8138_v62  ;;  %6614 = vmatprep.mubr.bf16.mxu1 %v5302_v14  ;;  %v8162_v25 = vld [vmem:[%s8909_s29 + $0x308] sm:$0xff]   ;;  %v8165_v27 = vld [vmem:[%s8909_s29 + $0x3c0] sm:$0xff]   ;;  %v11152_v6 = vld [vmem:[#allocation73_spill] sm:$0xff] }
0x1208   : > { %7595 = vmatprep.subr.bf16.mxu1 %v8140_v63  ;;  %6574 = vmatmul.mubr.bf16.vlgmr.msra.gmra.mxu0 %v5299_v3  ;;  %v4453_v63 = vmul.f32 0.5, %v11150_v5  ;;  %v8163_v33 = vld [vmem:[%s8909_s29 + $0x388] sm:$0xff]   ;;  %v8166_v2 = vld [vmem:[%s8909_s29 + $0x300] sm:$0xff]  }
0x1209   : > { %7616 = vmatpush3.bf16.msra.mxu0 %v8139_v55  ;;  %6655 = vmatprep.mubr.bf16.mxu0 %v5304_v50  ;;  %v11151_v12 = vld [vmem:[#allocation71_spill] sm:$0xff]  ;;  %v11153_v28 = vld [vmem:[#allocation86_spill] sm:$0xff] }
0x120a   : > { %7617 = vmatprep.subr.bf16.mxu0 %v8141_v36  ;;  %v8417_v39 = vpop.eup %8416  ;;  %v4437_v14 = vmul.f32 0.5, %v11151_v12  ;;  %v4455_v36 = vmul.f32 0.5, %v11152_v6  ;;  %v4439_v50 = vmul.f32 0.5, %v11153_v28 }
0x120b   : > { %7596 = vmatpush3.bf16.msra.mxu1 %v8142_v0  ;;  %v5093_v9 = vmul.f32 %v8417_v39, %v4933_v45  ;;  %v8419_v31 = vpop.eup %8418  ;;  %v8167_v0 = vld [vmem:[%s8909_s29 + $0x380] sm:$0xff]   ;;  %s11155_s29 = sld [smem:[#allocation39_spill]] }
0x120c   : > { %7597 = vmatprep.subr.bf16.mxu1 %v8144_v1  ;;  %v8421_v57 = vpop.eup %8420  ;;  %v5077_v52 = vmul.f32 %v8419_v31, %v4917_v49 }
0x120d   : > { %7618 = vmatpush3.bf16.msra.mxu0 %v8143_v37  ;;  %v8423_v48 = vpop.eup %8422  ;;  %v5095_v24 = vmul.f32 %v8421_v57, %v4935_v58  ;;  %v5125_v56 = vsub.f32 1.0, %v5093_v9 }
0x120e   : > { %7619 = vmatprep.subr.bf16.mxu0 %v8145_v20  ;;  %v5079_v8 = vmul.f32 %v8423_v48, %v4919_v53  ;;  %v5109_v43 = vsub.f32 1.0, %v5077_v52 }
0x120f   : > { %7598 = vmatpush3.bf16.msra.mxu1 %v8146_v16  ;;  %v5127_v26 = vsub.f32 1.0, %v5095_v24  ;;  %v5189_v10 = vsub.f32 0.0, %v5125_v56 }
0x1210   : > { %7599 = vmatprep.subr.bf16.mxu1 %v8148_v46  ;;  %v5111_v38 = vsub.f32 1.0, %v5079_v8  ;;  %v5173_v22 = vsub.f32 0.0, %v5109_v43 }
0x1211   : > { %7620 = vmatpush3.bf16.msra.mxu0 %v8147_v23  ;;  %v5191_v47 = vsub.f32 0.0, %v5127_v26  ;;  %v5221_v19 = vsel %vm5157_vm10, %v5189_v10, %v5125_v56  ;;  %s7403_s11 = sshll.u32 %s11155_s29, 8 }
0x1212   : > { %7621 = vmatprep.subr.bf16.mxu0 %v8149_v35  ;;  %v5175_v7 = vsub.f32 0.0, %v5111_v38  ;;  %v5205_v40 = vsel %vm5141_vm11, %v5173_v22, %v5109_v43  ;;  %v5253_v62 = vadd.f32 1.0, %v5221_v19  ;;  %s10802_s16 = scalar_lea.hbm %s11156_s8, %s7403_s11 }
0x1213   : > { %7600 = vmatpush3.bf16.msra.mxu1 %v8150_v59  ;;  %v5223_v29 = vsel %vm5159_vm12, %v5191_v47, %v5127_v26  ;;  %v5237_v21 = vadd.f32 1.0, %v5205_v40 }
0x1214   : > { %7601 = vmatprep.subr.bf16.mxu1 %v8152_v60  ;;  %v5207_v11 = vsel %vm5143_vm13, %v5175_v7, %v5111_v38  ;;  %v5255_v51 = vadd.f32 1.0, %v5223_v29  ;;  %v5285_v55 = vmul.f32 %v5253_v62, %v4453_v63  ;;  %v7259_v60 = vld [vmem:[%s1415_s7] ss:$0 sm:$0xff]  ;;  %s6682_s7 = sshll.u32 %s8912_s12, 4  ;;  %s10804_s7 = int_to_ptr.vmem [resolvable:$true] %s6682_s7 }
0x1215   : > { %7622 = vmatpush3.bf16.msra.mxu0 %v8151_v44  ;;  %v5239_v3 = vadd.f32 1.0, %v5207_v11  ;;  %v5269_v4 = vmul.f32 %v5237_v21, %v4437_v14  ;;  %s8426_s9 = scalar_lea.vmem %s10804_s7, 256  ;;  %p8433_p5 = scmp.lt.s32.totalorder %s10804_s7, %s8431_s21 }
0x1216   : > { %7623 = vmatprep.subr.bf16.mxu0 %v8153_v15  ;;  %v5287_v1 = vmul.f32 %v5255_v51, %v4455_v36  ;;  %p8427_p1 = scmp.ne.s32.totalorder %s10804_s7, %s8426_s9  ;;  %p8434_p6 = scmp.lt.s32.totalorder %s8432_s27, %s8426_s9 }
0x1217   : > { %7602 = vmatpush3.bf16.msra.mxu1 %v8154_v34  ;;  %v5301_v45 = vpack.c.bf16 %v5285_v55, %v5269_v4  ;;  %v5271_v41 = vmul.f32 %v5239_v3, %v4439_v50 }
0x1218   : > { %7603 = vmatprep.subr.bf16.mxu1 %v8156_v54  ;;  %p8428_p2 = pnand %p8427_p1, %p8795_p3  ;;  %p8435_p7 = por %p8434_p6, %p8433_p5 }
0x1219   : > { %7624 = vmatpush3.bf16.msra.mxu0 %v8155_v13  ;;  %v5303_v37 = vpack.c.bf16 %v5287_v1, %v5271_v41 }
0x121a   : > { %7625 = vmatprep.subr.bf16.mxu0 %v8157_v61  ;;  %p8429_p4 = pneg %p8428_p2 }
0x121b   : > { %7604 = vmatpush3.bf16.msra.mxu1 %v8158_v17 }
0x121c   : > { %7605 = vmatprep.subr.bf16.mxu1 %v8160_v42  ;;  %p8436_p8 = pnand %p8435_p7, %p8429_p4 }
0x121d   : > { %7626 = vmatpush3.bf16.msra.mxu0 %v8159_v30 }
0x121e   : > { %7627 = vmatprep.subr.bf16.mxu0 %v8161_v18 }
0x121f   : > { %7606 = vmatpush3.bf16.msra.mxu1 %v8162_v25 }
0x1220   : > { %7607 = vmatprep.subr.bf16.mxu1 %v8164_v32 }
0x1221   : > { %7628 = vmatpush3.bf16.msra.mxu0 %v8163_v33 }
0x1222   : > { %7629 = vmatprep.subr.bf16.mxu0 %v8165_v27 }
0x1223   : > { %7608 = vmatpush3.bf16.msra.mxu1 %v8166_v2 }
0x1225   : > { %7630 = vmatpush3.bf16.msra.mxu0 %v8167_v0 }
0x1226   : > { %6615 = vmatmul.mubr.bf16.vlgmr.msra.gmra.mxu1 %v5301_v45 }
0x1228   : > { %6656 = vmatmul.mubr.bf16.vlgmr.msra.gmra.mxu0 %v5303_v37  ;;  %v11159_v37 = vld [vmem:[#allocation59_spill] sm:$0xff] }
0x1285   : > { %v7477_v49 = vpop.f32.mrf.mxu1 }
0x1286   : > { %v7499_v16 = vpop.f32.mrf.mxu0 }
0x1287   : > { %v7478_v20 = vpop.f32.mrf.mxu1 }
0x1288   : > { %v7500_v58 = vpop.f32.mrf.mxu0  ;;  %v7479_v48 = vadd.f32 %v7478_v20, %v7477_v49 }
0x1289   : > { %v7480_v39 = vpop.f32.mrf.mxu1  ;;  %v7501_v34 = vadd.f32 %v7500_v58, %v7499_v16 }
0x128a   : > { %v7502_v9 = vpop.f32.mrf.mxu0  ;;  %v6371_v8 = vadd.f32 %v7479_v48, %v7259_v60 }
0x128b   : > { %v7481_v46 = vpop.f32.mrf.mxu1 }
0x128c   : > { %v7503_v53 = vpop.f32.mrf.mxu0  ;;  %v7482_v44 = vadd.f32 %v7481_v46, %v7480_v39  ;;  %v6412_v10 = vadd.f32 %v7501_v34, %v6371_v8  ;;  %v11160_v39 = vld [vmem:[#allocation60_spill] sm:$0xff] }
0x128d   : > { %v7504_v22 = vadd.f32 %v7503_v53, %v7502_v9 }
0x128e   : > { %v6374_v38 = vadd.f32 %v7482_v44, %v7259_v60 }
0x1290   : > { %v6415_v42 = vadd.f32 %v7504_v22, %v6374_v38 }
0x12a6   : > { %v7521_v31 = vpop.f32.mrf.mxu1  ;;  %v7543_v57 = vpop.f32.mrf.mxu0 }
0x12a8   : > { %v7522_v23 = vpop.f32.mrf.mxu1  ;;  %v7544_v35 = vpop.f32.mrf.mxu0 }
0x12a9   : > { %v7523_v26 = vadd.f32 %v7522_v23, %v7521_v31  ;;  %v7545_v19 = vadd.f32 %v7544_v35, %v7543_v57 }
0x12aa   : > { %v7524_v52 = vpop.f32.mrf.mxu1  ;;  %v7546_v24 = vpop.f32.mrf.mxu0 }
0x12ab   : > { %v6453_v61 = vadd.f32 %v7523_v26, %v6412_v10 }
0x12ac   : > { %v7525_v59 = vpop.f32.mrf.mxu1  ;;  %v7547_v43 = vpop.f32.mrf.mxu0 }
0x12ad   : > { %v7526_v17 = vadd.f32 %v7525_v59, %v7524_v52  ;;  %v6494_v40 = vadd.f32 %v7545_v19, %v6453_v61  ;;  %v7548_v62 = vadd.f32 %v7547_v43, %v7546_v24 }
0x12af   : > { %v6456_v18 = vadd.f32 %v7526_v17, %v6415_v42 }
0x12b1   : > { %v6497_v11 = vadd.f32 %v7548_v62, %v6456_v18 }
0x12c6   : > { %v7565_v56 = vpop.f32.mrf.mxu1 }
0x12c8   : > { %v7566_v15 = vpop.f32.mrf.mxu1  ;;  %v7587_v54 = vpop.f32.mrf.mxu0 }
0x12c9   : > { %v7567_v7 = vadd.f32 %v7566_v15, %v7565_v56 }
0x12ca   : > { %v7568_v13 = vpop.f32.mrf.mxu1  ;;  %v7588_v47 = vpop.f32.mrf.mxu0 }
0x12cb   : > { %v6535_v29 = vadd.f32 %v7567_v7, %v6494_v40  ;;  %v7589_v5 = vadd.f32 %v7588_v47, %v7587_v54 }
0x12cc   : > { %v7569_v30 = vpop.f32.mrf.mxu1  ;;  %v7590_v25 = vpop.f32.mrf.mxu0 }
0x12cd   : > { %v7570_v32 = vadd.f32 %v7569_v30, %v7568_v13  ;;  %v6576_v51 = vadd.f32 %v7589_v5, %v6535_v29 }
0x12ce   : > { %v7591_v63 = vpop.f32.mrf.mxu0 }
0x12cf   : > { %v6538_v27 = vadd.f32 %v7570_v32, %v6497_v11  ;;  %v7592_v55 = vadd.f32 %v7591_v63, %v7590_v25 }
0x12d1   : > { %v6579_v0 = vadd.f32 %v7592_v55, %v6538_v27 }
0x12e6   : > { %v7609_v21 = vpop.f32.mrf.mxu1 }
0x12e8   : > { %v7610_v33 = vpop.f32.mrf.mxu1  ;;  %v7631_v2 = vpop.f32.mrf.mxu0 }
0x12e9   : > { %v7611_v12 = vadd.f32 %v7610_v33, %v7609_v21 }
0x12ea   : > { %v7612_v14 = vpop.f32.mrf.mxu1  ;;  %v7632_v6 = vpop.f32.mrf.mxu0 }
0x12eb   : > { %v6617_v3 = vadd.f32 %v7611_v12, %v6576_v51  ;;  %v7633_v36 = vadd.f32 %v7632_v6, %v7631_v2 }
0x12ec   : > { %v7613_v4 = vpop.f32.mrf.mxu1  ;;  %v7634_v28 = vpop.f32.mrf.mxu0 }
0x12ed   : > { %v7614_v50 = vadd.f32 %v7613_v4, %v7612_v14  ;;  %v6658_v1 = vadd.f32 %v7633_v36, %v6617_v3 }
0x12ee   : > { %v7635_v41 = vpop.f32.mrf.mxu0 }
0x12ef   : > { %v6620_v45 = vadd.f32 %v7614_v50, %v6579_v0  ;;  %v6664_v49 = vadd.f32 %v6658_v1, %v11159_v37  ;;  %v7636_v20 = vadd.f32 %v7635_v41, %v7634_v28 }
0x12f1   : > { %6666 = vst.msk [vmem:[%s8912_s12] sm:$0xff] %vm1438_vm1, %v6664_v49  ;;  %v6661_v16 = vadd.f32 %v7636_v20, %v6620_v45 }
0x12f3   : > { %v6665_v58 = vadd.f32 %v6661_v16, %v11160_v39 }
0x12f5   : > { %6667 = vst.msk [vmem:[%s8912_s12 + $0x8] sm:$0xff] %vm1438_vm1, %v6665_v58 }
0x12f6   : > { %8439 = shalt.err (!%p8436_p8)
}
0x12f7   : > { %s8440_s12 = scalar_lea.hbm %s10802_s16, 256  ;;  %s8444_s28 = scalar_lea.hbm %s11156_s8, 512 }
0x12f8   : > { %p8441_p10 = scmp.ne.s32.totalorder %s10802_s16, %s8440_s12  ;;  %p8445_p13 = scmp.lt.s32.totalorder %s10802_s16, %s11156_s8 }
0x12f9   : > { %p8446_p0 = scmp.lt.s32.totalorder %s8444_s28, %s8440_s12 }
0x12fa   : > { %p8442_p11 = pnand %p8441_p10, %p8795_p3 }
0x12fb   : > { %p8447_p1 = por %p8446_p0, %p8445_p13 }
0x12fc   : > { %p8443_p12 = pneg %p8442_p11 }
0x12fe   : > { %p8448_p2 = pnand %p8447_p1, %p8443_p12 }
0x1300   : > { %8451 = shalt.err (!%p8448_p2)
}
0x1301   : > { %s8584_s4 = smov 128   ;;  %s8585_s22 = smov 8  }
0x1302   : > { %7794 = dma.vmem_to_hbm [thread:$0]  (%p8795_p3), %s10804_s7, 256, %s10802_s16, %s10811_s23, %s8584_s4, %s8584_s4, %s8585_s22  }
0x1303 PF: > { %s11162_s2 = sld [smem:[#allocation42_spill]] }
0x1304   : > { %s11163_s1 = sld [smem:[#allocation35_spill]] }
0x1309   : > { %p7800_p4 = scmp.ge.s32.totalorder %s11162_s2, 2 }
0x130a   : > { %s6697_s18 = sand.u32 1, %s11163_s1  }
0x130b   : > { %p7797_p5 = pnand %p7800_p4, %p8805_p9  ;;  %s6698_s26 = scalar_lea.sflag [#allocation3], %s6697_s18 }
0x130d   : > { %p7798_p6 = pneg %p7797_p5 }
0x130f   : > { %8485 = dma.done.wait (%p7798_p6), %s6698_s26, 256  }
0x1310   : > { %8487 = vsyncadd (%p7798_p6), %s6698_s26, 4294967040  ;;  %s74_s1 = sadd.s32 1, %s11162_s2   ;;  %s11165_s15 = sld [smem:[#allocation36_spill]] }
0x1311   : > { %p71_p7 = scmp.ge.s32.totalorder %s74_s1, 6   ;;  %s11166_s16 = sld [smem:[#allocation37_spill]] }
0x1312   : > { %s11167_s18 = sld [smem:[#allocation47_spill]] }
0x1313   : > { %s11168_s22 = sld [smem:[#allocation40_spill]]  ;;  %73 = sbr.rel (!%p71_p7) target bundleno = 76 (0x4c), region = 296 }
0x1314   : > { %s11169_s23 = sld [smem:[#allocation41_spill]] }
0x1315   : > { %s11170_s26 = sld [smem:[#allocation43_spill]] }
0x1316   : > { %s11171_s28 = sld [smem:[#allocation45_spill]] }
0x1318   :  { %6703 = vsyncpa [#allocation3], 1 }
0x1319   :  { %6705 = vsyncpa [#allocation3 + $0x1], 1 }

</bundles_post_ra>
